<compile_context>
chip_gen: v6e
topology: v6e:2x2x1
jax: 0.10.0
libtpu: 0.0.40
codegen_flags: <defaults>
</compile_context>

<pallas_src>
import functools

import jax
import jax.numpy as jnp
from jax.experimental import pallas as pl
from jax.experimental.pallas import tpu as pltpu

EPS = 1e-5
EXPANSION = 4
MATMUL_DTYPE = jnp.bfloat16   # MXU-native operand dtype
ACT_DTYPE = jnp.bfloat16      # inter-pass activation storage dtype (HBM)


# --------------------------- helpers ----------------------------------------


def _vmem_limit_bytes():
    # v7x has 64 MiB physical VMEM per TensorCore -> keep headroom; v5e/v6e
    # have 128 MiB so the scoped limit (not hardware) is the constraint.
    try:
        cap = pltpu.get_tpu_info().vmem_capacity_bytes
    except Exception:
        cap = 128 * 1024 * 1024
    return 48 * 1024 * 1024 if cap <= 64 * 1024 * 1024 else 64 * 1024 * 1024


def _compiler_params(grid_rank):
    return pltpu.CompilerParams(
        dimension_semantics=("parallel",) * grid_rank,
        vmem_limit_bytes=_vmem_limit_bytes(),
    )


def _stats_rows(y):
    # y: (rows, C) f32 -> (8, C) block: row 0 = sum, row 1 = sum of squares.
    # (8-row padding keeps the stats output block (8, C)-aligned.)
    s = jnp.sum(y, axis=0, keepdims=True)
    q = jnp.sum(y * y, axis=0, keepdims=True)
    pad = jnp.zeros((6, y.shape[1]), jnp.float32)
    return jnp.concatenate([s, q, pad], axis=0)


def _row_tile(p, target):
    # Largest multiple-of-8 divisor of p that is <= target (keeps the (8,128)
    # block constraint and real pipelining). Degenerate fallback = full array.
    t = min(target, p)
    t -= t % 8
    while t >= 8:
        if p % t == 0:
            return t
        t -= 8
    # TODO(synk): pad P to a tile multiple (masking the stats rows) instead of
    # degenerating to a single grid step for pathological row counts.
    return p


def _h_tile(h, target):
    # H is the 3rd-from-last block dim -> no (8,128) constraint; any divisor.
    for t in range(min(target, h), 0, -1):
        if h % t == 0:
            return t
    return h


def _full_spec(shape):
    nz = (0,) * len(shape)
    return pl.BlockSpec(shape, lambda *_: nz)


def _fold_bn(stats, count, gamma, beta):
    # Single-pass BN fold: per-channel sum / sum-of-squares -> scale, bias.
    st = stats.reshape(-1, stats.shape[-2], stats.shape[-1])
    s = jnp.sum(st[:, 0, :], axis=0)
    q = jnp.sum(st[:, 1, :], axis=0)
    mean = s / count
    var = jnp.maximum(q / count - mean * mean, 0.0)
    scale = gamma * jax.lax.rsqrt(var + EPS)
    bias = beta - mean * scale
    return scale[None, :].astype(jnp.float32), bias[None, :].astype(jnp.float32)


# --------------------------- kernels -----------------------------------------


def _conv1x1_stats_kernel(x_ref, w_ref, y_ref, st_ref):
    # 1x1 conv == channel matmul. bf16 operands, f32 accumulation; the bf16
    # cast happens only on the stored activation (stats use the f32 acc).
    y = jnp.dot(x_ref[...].astype(MATMUL_DTYPE), w_ref[...],
                preferred_element_type=jnp.float32)
    y_ref[...] = y.astype(y_ref.dtype)
    st_ref[...] = _stats_rows(y)[None]


def _bn_conv3x3_stats_kernel(y1_ref, prev_ref, next_ref, s_ref, b_ref, w2_ref,
                             y2_ref, st_ref):
    # Folded bn1 scale/bias FMA + ReLU on an H-row tile (+1-row halo on each
    # side), then 3x3 / stride 1 / pad 1 conv as three K=3*C matmuls over a
    # single hoisted W-shift slab.
    _, TH, W, C = y1_ref.shape
    j = pl.program_id(1)
    s = s_ref[...]
    b = b_ref[...]

    def act(t):  # bf16 -> f32 BN FMA + ReLU
        return jnp.maximum(t.astype(jnp.float32) * s + b, 0.0)

    a_main = act(y1_ref[0])                       # (TH, W, C)
    # Halo rows: clamped reads, zeroed at the image borders (zero padding of
    # the post-ReLU activation == SAME conv padding).
    top_keep = jnp.where(j > 0, 1.0, 0.0)
    bot_keep = jnp.where(j < pl.num_programs(1) - 1, 1.0, 0.0)
    a_top = act(prev_ref[0]) * top_keep           # (1, W, C)
    a_bot = act(next_ref[0]) * bot_keep           # (1, W, C)

    padded = jnp.concatenate([a_top, a_main, a_bot],
                             axis=0).astype(MATMUL_DTYPE)   # (TH+2, W, C)

    # Hoisted W-shift slab: built once, reused for all 3 kh taps.
    zw = jnp.zeros((TH + 2, 1, C), MATMUL_DTYPE)
    left = jnp.concatenate([zw, padded[:, :-1, :]], axis=1)     # kw = 0
    right = jnp.concatenate([padded[:, 1:, :], zw], axis=1)     # kw = 2
    slab = jnp.concatenate([left, padded, right], axis=-1)      # (TH+2, W, 3C)

    acc = None
    for kh in range(3):
        rows = slab[kh:kh + TH]                                 # (TH, W, 3C)
        part = jnp.dot(rows.reshape(TH * W, 3 * C), w2_ref[kh],
                       preferred_element_type=jnp.float32)      # (TH*W, C)
        acc = part if acc is None else acc + part               # init w/ tap 0

    y2_ref[...] = acc.reshape(1, TH, W, C).astype(y2_ref.dtype)
    st_ref[...] = _stats_rows(acc)[None, None]


def _bn_conv1x1_stats_kernel(y2_ref, s_ref, b_ref, w3_ref, y3_ref, st_ref):
    a = jnp.maximum(y2_ref[...].astype(jnp.float32) * s_ref[...] + b_ref[...],
                    0.0)
    y3 = jnp.dot(a.astype(MATMUL_DTYPE), w3_ref[...],
                 preferred_element_type=jnp.float32)
    y3_ref[...] = y3.astype(y3_ref.dtype)
    st_ref[...] = _stats_rows(y3)[None]


def _bn_residual_kernel(y3_ref, x_ref, s_ref, b_ref, o_ref):
    # bn3-apply + residual add + final ReLU; identity re-read from HBM here.
    o_ref[...] = jnp.maximum(
        y3_ref[...].astype(jnp.float32) * s_ref[...] + b_ref[...] + x_ref[...],
        0.0)


# --------------------------- wrapper -----------------------------------------


def bottleneck_forward(x, params, *, row_tile=512, row_tile_h=32):
    """x: (N, H, W, Cin) NHWC float32.  Returns (N, H, W, Cin) NHWC float32."""
    (w1, g1, b1, w2, g2, b2, w3, g3, b3) = params
    N, H, W, Cin = x.shape
    Cw = w1.shape[1]
    Cout = w3.shape[1]
    if Cin != Cout:
        raise ValueError("downsample=None requires inplanes == planes * expansion")

    P = N * H * W
    TP = _row_tile(P, row_tile)
    nt = P // TP
    TH = _h_tile(H, row_tile_h)
    nh = H // TH
    count = jnp.float32(P)

    w1b = w1.astype(MATMUL_DTYPE)
    w2b = w2.reshape(3, 3 * Cw, Cw).astype(MATMUL_DTYPE)  # rows ordered (kw, ci)
    w3b = w3.astype(MATMUL_DTYPE)

    x2d = x.reshape(P, Cin)

    # ---- pass 1: conv1 (1x1) + bn1 partial stats ----------------------------
    y1, st1 = pl.pallas_call(
        _conv1x1_stats_kernel,
        grid=(nt,),
        in_specs=[pl.BlockSpec((TP, Cin), lambda i: (i, 0)),
                  _full_spec((Cin, Cw))],
        out_specs=(pl.BlockSpec((TP, Cw), lambda i: (i, 0)),
                   pl.BlockSpec((1, 8, Cw), lambda i: (i, 0, 0))),
        out_shape=(jax.ShapeDtypeStruct((P, Cw), ACT_DTYPE),
                   jax.ShapeDtypeStruct((nt, 8, Cw), jnp.float32)),
        compiler_params=_compiler_params(1),
        cost_estimate=pl.CostEstimate(
            flops=2 * P * Cin * Cw, transcendentals=0,
            bytes_accessed=P * Cin * 4 + P * Cw * 2 + Cin * Cw * 2
            + nt * 8 * Cw * 4),
    )(x2d, w1b)
    s1, bb1 = _fold_bn(st1, count, g1, b1)

    # ---- pass 2: bn1-apply + ReLU + conv2 (3x3) + bn2 partial stats ---------
    y1_img = y1.reshape(N, H, W, Cw)
    y2, st2 = pl.pallas_call(
        _bn_conv3x3_stats_kernel,
        grid=(N, nh),
        in_specs=[
            pl.BlockSpec((1, TH, W, Cw), lambda n, j: (n, j, 0, 0)),
            # 1-row halo above / below the tile (clamped; zeroed in-kernel).
            pl.BlockSpec((1, 1, W, Cw),
                         lambda n, j: (n, jnp.maximum(j * TH - 1, 0), 0, 0)),
            pl.BlockSpec((1, 1, W, Cw),
                         lambda n, j: (n, jnp.minimum((j + 1) * TH, H - 1), 0, 0)),
            _full_spec((1, Cw)),
            _full_spec((1, Cw)),
            _full_spec((3, 3 * Cw, Cw)),
        ],
        out_specs=(pl.BlockSpec((1, TH, W, Cw), lambda n, j: (n, j, 0, 0)),
                   pl.BlockSpec((1, 1, 8, Cw), lambda n, j: (n, j, 0, 0))),
        out_shape=(jax.ShapeDtypeStruct((N, H, W, Cw), ACT_DTYPE),
                   jax.ShapeDtypeStruct((N, nh, 8, Cw), jnp.float32)),
        compiler_params=_compiler_params(2),
        cost_estimate=pl.CostEstimate(
            flops=2 * P * 9 * Cw * Cw, transcendentals=0,
            bytes_accessed=2 * P * Cw * 2 + N * nh * 8 * Cw * 4
            + 9 * Cw * Cw * 2),
    )(y1_img, y1_img, y1_img, s1, bb1, w2b)
    s2, bb2 = _fold_bn(st2, count, g2, b2)

    # ---- pass 3: bn2-apply + ReLU + conv3 (1x1) + bn3 partial stats ---------
    y3, st3 = pl.pallas_call(
        _bn_conv1x1_stats_kernel,
        grid=(nt,),
        in_specs=[pl.BlockSpec((TP, Cw), lambda i: (i, 0)),
                  _full_spec((1, Cw)),
                  _full_spec((1, Cw)),
                  _full_spec((Cw, Cout))],
        out_specs=(pl.BlockSpec((TP, Cout), lambda i: (i, 0)),
                   pl.BlockSpec((1, 8, Cout), lambda i: (i, 0, 0))),
        out_shape=(jax.ShapeDtypeStruct((P, Cout), ACT_DTYPE),
                   jax.ShapeDtypeStruct((nt, 8, Cout), jnp.float32)),
        compiler_params=_compiler_params(1),
        cost_estimate=pl.CostEstimate(
            flops=2 * P * Cw * Cout, transcendentals=0,
            bytes_accessed=P * Cw * 2 + P * Cout * 2 + Cw * Cout * 2
            + nt * 8 * Cout * 4),
    )(y2.reshape(P, Cw), s2, bb2, w3b)
    s3, bb3 = _fold_bn(st3, count, g3, b3)

    # ---- pass 4: bn3-apply + residual add + final ReLU ----------------------
    out = pl.pallas_call(
        _bn_residual_kernel,
        grid=(nt,),
        in_specs=[pl.BlockSpec((TP, Cout), lambda i: (i, 0)),
                  pl.BlockSpec((TP, Cin), lambda i: (i, 0)),
                  _full_spec((1, Cout)),
                  _full_spec((1, Cout))],
        out_specs=pl.BlockSpec((TP, Cout), lambda i: (i, 0)),
        out_shape=jax.ShapeDtypeStruct((P, Cout), jnp.float32),
        compiler_params=_compiler_params(1),
        cost_estimate=pl.CostEstimate(
            flops=3 * P * Cout, transcendentals=0,
            bytes_accessed=P * Cout * 2 + P * Cin * 4 + P * Cout * 4),
    )(y3, x2d, s3, bb3)

    return out.reshape(N, H, W, Cout)


# --------------------------- test harness ------------------------------------


def make_params(key, inplanes, planes, base_width=64, groups=1):
    width = int(planes * (base_width / 64.0)) * groups
    ks = jax.random.split(key, 9)
    w1 = 0.1 * jax.random.normal(ks[0], (inplanes, width), jnp.float32)
    w2 = 0.1 * jax.random.normal(ks[1], (3, 3, width, width), jnp.float32)  # HWIO
    w3 = 0.1 * jax.random.normal(ks[2], (width, width * EXPANSION), jnp.float32)
    g1 = 1.0 + 0.1 * jax.random.normal(ks[3], (width,), jnp.float32)
    b1 = 0.1 * jax.random.normal(ks[4], (width,), jnp.float32)
    g2 = 1.0 + 0.1 * jax.random.normal(ks[5], (width,), jnp.float32)
    b2 = 0.1 * jax.random.normal(ks[6], (width,), jnp.float32)
    g3 = 1.0 + 0.1 * jax.random.normal(ks[7], (width * EXPANSION,), jnp.float32)
    b3 = 0.1 * jax.random.normal(ks[8], (width * EXPANSION,), jnp.float32)
    return (w1, g1, b1, w2, g2, b2, w3, g3, b3)


def reference(x, params):
    # Pure-JAX (f32) NHWC reference of the PyTorch forward (training-mode BN).
    (w1, g1, b1, w2, g2, b2, w3, g3, b3) = params

    def bn(y, g, beta):
        mean = y.mean(axis=(0, 1, 2), keepdims=True)
        var = ((y - mean) ** 2).mean(axis=(0, 1, 2), keepdims=True)
        return (y - mean) * jax.lax.rsqrt(var + EPS) * g + beta

    a = jnp.maximum(bn(x @ w1, g1, b1), 0.0)
    a = jax.lax.conv_general_dilated(
        a, w2, (1, 1), 'SAME', dimension_numbers=('NHWC', 'HWIO', 'NHWC'))
    a = jnp.maximum(bn(a, g2, b2), 0.0)
    a = bn(a @ w3, g3, b3)
    return jnp.maximum(a + x, 0.0)


if __name__ == "__main__":
    key = jax.random.PRNGKey(0)
    kx, kp = jax.random.split(key)

    # inplanes == planes * expansion so the residual add is valid
    # (downsample=None in the module).  Input is NHWC (channels-last).
    N, planes, Hs, Ws = 2, 4, 16, 16
    inplanes = planes * EXPANSION  # 16

    x = jax.random.normal(kx, (N, Hs, Ws, inplanes), jnp.float32)
    params = make_params(kp, inplanes, planes)

    # row_tile_h=8 exercises both the interior-halo and image-border paths of
    # the H-tiled 3x3 conv at H=16.
    fwd = jax.jit(functools.partial(bottleneck_forward, row_tile=512,
                                    row_tile_h=8))
    y = fwd(x, params)
    jax.block_until_ready(y)

    y_ref = reference(x, params)
    # bf16 MXU operands + bf16 inter-pass activations vs f32 reference.
    if not jnp.allclose(y, y_ref, atol=8e-2, rtol=8e-2):
        err = float(jnp.max(jnp.abs(y - y_ref)))
        raise AssertionError(
            f"Pallas kernel does not match JAX reference (max abs err {err})")
    print("KERNEL_OK")
</pallas_src>

<mosaic_0001>
module attributes {stable_mosaic.version = 11 : i64} {
  func.func @_conv1x1_stats_kernel(%arg0: i32, %arg1: memref<512x16xf32, #tpu.memory_space<vmem>>, %arg2: memref<16x4xbf16, #tpu.memory_space<vmem>>, %arg3: memref<512x4xbf16, #tpu.memory_space<vmem>>, %arg4: memref<1x8x4xf32, #tpu.memory_space<vmem>>) attributes {dimension_semantics = [#tpu.dimension_semantics<parallel>], iteration_bounds = array<i64: 1>, scalar_prefetch = 0 : i64, scratch_operands = 0 : i64, tpu.core_type = #tpu.core_type<tc>, window_params = [{transform_indices = @transform_0, window_bounds = array<i64: 512, 16>}, {pipeline_mode = #tpu.pipeline_mode<synchronous>, transform_indices = @transform_1, window_bounds = array<i64: 16, 4>}, {transform_indices = @transform_2, window_bounds = array<i64: 512, 4>}, {transform_indices = @transform_3, window_bounds = array<i64: 1, 8, 4>}]} {
    %c0 = arith.constant 0 : index
    %c0_0 = arith.constant 0 : index
    %0 = vector.load %arg1[%c0, %c0_0] : memref<512x16xf32, #tpu.memory_space<vmem>>, vector<512x16xf32>
    %1 = arith.truncf %0 : vector<512x16xf32> to vector<512x16xbf16>
    %c0_1 = arith.constant 0 : index
    %c0_2 = arith.constant 0 : index
    %2 = vector.load %arg2[%c0_1, %c0_2] : memref<16x4xbf16, #tpu.memory_space<vmem>>, vector<16x4xbf16>
    %cst = arith.constant dense<0.000000e+00> : vector<512x4xf32>
    %3 = tpu.matmul %1, %2, %cst {dimension_numbers = #tpu.dot_dimension_numbers<[1], [0], [0], [1], [0, 0, 1, 1], [], []>} : vector<512x16xbf16>, vector<16x4xbf16>, vector<512x4xf32> -> vector<512x4xf32>
    %4 = arith.truncf %3 : vector<512x4xf32> to vector<512x4xbf16>
    %c0_3 = arith.constant 0 : index
    %c0_4 = arith.constant 0 : index
    %5 = vector.load %arg3[%c0_3, %c0_4] : memref<512x4xbf16, #tpu.memory_space<vmem>>, vector<512x4xbf16>
    tpu.vector_store %arg3[%c0_3, %c0_4], %4 {strides = array<i32>} : memref<512x4xbf16, #tpu.memory_space<vmem>>, vector<512x4xbf16>,
    %cst_5 = arith.constant dense<0.000000e+00> : vector<4xf32>
    %6 = vector.multi_reduction <add>, %3, %cst_5 [0] : vector<512x4xf32> to vector<4xf32>
    %7 = vector.shape_cast %6 : vector<4xf32> to vector<1x4xf32>
    %8 = arith.mulf %3, %3 : vector<512x4xf32>
    %cst_6 = arith.constant dense<0.000000e+00> : vector<4xf32>
    %9 = vector.multi_reduction <add>, %8, %cst_6 [0] : vector<512x4xf32> to vector<4xf32>
    %10 = vector.shape_cast %9 : vector<4xf32> to vector<1x4xf32>
    %cst_7 = arith.constant 0.000000e+00 : f32
    %11 = vector.broadcast %cst_7 : f32 to vector<6x4xf32>
    %12 = tpu.concatenate %7, %10, %11 in 0 : vector<1x4xf32>, vector<1x4xf32>, vector<6x4xf32> -> vector<8x4xf32>
    %13 = vector.shape_cast %12 : vector<8x4xf32> to vector<1x8x4xf32>
    %c0_8 = arith.constant 0 : index
    %c0_9 = arith.constant 0 : index
    %c0_10 = arith.constant 0 : index
    %14 = vector.load %arg4[%c0_8, %c0_9, %c0_10] : memref<1x8x4xf32, #tpu.memory_space<vmem>>, vector<1x8x4xf32>
    tpu.vector_store %arg4[%c0_8, %c0_9, %c0_10], %13 {strides = array<i32>} : memref<1x8x4xf32, #tpu.memory_space<vmem>>, vector<1x8x4xf32>,
    return
  }
  func.func @transform_0(%arg0: i32) -> (i32, i32) {
    %c0_i32 = arith.constant 0 : i32
    %c0_i32_0 = arith.constant 0 : i32
    return %arg0, %c0_i32 : i32, i32
  }
  func.func @transform_1(%arg0: i32) -> (i32, i32) {
    %c0_i32 = arith.constant 0 : i32
    %c0_i32_0 = arith.constant 0 : i32
    %c0_i32_1 = arith.constant 0 : i32
    return %c0_i32, %c0_i32_0 : i32, i32
  }
  func.func @transform_2(%arg0: i32) -> (i32, i32) {
    %c0_i32 = arith.constant 0 : i32
    %c0_i32_0 = arith.constant 0 : i32
    return %arg0, %c0_i32 : i32, i32
  }
  func.func @transform_3(%arg0: i32) -> (i32, i32, i32) {
    %c0_i32 = arith.constant 0 : i32
    %c0_i32_0 = arith.constant 0 : i32
    %c0_i32_1 = arith.constant 0 : i32
    return %arg0, %c0_i32, %c0_i32_0 : i32, i32, i32
  }
}

module attributes {stable_mosaic.version = 11 : i64} {
  func.func @_bn_conv3x3_stats_kernel(%arg0: i32, %arg1: i32, %arg2: memref<1x8x16x4xbf16, #tpu.memory_space<vmem>>, %arg3: memref<1x1x16x4xbf16, #tpu.memory_space<vmem>>, %arg4: memref<1x1x16x4xbf16, #tpu.memory_space<vmem>>, %arg5: memref<1x4xf32, #tpu.memory_space<vmem>>, %arg6: memref<1x4xf32, #tpu.memory_space<vmem>>, %arg7: memref<3x12x4xbf16, #tpu.memory_space<vmem>>, %arg8: memref<1x8x16x4xbf16, #tpu.memory_space<vmem>>, %arg9: memref<1x1x8x4xf32, #tpu.memory_space<vmem>>) attributes {dimension_semantics = [#tpu.dimension_semantics<parallel>, #tpu.dimension_semantics<parallel>], iteration_bounds = array<i64: 2, 2>, scalar_prefetch = 0 : i64, scratch_operands = 0 : i64, tpu.core_type = #tpu.core_type<tc>, window_params = [{transform_indices = @transform_0, window_bounds = array<i64: 1, 8, 16, 4>}, {transform_indices = @transform_1, window_bounds = array<i64: 1, 1, 16, 4>}, {transform_indices = @transform_2, window_bounds = array<i64: 1, 1, 16, 4>}, {pipeline_mode = #tpu.pipeline_mode<synchronous>, transform_indices = @transform_3, window_bounds = array<i64: 1, 4>}, {pipeline_mode = #tpu.pipeline_mode<synchronous>, transform_indices = @transform_4, window_bounds = array<i64: 1, 4>}, {pipeline_mode = #tpu.pipeline_mode<synchronous>, transform_indices = @transform_5, window_bounds = array<i64: 3, 12, 4>}, {transform_indices = @transform_6, window_bounds = array<i64: 1, 8, 16, 4>}, {transform_indices = @transform_7, window_bounds = array<i64: 1, 1, 8, 4>}]} {
    %c0 = arith.constant 0 : index
    %c0_0 = arith.constant 0 : index
    %0 = vector.load %arg5[%c0, %c0_0] : memref<1x4xf32, #tpu.memory_space<vmem>>, vector<1x4xf32>
    %c0_1 = arith.constant 0 : index
    %c0_2 = arith.constant 0 : index
    %1 = vector.load %arg6[%c0_1, %c0_2] : memref<1x4xf32, #tpu.memory_space<vmem>>, vector<1x4xf32>
    %c0_3 = arith.constant 0 : index
    %c0_4 = arith.constant 0 : index
    %c0_5 = arith.constant 0 : index
    %c0_6 = arith.constant 0 : index
    %2 = vector.load %arg2[%c0_3, %c0_4, %c0_5, %c0_6] : memref<1x8x16x4xbf16, #tpu.memory_space<vmem>>, vector<1x8x16x4xbf16>
    %3 = vector.shape_cast %2 : vector<1x8x16x4xbf16> to vector<8x16x4xbf16>
    %4 = arith.extf %3 : vector<8x16x4xbf16> to vector<8x16x4xf32>
    %5 = vector.shape_cast %0 : vector<1x4xf32> to vector<1x1x4xf32>
    %6 = vector.broadcast %5 : vector<1x1x4xf32> to vector<8x16x4xf32>
    %7 = arith.mulf %4, %6 : vector<8x16x4xf32>
    %8 = vector.shape_cast %1 : vector<1x4xf32> to vector<1x1x4xf32>
    %9 = vector.broadcast %8 : vector<1x1x4xf32> to vector<8x16x4xf32>
    %10 = arith.addf %7, %9 : vector<8x16x4xf32>
    %cst = arith.constant 0.000000e+00 : f32
    %11 = vector.broadcast %cst : f32 to vector<8x16x4xf32>
    %12 = arith.maximumf %10, %11 : vector<8x16x4xf32>
    %c0_i32 = arith.constant 0 : i32
    %13 = arith.cmpi sgt, %arg1, %c0_i32 : i32
    %cst_7 = arith.constant 1.000000e+00 : f32
    %cst_8 = arith.constant 0.000000e+00 : f32
    %14 = arith.select %13, %cst_7, %cst_8 : f32
    %c1_i32 = arith.constant 1 : i32
    %15 = arith.cmpi slt, %arg1, %c1_i32 : i32
    %cst_9 = arith.constant 1.000000e+00 : f32
    %cst_10 = arith.constant 0.000000e+00 : f32
    %16 = arith.select %15, %cst_9, %cst_10 : f32
    %c0_11 = arith.constant 0 : index
    %c0_12 = arith.constant 0 : index
    %c0_13 = arith.constant 0 : index
    %c0_14 = arith.constant 0 : index
    %17 = vector.load %arg3[%c0_11, %c0_12, %c0_13, %c0_14] : memref<1x1x16x4xbf16, #tpu.memory_space<vmem>>, vector<1x1x16x4xbf16>
    %18 = vector.shape_cast %17 : vector<1x1x16x4xbf16> to vector<1x16x4xbf16>
    %19 = arith.extf %18 : vector<1x16x4xbf16> to vector<1x16x4xf32>
    %20 = vector.shape_cast %0 : vector<1x4xf32> to vector<1x1x4xf32>
    %21 = vector.broadcast %20 : vector<1x1x4xf32> to vector<1x16x4xf32>
    %22 = arith.mulf %19, %21 : vector<1x16x4xf32>
    %23 = vector.shape_cast %1 : vector<1x4xf32> to vector<1x1x4xf32>
    %24 = vector.broadcast %23 : vector<1x1x4xf32> to vector<1x16x4xf32>
    %25 = arith.addf %22, %24 : vector<1x16x4xf32>
    %cst_15 = arith.constant 0.000000e+00 : f32
    %26 = vector.broadcast %cst_15 : f32 to vector<1x16x4xf32>
    %27 = arith.maximumf %25, %26 : vector<1x16x4xf32>
    %28 = vector.broadcast %14 : f32 to vector<1x16x4xf32>
    %29 = arith.mulf %27, %28 : vector<1x16x4xf32>
    %c0_16 = arith.constant 0 : index
    %c0_17 = arith.constant 0 : index
    %c0_18 = arith.constant 0 : index
    %c0_19 = arith.constant 0 : index
    %30 = vector.load %arg4[%c0_16, %c0_17, %c0_18, %c0_19] : memref<1x1x16x4xbf16, #tpu.memory_space<vmem>>, vector<1x1x16x4xbf16>
    %31 = vector.shape_cast %30 : vector<1x1x16x4xbf16> to vector<1x16x4xbf16>
    %32 = arith.extf %31 : vector<1x16x4xbf16> to vector<1x16x4xf32>
    %33 = vector.shape_cast %0 : vector<1x4xf32> to vector<1x1x4xf32>
    %34 = vector.broadcast %33 : vector<1x1x4xf32> to vector<1x16x4xf32>
    %35 = arith.mulf %32, %34 : vector<1x16x4xf32>
    %36 = vector.shape_cast %1 : vector<1x4xf32> to vector<1x1x4xf32>
    %37 = vector.broadcast %36 : vector<1x1x4xf32> to vector<1x16x4xf32>
    %38 = arith.addf %35, %37 : vector<1x16x4xf32>
    %cst_20 = arith.constant 0.000000e+00 : f32
    %39 = vector.broadcast %cst_20 : f32 to vector<1x16x4xf32>
    %40 = arith.maximumf %38, %39 : vector<1x16x4xf32>
    %41 = vector.broadcast %16 : f32 to vector<1x16x4xf32>
    %42 = arith.mulf %40, %41 : vector<1x16x4xf32>
    %43 = tpu.concatenate %29, %12, %42 in 0 : vector<1x16x4xf32>, vector<8x16x4xf32>, vector<1x16x4xf32> -> vector<10x16x4xf32>
    %44 = arith.truncf %43 : vector<10x16x4xf32> to vector<10x16x4xbf16>
    %cst_21 = arith.constant 0.000000e+00 : bf16
    %45 = vector.broadcast %cst_21 : bf16 to vector<10x1x4xbf16>
    %46 = vector.extract_strided_slice %44 {offsets = [0, 0, 0], sizes = [10, 15, 4], strides = [1, 1, 1]} : vector<10x16x4xbf16> to vector<10x15x4xbf16>
    %47 = tpu.concatenate %45, %46 in 1 : vector<10x1x4xbf16>, vector<10x15x4xbf16> -> vector<10x16x4xbf16>
    %48 = vector.extract_strided_slice %44 {offsets = [0, 1, 0], sizes = [10, 15, 4], strides = [1, 1, 1]} : vector<10x16x4xbf16> to vector<10x15x4xbf16>
    %49 = tpu.concatenate %48, %45 in 1 : vector<10x15x4xbf16>, vector<10x1x4xbf16> -> vector<10x16x4xbf16>
    %50 = tpu.concatenate %47, %44, %49 in 2 : vector<10x16x4xbf16>, vector<10x16x4xbf16>, vector<10x16x4xbf16> -> vector<10x16x12xbf16>
    %51 = vector.extract_strided_slice %50 {offsets = [0, 0, 0], sizes = [8, 16, 12], strides = [1, 1, 1]} : vector<10x16x12xbf16> to vector<8x16x12xbf16>
    %52 = vector.shape_cast %51 : vector<8x16x12xbf16> to vector<128x12xbf16>
    %c0_22 = arith.constant 0 : index
    %c0_23 = arith.constant 0 : index
    %c0_24 = arith.constant 0 : index
    %53 = vector.load %arg7[%c0_22, %c0_23, %c0_24] : memref<3x12x4xbf16, #tpu.memory_space<vmem>>, vector<1x12x4xbf16>
    %54 = vector.shape_cast %53 : vector<1x12x4xbf16> to vector<12x4xbf16>
    %cst_25 = arith.constant dense<0.000000e+00> : vector<128x4xf32>
    %55 = tpu.matmul %52, %54, %cst_25 {dimension_numbers = #tpu.dot_dimension_numbers<[1], [0], [0], [1], [0, 0, 1, 1], [], []>} : vector<128x12xbf16>, vector<12x4xbf16>, vector<128x4xf32> -> vector<128x4xf32>
    %56 = vector.extract_strided_slice %50 {offsets = [1, 0, 0], sizes = [8, 16, 12], strides = [1, 1, 1]} : vector<10x16x12xbf16> to vector<8x16x12xbf16>
    %57 = vector.shape_cast %56 : vector<8x16x12xbf16> to vector<128x12xbf16>
    %c1 = arith.constant 1 : index
    %c0_26 = arith.constant 0 : index
    %c0_27 = arith.constant 0 : index
    %58 = vector.load %arg7[%c1, %c0_26, %c0_27] : memref<3x12x4xbf16, #tpu.memory_space<vmem>>, vector<1x12x4xbf16>
    %59 = vector.shape_cast %58 : vector<1x12x4xbf16> to vector<12x4xbf16>
    %cst_28 = arith.constant dense<0.000000e+00> : vector<128x4xf32>
    %60 = tpu.matmul %57, %59, %cst_28 {dimension_numbers = #tpu.dot_dimension_numbers<[1], [0], [0], [1], [0, 0, 1, 1], [], []>} : vector<128x12xbf16>, vector<12x4xbf16>, vector<128x4xf32> -> vector<128x4xf32>
    %61 = arith.addf %55, %60 : vector<128x4xf32>
    %62 = vector.extract_strided_slice %50 {offsets = [2, 0, 0], sizes = [8, 16, 12], strides = [1, 1, 1]} : vector<10x16x12xbf16> to vector<8x16x12xbf16>
    %63 = vector.shape_cast %62 : vector<8x16x12xbf16> to vector<128x12xbf16>
    %c2 = arith.constant 2 : index
    %c0_29 = arith.constant 0 : index
    %c0_30 = arith.constant 0 : index
    %64 = vector.load %arg7[%c2, %c0_29, %c0_30] : memref<3x12x4xbf16, #tpu.memory_space<vmem>>, vector<1x12x4xbf16>
    %65 = vector.shape_cast %64 : vector<1x12x4xbf16> to vector<12x4xbf16>
    %cst_31 = arith.constant dense<0.000000e+00> : vector<128x4xf32>
    %66 = tpu.matmul %63, %65, %cst_31 {dimension_numbers = #tpu.dot_dimension_numbers<[1], [0], [0], [1], [0, 0, 1, 1], [], []>} : vector<128x12xbf16>, vector<12x4xbf16>, vector<128x4xf32> -> vector<128x4xf32>
    %67 = arith.addf %61, %66 : vector<128x4xf32>
    %68 = vector.shape_cast %67 : vector<128x4xf32> to vector<1x8x16x4xf32>
    %69 = arith.truncf %68 : vector<1x8x16x4xf32> to vector<1x8x16x4xbf16>
    %c0_32 = arith.constant 0 : index
    %c0_33 = arith.constant 0 : index
    %c0_34 = arith.constant 0 : index
    %c0_35 = arith.constant 0 : index
    %70 = vector.load %arg8[%c0_32, %c0_33, %c0_34, %c0_35] : memref<1x8x16x4xbf16, #tpu.memory_space<vmem>>, vector<1x8x16x4xbf16>
    tpu.vector_store %arg8[%c0_32, %c0_33, %c0_34, %c0_35], %69 {strides = array<i32>} : memref<1x8x16x4xbf16, #tpu.memory_space<vmem>>, vector<1x8x16x4xbf16>,
    %cst_36 = arith.constant dense<0.000000e+00> : vector<4xf32>
    %71 = vector.multi_reduction <add>, %67, %cst_36 [0] : vector<128x4xf32> to vector<4xf32>
    %72 = vector.shape_cast %71 : vector<4xf32> to vector<1x4xf32>
    %73 = arith.mulf %67, %67 : vector<128x4xf32>
    %cst_37 = arith.constant dense<0.000000e+00> : vector<4xf32>
    %74 = vector.multi_reduction <add>, %73, %cst_37 [0] : vector<128x4xf32> to vector<4xf32>
    %75 = vector.shape_cast %74 : vector<4xf32> to vector<1x4xf32>
    %cst_38 = arith.constant 0.000000e+00 : f32
    %76 = vector.broadcast %cst_38 : f32 to vector<6x4xf32>
    %77 = tpu.concatenate %72, %75, %76 in 0 : vector<1x4xf32>, vector<1x4xf32>, vector<6x4xf32> -> vector<8x4xf32>
    %78 = vector.shape_cast %77 : vector<8x4xf32> to vector<1x1x8x4xf32>
    %c0_39 = arith.constant 0 : index
    %c0_40 = arith.constant 0 : index
    %c0_41 = arith.constant 0 : index
    %c0_42 = arith.constant 0 : index
    %79 = vector.load %arg9[%c0_39, %c0_40, %c0_41, %c0_42] : memref<1x1x8x4xf32, #tpu.memory_space<vmem>>, vector<1x1x8x4xf32>
    tpu.vector_store %arg9[%c0_39, %c0_40, %c0_41, %c0_42], %78 {strides = array<i32>} : memref<1x1x8x4xf32, #tpu.memory_space<vmem>>, vector<1x1x8x4xf32>,
    return
  }
  func.func @transform_0(%arg0: i32, %arg1: i32) -> (i32, i32, i32, i32) {
    %c0_i32 = arith.constant 0 : i32
    %c0_i32_0 = arith.constant 0 : i32
    %c0_i32_1 = arith.constant 0 : i32
    return %arg0, %arg1, %c0_i32, %c0_i32_0 : i32, i32, i32, i32
  }
  func.func @transform_1(%arg0: i32, %arg1: i32) -> (i32, i32, i32, i32) {
    %c8_i32 = arith.constant 8 : i32
    %0 = arith.muli %arg1, %c8_i32 : i32
    %c1_i32 = arith.constant 1 : i32
    %1 = arith.subi %0, %c1_i32 : i32
    %c0_i32 = arith.constant 0 : i32
    %2 = arith.maxsi %1, %c0_i32 : i32
    %c0_i32_0 = arith.constant 0 : i32
    %c0_i32_1 = arith.constant 0 : i32
    %c0_i32_2 = arith.constant 0 : i32
    return %arg0, %2, %c0_i32_0, %c0_i32_1 : i32, i32, i32, i32
  }
  func.func @transform_2(%arg0: i32, %arg1: i32) -> (i32, i32, i32, i32) {
    %c1_i32 = arith.constant 1 : i32
    %0 = arith.addi %arg1, %c1_i32 : i32
    %c8_i32 = arith.constant 8 : i32
    %1 = arith.muli %0, %c8_i32 : i32
    %c15_i32 = arith.constant 15 : i32
    %2 = arith.minsi %1, %c15_i32 : i32
    %c0_i32 = arith.constant 0 : i32
    %c0_i32_0 = arith.constant 0 : i32
    %c0_i32_1 = arith.constant 0 : i32
    return %arg0, %2, %c0_i32, %c0_i32_0 : i32, i32, i32, i32
  }
  func.func @transform_3(%arg0: i32, %arg1: i32) -> (i32, i32) {
    %c0_i32 = arith.constant 0 : i32
    %c0_i32_0 = arith.constant 0 : i32
    %c0_i32_1 = arith.constant 0 : i32
    return %c0_i32, %c0_i32_0 : i32, i32
  }
  func.func @transform_4(%arg0: i32, %arg1: i32) -> (i32, i32) {
    %c0_i32 = arith.constant 0 : i32
    %c0_i32_0 = arith.constant 0 : i32
    %c0_i32_1 = arith.constant 0 : i32
    return %c0_i32, %c0_i32_0 : i32, i32
  }
  func.func @transform_5(%arg0: i32, %arg1: i32) -> (i32, i32, i32) {
    %c0_i32 = arith.constant 0 : i32
    %c0_i32_0 = arith.constant 0 : i32
    %c0_i32_1 = arith.constant 0 : i32
    %c0_i32_2 = arith.constant 0 : i32
    return %c0_i32, %c0_i32_0, %c0_i32_1 : i32, i32, i32
  }
  func.func @transform_6(%arg0: i32, %arg1: i32) -> (i32, i32, i32, i32) {
    %c0_i32 = arith.constant 0 : i32
    %c0_i32_0 = arith.constant 0 : i32
    %c0_i32_1 = arith.constant 0 : i32
    return %arg0, %arg1, %c0_i32, %c0_i32_0 : i32, i32, i32, i32
  }
  func.func @transform_7(%arg0: i32, %arg1: i32) -> (i32, i32, i32, i32) {
    %c0_i32 = arith.constant 0 : i32
    %c0_i32_0 = arith.constant 0 : i32
    %c0_i32_1 = arith.constant 0 : i32
    return %arg0, %arg1, %c0_i32, %c0_i32_0 : i32, i32, i32, i32
  }
}

module attributes {stable_mosaic.version = 11 : i64} {
  func.func @_bn_conv1x1_stats_kernel(%arg0: i32, %arg1: memref<512x4xbf16, #tpu.memory_space<vmem>>, %arg2: memref<1x4xf32, #tpu.memory_space<vmem>>, %arg3: memref<1x4xf32, #tpu.memory_space<vmem>>, %arg4: memref<4x16xbf16, #tpu.memory_space<vmem>>, %arg5: memref<512x16xbf16, #tpu.memory_space<vmem>>, %arg6: memref<1x8x16xf32, #tpu.memory_space<vmem>>) attributes {dimension_semantics = [#tpu.dimension_semantics<parallel>], iteration_bounds = array<i64: 1>, scalar_prefetch = 0 : i64, scratch_operands = 0 : i64, tpu.core_type = #tpu.core_type<tc>, window_params = [{transform_indices = @transform_0, window_bounds = array<i64: 512, 4>}, {pipeline_mode = #tpu.pipeline_mode<synchronous>, transform_indices = @transform_1, window_bounds = array<i64: 1, 4>}, {pipeline_mode = #tpu.pipeline_mode<synchronous>, transform_indices = @transform_2, window_bounds = array<i64: 1, 4>}, {pipeline_mode = #tpu.pipeline_mode<synchronous>, transform_indices = @transform_3, window_bounds = array<i64: 4, 16>}, {transform_indices = @transform_4, window_bounds = array<i64: 512, 16>}, {transform_indices = @transform_5, window_bounds = array<i64: 1, 8, 16>}]} {
    %c0 = arith.constant 0 : index
    %c0_0 = arith.constant 0 : index
    %0 = vector.load %arg1[%c0, %c0_0] : memref<512x4xbf16, #tpu.memory_space<vmem>>, vector<512x4xbf16>
    %1 = arith.extf %0 : vector<512x4xbf16> to vector<512x4xf32>
    %c0_1 = arith.constant 0 : index
    %c0_2 = arith.constant 0 : index
    %2 = vector.load %arg2[%c0_1, %c0_2] : memref<1x4xf32, #tpu.memory_space<vmem>>, vector<1x4xf32>
    %3 = vector.broadcast %2 : vector<1x4xf32> to vector<512x4xf32>
    %4 = arith.mulf %1, %3 : vector<512x4xf32>
    %c0_3 = arith.constant 0 : index
    %c0_4 = arith.constant 0 : index
    %5 = vector.load %arg3[%c0_3, %c0_4] : memref<1x4xf32, #tpu.memory_space<vmem>>, vector<1x4xf32>
    %6 = vector.broadcast %5 : vector<1x4xf32> to vector<512x4xf32>
    %7 = arith.addf %4, %6 : vector<512x4xf32>
    %cst = arith.constant 0.000000e+00 : f32
    %8 = vector.broadcast %cst : f32 to vector<512x4xf32>
    %9 = arith.maximumf %7, %8 : vector<512x4xf32>
    %10 = arith.truncf %9 : vector<512x4xf32> to vector<512x4xbf16>
    %c0_5 = arith.constant 0 : index
    %c0_6 = arith.constant 0 : index
    %11 = vector.load %arg4[%c0_5, %c0_6] : memref<4x16xbf16, #tpu.memory_space<vmem>>, vector<4x16xbf16>
    %cst_7 = arith.constant dense<0.000000e+00> : vector<512x16xf32>
    %12 = tpu.matmul %10, %11, %cst_7 {dimension_numbers = #tpu.dot_dimension_numbers<[1], [0], [0], [1], [0, 0, 1, 1], [], []>} : vector<512x4xbf16>, vector<4x16xbf16>, vector<512x16xf32> -> vector<512x16xf32>
    %13 = arith.truncf %12 : vector<512x16xf32> to vector<512x16xbf16>
    %c0_8 = arith.constant 0 : index
    %c0_9 = arith.constant 0 : index
    %14 = vector.load %arg5[%c0_8, %c0_9] : memref<512x16xbf16, #tpu.memory_space<vmem>>, vector<512x16xbf16>
    tpu.vector_store %arg5[%c0_8, %c0_9], %13 {strides = array<i32>} : memref<512x16xbf16, #tpu.memory_space<vmem>>, vector<512x16xbf16>,
    %cst_10 = arith.constant dense<0.000000e+00> : vector<16xf32>
    %15 = vector.multi_reduction <add>, %12, %cst_10 [0] : vector<512x16xf32> to vector<16xf32>
    %16 = vector.shape_cast %15 : vector<16xf32> to vector<1x16xf32>
    %17 = arith.mulf %12, %12 : vector<512x16xf32>
    %cst_11 = arith.constant dense<0.000000e+00> : vector<16xf32>
    %18 = vector.multi_reduction <add>, %17, %cst_11 [0] : vector<512x16xf32> to vector<16xf32>
    %19 = vector.shape_cast %18 : vector<16xf32> to vector<1x16xf32>
    %cst_12 = arith.constant 0.000000e+00 : f32
    %20 = vector.broadcast %cst_12 : f32 to vector<6x16xf32>
    %21 = tpu.concatenate %16, %19, %20 in 0 : vector<1x16xf32>, vector<1x16xf32>, vector<6x16xf32> -> vector<8x16xf32>
    %22 = vector.shape_cast %21 : vector<8x16xf32> to vector<1x8x16xf32>
    %c0_13 = arith.constant 0 : index
    %c0_14 = arith.constant 0 : index
    %c0_15 = arith.constant 0 : index
    %23 = vector.load %arg6[%c0_13, %c0_14, %c0_15] : memref<1x8x16xf32, #tpu.memory_space<vmem>>, vector<1x8x16xf32>
    tpu.vector_store %arg6[%c0_13, %c0_14, %c0_15], %22 {strides = array<i32>} : memref<1x8x16xf32, #tpu.memory_space<vmem>>, vector<1x8x16xf32>,
    return
  }
  func.func @transform_0(%arg0: i32) -> (i32, i32) {
    %c0_i32 = arith.constant 0 : i32
    %c0_i32_0 = arith.constant 0 : i32
    return %arg0, %c0_i32 : i32, i32
  }
  func.func @transform_1(%arg0: i32) -> (i32, i32) {
    %c0_i32 = arith.constant 0 : i32
    %c0_i32_0 = arith.constant 0 : i32
    %c0_i32_1 = arith.constant 0 : i32
    return %c0_i32, %c0_i32_0 : i32, i32
  }
  func.func @transform_2(%arg0: i32) -> (i32, i32) {
    %c0_i32 = arith.constant 0 : i32
    %c0_i32_0 = arith.constant 0 : i32
    %c0_i32_1 = arith.constant 0 : i32
    return %c0_i32, %c0_i32_0 : i32, i32
  }
  func.func @transform_3(%arg0: i32) -> (i32, i32) {
    %c0_i32 = arith.constant 0 : i32
    %c0_i32_0 = arith.constant 0 : i32
    %c0_i32_1 = arith.constant 0 : i32
    return %c0_i32, %c0_i32_0 : i32, i32
  }
  func.func @transform_4(%arg0: i32) -> (i32, i32) {
    %c0_i32 = arith.constant 0 : i32
    %c0_i32_0 = arith.constant 0 : i32
    return %arg0, %c0_i32 : i32, i32
  }
  func.func @transform_5(%arg0: i32) -> (i32, i32, i32) {
    %c0_i32 = arith.constant 0 : i32
    %c0_i32_0 = arith.constant 0 : i32
    %c0_i32_1 = arith.constant 0 : i32
    return %arg0, %c0_i32, %c0_i32_0 : i32, i32, i32
  }
}

module attributes {stable_mosaic.version = 11 : i64} {
  func.func @_bn_residual_kernel(%arg0: i32, %arg1: memref<512x16xbf16, #tpu.memory_space<vmem>>, %arg2: memref<512x16xf32, #tpu.memory_space<vmem>>, %arg3: memref<1x16xf32, #tpu.memory_space<vmem>>, %arg4: memref<1x16xf32, #tpu.memory_space<vmem>>, %arg5: memref<512x16xf32, #tpu.memory_space<vmem>>) attributes {dimension_semantics = [#tpu.dimension_semantics<parallel>], iteration_bounds = array<i64: 1>, scalar_prefetch = 0 : i64, scratch_operands = 0 : i64, tpu.core_type = #tpu.core_type<tc>, window_params = [{transform_indices = @transform_0, window_bounds = array<i64: 512, 16>}, {transform_indices = @transform_1, window_bounds = array<i64: 512, 16>}, {pipeline_mode = #tpu.pipeline_mode<synchronous>, transform_indices = @transform_2, window_bounds = array<i64: 1, 16>}, {pipeline_mode = #tpu.pipeline_mode<synchronous>, transform_indices = @transform_3, window_bounds = array<i64: 1, 16>}, {transform_indices = @transform_4, window_bounds = array<i64: 512, 16>}]} {
    %c0 = arith.constant 0 : index
    %c0_0 = arith.constant 0 : index
    %0 = vector.load %arg1[%c0, %c0_0] : memref<512x16xbf16, #tpu.memory_space<vmem>>, vector<512x16xbf16>
    %1 = arith.extf %0 : vector<512x16xbf16> to vector<512x16xf32>
    %c0_1 = arith.constant 0 : index
    %c0_2 = arith.constant 0 : index
    %2 = vector.load %arg3[%c0_1, %c0_2] : memref<1x16xf32, #tpu.memory_space<vmem>>, vector<1x16xf32>
    %3 = vector.broadcast %2 : vector<1x16xf32> to vector<512x16xf32>
    %4 = arith.mulf %1, %3 : vector<512x16xf32>
    %c0_3 = arith.constant 0 : index
    %c0_4 = arith.constant 0 : index
    %5 = vector.load %arg4[%c0_3, %c0_4] : memref<1x16xf32, #tpu.memory_space<vmem>>, vector<1x16xf32>
    %6 = vector.broadcast %5 : vector<1x16xf32> to vector<512x16xf32>
    %7 = arith.addf %4, %6 : vector<512x16xf32>
    %c0_5 = arith.constant 0 : index
    %c0_6 = arith.constant 0 : index
    %8 = vector.load %arg2[%c0_5, %c0_6] : memref<512x16xf32, #tpu.memory_space<vmem>>, vector<512x16xf32>
    %9 = arith.addf %7, %8 : vector<512x16xf32>
    %cst = arith.constant 0.000000e+00 : f32
    %10 = vector.broadcast %cst : f32 to vector<512x16xf32>
    %11 = arith.maximumf %9, %10 : vector<512x16xf32>
    %c0_7 = arith.constant 0 : index
    %c0_8 = arith.constant 0 : index
    %12 = vector.load %arg5[%c0_7, %c0_8] : memref<512x16xf32, #tpu.memory_space<vmem>>, vector<512x16xf32>
    tpu.vector_store %arg5[%c0_7, %c0_8], %11 {strides = array<i32>} : memref<512x16xf32, #tpu.memory_space<vmem>>, vector<512x16xf32>,
    return
  }
  func.func @transform_0(%arg0: i32) -> (i32, i32) {
    %c0_i32 = arith.constant 0 : i32
    %c0_i32_0 = arith.constant 0 : i32
    return %arg0, %c0_i32 : i32, i32
  }
  func.func @transform_1(%arg0: i32) -> (i32, i32) {
    %c0_i32 = arith.constant 0 : i32
    %c0_i32_0 = arith.constant 0 : i32
    return %arg0, %c0_i32 : i32, i32
  }
  func.func @transform_2(%arg0: i32) -> (i32, i32) {
    %c0_i32 = arith.constant 0 : i32
    %c0_i32_0 = arith.constant 0 : i32
    %c0_i32_1 = arith.constant 0 : i32
    return %c0_i32, %c0_i32_0 : i32, i32
  }
  func.func @transform_3(%arg0: i32) -> (i32, i32) {
    %c0_i32 = arith.constant 0 : i32
    %c0_i32_0 = arith.constant 0 : i32
    %c0_i32_1 = arith.constant 0 : i32
    return %c0_i32, %c0_i32_0 : i32, i32
  }
  func.func @transform_4(%arg0: i32) -> (i32, i32) {
    %c0_i32 = arith.constant 0 : i32
    %c0_i32_0 = arith.constant 0 : i32
    return %arg0, %c0_i32 : i32, i32
  }
}

</mosaic_0001>

<bundles_post_ra>
// kernel: bottleneck_forward.5
= control target key start
LH: loop header
LB: loop body
LE: loop exit
PB: predicated region body
PF: predicated region fallthrough
CT: control target
= control target key end

     0   :  { %s1950_s24 = smov 0   ;;  %s1952_s25 = smov 0   ;;  %s2469_s0 = inlined_call_operand.vmem [shape: bf16[2,16,16,4], index: 0, kind: input, shape index: {}, may-alias: {0,1,2}]   ;;  %s2470_s1 = inlined_call_operand.vmem [shape: bf16[2,16,16,4], index: 1, kind: input, shape index: {}, may-alias: {0,1,2}]   ;;  %s2471_s2 = inlined_call_operand.vmem [shape: bf16[2,16,16,4], index: 2, kind: input, shape index: {}, may-alias: {0,1,2}]   ;;  %s2472_s3 = inlined_call_operand.vmem [shape: f32[1,4], index: 3, kind: input, shape index: {}]   ;;  %s2473_s4 = inlined_call_operand.vmem [shape: f32[1,4], index: 4, kind: input, shape index: {}]   ;;  %s2474_s5 = inlined_call_operand.vmem [shape: bf16[3,12,4], index: 5, kind: input, shape index: {}]   ;;  %s2475_s6 = inlined_call_operand.vmem [shape: bf16[2,16,16,4], index: 6, kind: output, shape index: {0}]   ;;  %s2476_s7 = inlined_call_operand.vmem [shape: f32[2,2,8,4], index: 7, kind: output, shape index: {1}]  }
   0x1   :  { %s1954_s26 = smov 0   ;;  %s1956_s27 = smov 0  }
   0x2   :  { %s1958_s28 = smov 0  }
   0x3 LB: > { %s27_s29 = sadd.s32 1, %s1898_s26  ;;  %s30_s30 = sadd.s32 1, %s1902_s27  ;;  %s1906_s28 = sphi %s1958_s28, %s18_s28   ;;  %s1902_s27 = sphi %s1956_s27, %s2485_s27   ;;  %s1898_s26 = sphi %s1954_s26, %s2484_s26   ;;  %s1894_s25 = sphi %s1952_s25, %s2483_s25   ;;  %s1890_s24 = sphi %s1950_s24, %s2482_s24  }
   0x4   : > { %p28_p0 = scmp.ge.s32.totalorder %s27_s29, 2  ;;  %p1586_p1 = scmp.ge.s32.totalorder %s1906_s28, 1 }
   0x5   : > { %p328_p2 = scmp.lt.s32.totalorder %s1906_s28, 5 }
   0x6   : > { %s2487_s29 = smov (%p28_p0, %s27_s29), 0  ;;  %s2489_s30 = smov (!%p28_p0, %s30_s30), %s1902_s27 }
   0x7   : > { %p329_p3 = pnand %p1586_p1, %p328_p2  ;;  %p32_p4 = scmp.ge.s32.totalorder %s2489_s30, 2 }
   0x8   : > { %s1983_s8 = sshll.u32 (!%p329_p3), %s1890_s24, 3  ;;  %p405_p5 = scmp.lt.s32.totalorder (!%p329_p3), %s1894_s25, 1 }
   0x9   : > { %s2491_s30 = smov (%p32_p4, %s2489_s30), 0  ;;  %332 = sbr.rel (%p329_p3) target bundleno = 437 (0x1b5), region = 44 }
   0xa   : > { %p407_p6 = scmp.lt.s32.totalorder (!%p329_p3), %s1983_s8, 15  ;;  %s1993_s12 = sadd.s32 (!%p329_p3), 4294967295, %s1983_s8 }
   0xb   : > { %p417_p7 = scmp.gt.s32.totalorder (!%p329_p3), %s1993_s12, 0  ;;  %p1593_p8 = scmp.lt.s32.totalorder (!%p329_p3), %s1993_s12, 15 }
   0xc   : > { %s1672_s20 = sadd.s32 (!%p329_p3), 8, %s1983_s8  ;;  %p462_p10 = scmp.lt.s32.totalorder (!%p329_p3), %s1890_s24, 1 }
   0xd   : > { %p2036_p9 = scmp.lt.s32.totalorder (!%p329_p3), %s1672_s20, 15  ;;  %p563_p11 = scmp.gt.s32.totalorder (!%p329_p3), %s1890_s24, 0 }
   0xe   : > { %s2493_s25 = smov (!%p405_p5, %s1894_s25), 1  ;;  %v2010_v0 = vld [vmem:[%s2472_s3] ss:$0 sm:$0xff]  ;;  %vm726_vm0 = vcmask 1047552   ;;  %vm727_vm1 = vsmask.f32 7424 }
   0xf   : > { %s408_s9 = scalar_select %p407_p6, %s1983_s8, 15  ;;  %v2021_v9 = vld [vmem:[%s2473_s4] ss:$0 sm:$0xff]  ;;  %vm2106_vm2 = vmand %vm726_vm0, %vm727_vm1  ;;  %vm878_vm3 = vcmask 1045504   ;;  %vm683_vm4 = vcmask 1040384   ;;  %vm799_vm7 = vcmask 31744  }
  0x10   : > { %s1990_s10 = sshll.u32 %s2493_s25, 5  ;;  %s2497_s20 = smov (!%p2036_p9, %s1672_s20), 15  ;;  %vm684_vm5 = vsmask.f32 256  ;;  %vm861_vm8 = vcmask 97280   ;;  %vm830_vm9 = vcmask 64512  }
  0x11   : > { %s1588_s11 = sshll.u32 %s408_s9, 1  ;;  %s2499_s20 = smov (!%p2036_p9, %s2497_s20), 15  ;;  %vm2276_vm6 = vmand %vm683_vm4, %vm684_vm5  ;;  %vm1276_vm10 = vcmask 27648   ;;  %vm1385_vm11 = vcmask 1041408  }
  0x12   : > { %s1996_s13 = sadd.s32 %s1990_s10, %s1588_s11  ;;  %s1612_s11 = sshll.u32 %s2493_s25, 1 }
  0x13   : > { %s1590_s14 = sshll.u32 %s1996_s13, 2  ;;  %s1908_s25 = smov 4  }
  0x14   : > { %s2005_s17 = scalar_lea.vmem %s2469_s0, %s1590_s14  ;;  %s2098_s16 = sshll.u32 %s2499_s20, 1 }
  0x15   : > { %v1732_v1 = vld [vmem:[%s2005_s17 + $0x20] sm:$0xff]   ;;  %v1733_v3 = vld [vmem:[%s2005_s17 + $0x28] sm:$0xff]   ;;  %s418_s23 = scalar_select %p417_p7, %s1993_s12, 0  ;;  %v1734_v30 = vld [vmem:[%s2005_s17 + $0x30] sm:$0xff]  }
  0x16   : > { %v1690_v2 = vld [vmem:[%s2005_s17] sm:$0xff]   ;;  %v1707_v4 = vunpack.c.l.bf16 %v1732_v1  ;;  %v1708_v5 = vunpack.c.h.bf16 %v1732_v1  ;;  %v1729_v8 = vld [vmem:[%s2005_s17 + $0x8] sm:$0xff]   ;;  %v1711_v10 = vunpack.c.l.bf16 %v1733_v3  ;;  %v1712_v11 = vunpack.c.h.bf16 %v1733_v3  ;;  %v1735_v31 = vld [vmem:[%s2005_s17 + $0x38] sm:$0xff]   ;;  %s463_s12 = scalar_select %p462_p10, %s1890_s24, 1 }
  0x17   : > { %v1691_v6 = vunpack.c.l.bf16 %v1690_v2  ;;  %v1692_v7 = vunpack.c.h.bf16 %v1690_v2  ;;  %v1695_v12 = vunpack.c.l.bf16 %v1729_v8  ;;  %v1696_v13 = vunpack.c.h.bf16 %v1729_v8  ;;  %s2495_s23 = smov (!%p1593_p8, %s418_s23), 15  ;;  %v1730_v40 = vld [vmem:[%s2005_s17 + $0x10] sm:$0xff]   ;;  %s442_s19 = sadd.s32 %s2098_s16, %s1990_s10 }
  0x18   : > { %v517_v14 = vmul.f32 %v1707_v4, %v2010_v0  ;;  %v518_v15 = vmul.f32 %v1708_v5, %v2010_v0  ;;  %v519_v18 = vmul.f32 %v1711_v10, %v2010_v0  ;;  %v520_v19 = vmul.f32 %v1712_v11, %v2010_v0  ;;  %s2083_s8 = sadd.s32 %s1612_s11, %s463_s12  ;;  %s1598_s15 = sshll.u32 %s2495_s23, 1 }
  0x19   : > { %v509_v16 = vmul.f32 %v1691_v6, %v2010_v0  ;;  %v510_v17 = vmul.f32 %v1692_v7, %v2010_v0  ;;  %v511_v20 = vmul.f32 %v1695_v12, %v2010_v0  ;;  %v512_v21 = vmul.f32 %v1696_v13, %v2010_v0  ;;  %s2113_s18 = sadd.s32 %s1598_s15, %s1990_s10  ;;  %s2143_s10 = sshll.u32 %s442_s19, 2 }
  0x1a   : > { %v539_v22 = vadd.f32 %v2021_v9, %v517_v14  ;;  %v540_v23 = vadd.f32 %v2021_v9, %v518_v15  ;;  %v541_v26 = vadd.f32 %v2021_v9, %v519_v18  ;;  %v542_v27 = vadd.f32 %v2021_v9, %v520_v19  ;;  %v1731_v18 = vld [vmem:[%s2005_s17 + $0x18] sm:$0xff]   ;;  %s1600_s20 = sshll.u32 %s2113_s18, 2  ;;  %s1909_s23 = smov 8  }
  0x1b   : > { %v531_v24 = vadd.f32 %v2021_v9, %v509_v16  ;;  %v532_v25 = vadd.f32 %v2021_v9, %v510_v17  ;;  %v533_v28 = vadd.f32 %v2021_v9, %v511_v20  ;;  %v534_v29 = vadd.f32 %v2021_v9, %v512_v21  ;;  %s427_s22 = scalar_lea.vmem %s2470_s1, %s1600_s20  ;;  %s444_s12 = scalar_lea.vmem %s2471_s2, %s2143_s10 }
  0x1c   : > { %v555_v32 = vmax.f32 %v539_v22, 0.0  ;;  %v556_v33 = vmax.f32 %v540_v23, 0.0  ;;  %v557_v36 = vmax.f32 %v541_v26, 0.0  ;;  %v558_v37 = vmax.f32 %v542_v27, 0.0  ;;  %s2181_s15 = scalar_select %p563_p11, 1.0, 0.0 }
  0x1d   : > { %v547_v34 = vmax.f32 %v531_v24, 0.0  ;;  %v548_v35 = vmax.f32 %v532_v25, 0.0  ;;  %v549_v38 = vmax.f32 %v533_v28, 0.0  ;;  %v550_v39 = vmax.f32 %v534_v29, 0.0  ;;  %s566_s16 = scalar_select %p462_p10, 1.0, 0.0 }
  0x1e   : > { %v2063_v41 = vpack.c.bf16 %v556_v33, %v555_v32  ;;  %v1715_v43 = vunpack.c.l.bf16 %v1734_v30  ;;  %v1716_v44 = vunpack.c.h.bf16 %v1734_v30  ;;  %v2070_v45 = vpack.c.bf16 %v558_v37, %v557_v36  ;;  %s1613_s13 = sshll.u32 %s2083_s8, 3 }
  0x1f   : > { %v2065_v42 = vpack.c.bf16 %v548_v35, %v547_v34  ;;  %v2072_v46 = vpack.c.bf16 %v550_v39, %v549_v38  ;;  %v1719_v47 = vunpack.c.l.bf16 %v1735_v31  ;;  %v1720_v48 = vunpack.c.h.bf16 %v1735_v31  ;;  %s467_s9 = scalar_lea.vmem %s2476_s7, %s1613_s13 }
  0x20   : > { %759 = vrot.lane.b32.xlu0 %v2063_v41, %s1908_s25  ;;  %v521_v49 = vmul.f32 %v1715_v43, %v2010_v0  ;;  %v522_v50 = vmul.f32 %v1716_v44, %v2010_v0  ;;  %v1699_v51 = vunpack.c.l.bf16 %v1730_v40  ;;  %v1700_v52 = vunpack.c.h.bf16 %v1730_v40 }
  0x21   : > { %751 = vrot.lane.b32.xlu1 %v2065_v42, %s1908_s25  ;;  %v523_v53 = vmul.f32 %v1719_v47, %v2010_v0  ;;  %v524_v54 = vmul.f32 %v1720_v48, %v2010_v0  ;;  %v646_v55 = vshrl.u32 %v2070_v45, 16  ;;  %v649_v56 = vshll.u32 %v2070_v45, 16  ;;  %v1722_v47 = vld [vmem:[%s427_s22] sm:$0xff]   ;;  %s2374_s22 = scalar_lea.vmem %s2475_s6, %s1590_s14 }
  0x22   : > { %v543_v57 = vadd.f32 %v2021_v9, %v521_v49  ;;  %v544_v58 = vadd.f32 %v2021_v9, %v522_v50  ;;  %v513_v59 = vmul.f32 %v1699_v51, %v2010_v0  ;;  %v514_v60 = vmul.f32 %v1700_v52, %v2010_v0 }
  0x23   : > { %v545_v61 = vadd.f32 %v2021_v9, %v523_v53  ;;  %v546_v62 = vadd.f32 %v2021_v9, %v524_v54  ;;  %v708_v63 = vrot.slane %v649_v56, 1  ;;  %v639_v10 = vshrl.u32 %v2063_v41, 16 }
  0x24   : > { %761 = vrot.lane.b32.xlu0 %v2070_v45, %s1908_s25  ;;  %v559_v1 = vmax.f32 %v543_v57, 0.0  ;;  %v560_v2 = vmax.f32 %v544_v58, 0.0  ;;  %v535_v4 = vadd.f32 %v2021_v9, %v513_v59  ;;  %v536_v5 = vadd.f32 %v2021_v9, %v514_v60  ;;  %v1726_v57 = vld [vmem:[%s444_s12] sm:$0xff]  }
  0x25   : > { %753 = vrot.lane.b32.xlu1 %v2072_v46, %s1908_s25  ;;  %v561_v6 = vmax.f32 %v545_v61, 0.0  ;;  %v562_v7 = vmax.f32 %v546_v62, 0.0  ;;  %v709_v8 = vor.u32 %v708_v63, %v646_v55  ;;  %v642_v14 = vshll.u32 %v2063_v41, 16 }
  0x26   : > { %v2116_v11 = vpack.c.bf16 %v560_v2, %v559_v1  ;;  %v551_v12 = vmax.f32 %v535_v4, 0.0  ;;  %v552_v13 = vmax.f32 %v536_v5, 0.0  ;;  %v2123_v16 = vrot.slane %v646_v55, 7 }
  0x27   : > { %v2121_v15 = vpack.c.bf16 %v562_v7, %v561_v6  ;;  %v735_v17 = vsel %vm2106_vm2, %v709_v8, 0  ;;  %v706_v20 = vrot.slane %v642_v14, 1  ;;  %v611_v21 = vshrl.u32 %v2065_v42, 16 }
  0x28   : > { %763 = vrot.lane.b32.xlu0 %v2116_v11, %s1908_s25  ;;  %v2131_v19 = vpack.c.bf16 %v552_v13, %v551_v12  ;;  %v614_v22 = vshll.u32 %v2065_v42, 16  ;;  %v618_v23 = vshrl.u32 %v2072_v46, 16  ;;  %v621_v24 = vshll.u32 %v2072_v46, 16 }
  0x29   : > { %765 = vrot.lane.b32.xlu1 %v2121_v15, %s1908_s25  ;;  %v653_v25 = vshrl.u32 %v2116_v11, 16  ;;  %v656_v26 = vshll.u32 %v2116_v11, 16  ;;  %v641_v27 = vrot.slane %v639_v10, 7  ;;  %v707_v28 = vor.u32 %v706_v20, %v639_v10  ;;  %v1866_v11 = vld [vmem:[%s2474_s5] sm:$0x3f]  }
  0x2a   : > { %v698_v29 = vrot.slane %v614_v22, 1  ;;  %v1703_v30 = vunpack.c.l.bf16 %v1731_v18  ;;  %v2150_v31 = vrot.slane %v611_v21, 7  ;;  %v700_v32 = vrot.slane %v621_v24, 1 }
  0x2b   : > { %v710_v33 = vrot.slane %v656_v26, 1  ;;  %v1704_v34 = vunpack.c.h.bf16 %v1731_v18  ;;  %v2158_v36 = vrot.slane %v618_v23, 7  ;;  %v660_v38 = vshrl.u32 %v2121_v15, 16 }
  0x2c   : > { %791 = vrot.lane.b32.xlu0 %v735_v17, %s1909_s23  ;;  %v699_v35 = vor.u32 %v698_v29, %v611_v21  ;;  %v515_v37 = vmul.f32 %v1703_v30, %v2010_v0  ;;  %v701_v39 = vor.u32 %v700_v32, %v618_v23  ;;  %v663_v44 = vshll.u32 %v2121_v15, 16 }
  0x2d   : > { %755 = vrot.lane.b32.xlu1 %v2131_v19, %s1908_s25  ;;  %v711_v40 = vor.u32 %v710_v33, %v653_v25  ;;  %v516_v43 = vmul.f32 %v1704_v34, %v2010_v0  ;;  %v734_v48 = vsel %vm2106_vm2, %v707_v28, 0  ;;  %v655_v50 = vrot.slane %v653_v25, 7 }
  0x2e   : > { %v730_v49 = vsel %vm2106_vm2, %v699_v35, 0  ;;  %v537_v51 = vadd.f32 %v2021_v9, %v515_v37  ;;  %v662_v53 = vrot.slane %v660_v38, 7  ;;  %v712_v54 = vrot.slane %v663_v44, 1 }
  0x2f   : > { %v538_v52 = vadd.f32 %v2021_v9, %v516_v43  ;;  %v625_v55 = vshrl.u32 %v2131_v19, 16  ;;  %v731_v58 = vsel %vm2106_vm2, %v701_v39, 0  ;;  %v628_v60 = vshll.u32 %v2131_v19, 16 }
  0x30   : > { %781 = vrot.lane.b32.xlu0 %v730_v49, %s1909_s23  ;;  %v553_v59 = vmax.f32 %v537_v51, 0.0  ;;  %v1723_v61 = vunpack.c.l.bf16 %v1722_v47  ;;  %v736_v62 = vsel %vm2106_vm2, %v711_v40, 0  ;;  %v713_v1 = vor.u32 %v712_v54, %v660_v38 }
  0x31   : > { %789 = vrot.lane.b32.xlu1 %v734_v48, %s1909_s23  ;;  %v554_v63 = vmax.f32 %v538_v52, 0.0  ;;  %v1724_v2 = vunpack.c.h.bf16 %v1722_v47  ;;  %v702_v4 = vrot.slane %v628_v60, 1  ;;  %v1727_v6 = vunpack.c.l.bf16 %v1726_v57 }
  0x32   : > { %v571_v5 = vmul.f32 %v1723_v61, %v2010_v0  ;;  %v1728_v7 = vunpack.c.h.bf16 %v1726_v57  ;;  %v737_v10 = vsel %vm2106_vm2, %v713_v1, 0  ;;  %v577_v13 = vstv %s2181_s15 }
  0x33   : > { %v2191_v8 = vpack.c.bf16 %v554_v63, %v553_v59  ;;  %v572_v12 = vmul.f32 %v1724_v2, %v2010_v0  ;;  %v703_v17 = vor.u32 %v702_v4, %v625_v55  ;;  %v584_v19 = vmul.f32 %v1727_v6, %v2010_v0 }
  0x34   : > { %793 = vrot.lane.b32.xlu0 %v736_v62, %s1909_s23  ;;  %v573_v18 = vadd.f32 %v2021_v9, %v571_v5  ;;  %v585_v20 = vmul.f32 %v1728_v7, %v2010_v0  ;;  %v2209_v28 = vor.u32 %v642_v14, %v641_v27  ;;  %v627_v29 = vrot.slane %v625_v55, 7 }
  0x35   : > { %783 = vrot.lane.b32.xlu1 %v731_v58, %s1909_s23  ;;  %v632_v21 = vshrl.u32 %v2191_v8, 16  ;;  %v635_v23 = vshll.u32 %v2191_v8, 16  ;;  %v574_v25 = vadd.f32 %v2021_v9, %v572_v12  ;;  %v586_v32 = vadd.f32 %v2021_v9, %v584_v19 }
  0x36   : > { %v575_v30 = vmax.f32 %v573_v18, 0.0  ;;  %v587_v33 = vadd.f32 %v2021_v9, %v585_v20  ;;  %v732_v0 = vsel %vm2106_vm2, %v703_v17, 0  ;;  %v590_v37 = vstv %s566_s16 }
  0x37   : > { %v704_v34 = vrot.slane %v635_v23, 1  ;;  %v576_v35 = vmax.f32 %v574_v25, 0.0  ;;  %v588_v39 = vmax.f32 %v586_v32, 0.0  ;;  %v2219_v41 = vor.u32 %v614_v22, %v2150_v31  ;;  %v1865_v22 = vld [vmem:[%s2474_s5 + $0x8] sm:$0x3f]  }
  0x38   : > { %795 = vrot.lane.b32.xlu0 %v737_v10, %s1909_s23  ;;  %v578_v38 = vmul.f32 %v577_v13, %v575_v30  ;;  %v589_v40 = vmax.f32 %v587_v33, 0.0  ;;  %v2226_v27 = vor.u32 %v649_v56, %v2123_v16  ;;  %v2231_v43 = vor.u32 %v621_v24, %v2158_v36  ;;  %1820 = vmatprep.subr.msk.bf16.mxu1 %vm878_vm3, %v1865_v22 }
  0x39   : > { %757 = vrot.lane.b32.xlu1 %v2191_v8, %s1908_s25  ;;  %v705_v9 = vor.u32 %v704_v34, %v632_v21  ;;  %v579_v14 = vmul.f32 %v577_v13, %v576_v35  ;;  %v591_v47 = vmul.f32 %v590_v37, %v588_v39  ;;  %v2235_v42 = vor.u32 %v656_v26, %v655_v50  ;;  %v1867_v26 = vld [vmem:[%s2474_s5 + $0x10] sm:$0x3f]  }
  0x3a   : > { %v592_v48 = vmul.f32 %v590_v37, %v589_v40  ;;  %v634_v16 = vrot.slane %v632_v21, 7  ;;  %v2245_v24 = vor.u32 %v663_v44, %v662_v53  ;;  %v2254_v49 = vor.u32 %v628_v60, %v627_v29  ;;  %1819 = vmatprep.subr.msk.bf16.mxu0 %vm878_vm3, %v1865_v22 }
  0x3b   : > { %v733_v45 = vsel %vm2106_vm2, %v705_v9, 0  ;;  %v593_v56 = vpack.c.bf16 %v579_v14, %v578_v38  ;;  %v880_v15 = vsel %vm878_vm3, %v1865_v22, 0  ;;  %v987_v54 = vsel %vm878_vm3, %v1866_v11, 0 }
  0x3c   : > { %785 = vrot.lane.b32.xlu0 %v732_v0, %s1909_s23  ;;  %v602_v46 = vpack.c.bf16 %v592_v48, %v591_v47  ;;  %1818 = vmatpush3.bf16.msra.mxu1 %v880_v15  ;;  %v1097_v55 = vsel %vm878_vm3, %v1867_v26, 0  ;;  %v637_v58 = vor.u32 %v635_v23, %v634_v16  ;;  %v687_v12 = vsel %vm2276_vm6, 0, %v2219_v41 }
  0x3d   : > { %787 = vrot.lane.b32.xlu1 %v733_v45, %s1909_s23  ;;  %v604_v31 = vshrl.u32 %v593_v56, 16  ;;  %v607_v36 = vshll.u32 %v593_v56, 16  ;;  %1764 = vmatpush3.bf16.msra.mxu0 %v880_v15  ;;  %v691_v17 = vsel %vm2276_vm6, 0, %v2209_v28  ;;  %v692_v18 = vsel %vm2276_vm6, 0, %v2226_v27 }
  0x3e   : > { %v667_v50 = vshrl.u32 %v602_v46, 16  ;;  %v670_v51 = vshll.u32 %v602_v46, 16  ;;  %1821 = vmatprep.subr.msk.bf16.mxu1 %vm878_vm3, %v1866_v11  ;;  %1822 = vmatprep.subr.msk.bf16.mxu0 %vm878_vm3, %v1867_v26  ;;  %v693_v23 = vsel %vm2276_vm6, 0, %v2235_v42  ;;  %v688_v30 = vsel %vm2276_vm6, 0, %v2231_v43 }
  0x3f   : > { %v606_v44 = vrot.slane %v604_v31, 7  ;;  %v696_v52 = vrot.slane %v607_v36, 1  ;;  %v694_v37 = vsel %vm2276_vm6, 0, %v2245_v24  ;;  %v689_v14 = vsel %vm2276_vm6, 0, %v2254_v49 }
  0x40   : > { %749 = vrot.lane.b32.xlu0 %v593_v56, %s1908_s25  ;;  %v714_v53 = vrot.slane %v670_v51, 1  ;;  %v669_v63 = vrot.slane %v667_v50, 7  ;;  %v690_v47 = vsel %vm2276_vm6, 0, %v637_v58 }
  0x41   : > { %v697_v57 = vor.u32 %v696_v52, %v604_v31  ;;  %v2264_v59 = vor.u32 %v607_v36, %v606_v44 }
  0x42   : > { %v715_v60 = vor.u32 %v714_v53, %v667_v50  ;;  %v2273_v1 = vor.u32 %v670_v51, %v669_v63 }
  0x43   : > { %v729_v61 = vsel %vm2106_vm2, %v697_v57, 0 }
  0x44   : > { %779 = vrot.lane.b32.xlu1 %v729_v61, %s1909_s23  ;;  %767 = vrot.lane.b32.xlu0 %v602_v46, %s1908_s25  ;;  %v738_v62 = vsel %vm2106_vm2, %v715_v60, 0  ;;  %v686_v46 = vsel %vm2276_vm6, 0, %v2264_v59  ;;  %v695_v36 = vsel %vm2276_vm6, 0, %v2273_v1 }
  0x48   : > { %797 = vrot.lane.b32.xlu1 %v738_v62, %s1909_s23 }
  0x92   : > { %v760_v2 = vpop.permute.xlu0 %759 }
  0x93   : > { %v752_v4 = vpop.permute.xlu1 %751  ;;  %v817_v21 = vsel %vm799_vm7, %v691_v17, %v760_v2 }
  0x94   : > { %v805_v19 = vsel %vm799_vm7, %v687_v12, %v752_v4 }
  0x96   : > { %v762_v5 = vpop.permute.xlu0 %761 }
  0x97   : > { %v754_v6 = vpop.permute.xlu1 %753  ;;  %v820_v28 = vsel %vm799_vm7, %v692_v18, %v762_v5 }
  0x98   : > { %v808_v35 = vsel %vm799_vm7, %v688_v30, %v754_v6 }
  0x9a   : > { %v764_v7 = vpop.permute.xlu0 %763 }
  0x9b   : > { %v766_v8 = vpop.permute.xlu1 %765  ;;  %v823_v34 = vsel %vm799_vm7, %v693_v23, %v764_v7 }
  0x9c   : > { %v826_v41 = vsel %vm799_vm7, %v694_v37, %v766_v8 }
  0x9e   : > { %v792_v3 = vpop.permute.xlu0 %791 }
  0x9f   : > { %v756_v13 = vpop.permute.xlu1 %755  ;;  %v844_v33 = vsel %vm830_vm9, %v820_v28, %v792_v3 }
  0xa0   : > { %v811_v48 = vsel %vm799_vm7, %v689_v14, %v756_v13 }
  0xa2   : > { %v782_v20 = vpop.permute.xlu0 %781 }
  0xa3   : > { %v790_v25 = vpop.permute.xlu1 %789  ;;  %v834_v29 = vsel %vm830_vm9, %v805_v19, %v782_v20 }
  0xa4   : > { %1765 = vmatprep.mubr.msk.bf16.mxu0 %vm861_vm8, %v834_v29  ;;  %v842_v32 = vsel %vm830_vm9, %v817_v21, %v790_v25 }
  0xa5   : > { %1773 = vmatprep.mubr.msk.bf16.mxu1 %vm861_vm8, %v842_v32 }
  0xa6   : > { %1774 = vmatmul.mubr.msk.bf16.vlgmr.msra.gmra.mxu1 %vm861_vm8, %v844_v33  ;;  %v794_v0 = vpop.permute.xlu0 %793 }
  0xa7   : > { %v784_v38 = vpop.permute.xlu1 %783  ;;  %v846_v39 = vsel %vm830_vm9, %v823_v34, %v794_v0  ;;  %1782 = vmatpush3.bf16.msra.mxu1 %v987_v54 }
  0xa8   : > { %v836_v40 = vsel %vm830_vm9, %v808_v35, %v784_v38  ;;  %1777 = vmatprep.mubr.msk.bf16.mxu1 %vm861_vm8, %v846_v39 }
  0xa9   : > { %1766 = vmatmul.mubr.msk.bf16.vlgmr.msra.gmra.mxu0 %vm861_vm8, %v836_v40 }
  0xaa   : > { %1800 = vmatpush3.bf16.msra.mxu0 %v1097_v55  ;;  %v796_v9 = vpop.permute.xlu0 %795 }
  0xab   : > { %v758_v27 = vpop.permute.xlu1 %757  ;;  %v848_v43 = vsel %vm830_vm9, %v826_v41, %v796_v9 }
  0xac   : > { %v814_v22 = vsel %vm799_vm7, %v690_v47, %v758_v27 }
  0xae   : > { %1778 = vmatmul.mubr.msk.bf16.gmra.mxu1 %vm861_vm8, %v848_v43  ;;  %v786_v42 = vpop.permute.xlu0 %785 }
  0xaf   : > { %v788_v45 = vpop.permute.xlu1 %787  ;;  %v838_v56 = vsel %vm830_vm9, %v811_v48, %v786_v42 }
  0xb0   : > { %v840_v16 = vsel %vm830_vm9, %v814_v22, %v788_v45  ;;  %1769 = vmatprep.mubr.msk.bf16.mxu0 %vm861_vm8, %v838_v56 }
  0xb1   : > { %1770 = vmatmul.mubr.msk.bf16.gmra.mxu0 %vm861_vm8, %v840_v16 }
  0xb2   : > { %v750_v24 = vpop.permute.xlu0 %749  ;;  %1801 = vmatprep.mubr.msk.bf16.mxu0 %vm861_vm8, %v836_v40 }
  0xb3   : > { %v802_v11 = vsel %vm799_vm7, %v686_v46, %v750_v24 }
  0xb6   : > { %v780_v26 = vpop.permute.xlu1 %779  ;;  %v768_v49 = vpop.permute.xlu0 %767 }
  0xb7   : > { %v832_v31 = vsel %vm830_vm9, %v802_v11, %v780_v26  ;;  %v829_v50 = vsel %vm799_vm7, %v695_v36, %v768_v49 }
  0xb8   : > { %1783 = vmatprep.mubr.msk.bf16.mxu1 %vm861_vm8, %v832_v31 }
  0xb9   : > { %1784 = vmatmul.mubr.msk.bf16.vlgmr.msra.gmra.mxu1 %vm861_vm8, %v834_v29  ;;  %1802 = vmatmul.mubr.msk.bf16.vlgmr.msra.gmra.mxu0 %vm861_vm8, %v838_v56 }
  0xba   : > { %1787 = vmatprep.mubr.msk.bf16.mxu1 %vm861_vm8, %v836_v40  ;;  %1805 = vmatprep.mubr.msk.bf16.mxu0 %vm861_vm8, %v840_v16  ;;  %v798_v51 = vpop.permute.xlu1 %797 }
  0xbb   : > { %v850_v15 = vsel %vm830_vm9, %v829_v50, %v798_v51 }
  0xc1   : > { %1788 = vmatmul.mubr.msk.bf16.gmra.mxu1 %vm861_vm8, %v838_v56  ;;  %1806 = vmatmul.mubr.msk.bf16.gmra.mxu0 %vm861_vm8, %v842_v32 }
  0xc2   : > { %1791 = vmatprep.mubr.msk.bf16.mxu1 %vm861_vm8, %v840_v16  ;;  %1809 = vmatprep.mubr.msk.bf16.mxu0 %vm861_vm8, %v844_v33 }
  0xc9   : > { %1792 = vmatmul.mubr.msk.bf16.gmra.mxu1 %vm861_vm8, %v842_v32  ;;  %1810 = vmatmul.mubr.msk.bf16.gmra.mxu0 %vm861_vm8, %v846_v39 }
  0xca   : > { %1795 = vmatprep.mubr.msk.bf16.mxu1 %vm861_vm8, %v844_v33  ;;  %1813 = vmatprep.mubr.msk.bf16.mxu0 %vm861_vm8, %v848_v43 }
  0xd1   : > { %1796 = vmatmul.mubr.msk.bf16.gmra.mxu1 %vm861_vm8, %v846_v39  ;;  %1814 = vmatmul.mubr.msk.bf16.gmra.mxu0 %vm861_vm8, %v850_v15 }
 0x166   : > { %v2353_v44 = vpop.f32.mrf.mxu1 }
 0x168   : > { %v2355_v52 = vpop.f32.mrf.mxu1 }
 0x169   : > { %v1767_v53 = vpop.f32.mrf.mxu0 }
 0x16a   : > { %v2357_v54 = vpop.f32.mrf.mxu1 }
 0x16b   : > { %v916_v55 = vpop.f32.mrf.mxu0 }
 0x16c   : > { %v2359_v57 = vpop.f32.mrf.mxu1 }
 0x16d   : > { %v1768_v58 = vpop.f32.mrf.mxu0 }
 0x16e   : > { %v2361_v59 = vpop.f32.mrf.mxu1 }
 0x16f   : > { %v919_v60 = vpop.f32.mrf.mxu0 }
 0x170   : > { %v2363_v61 = vpop.f32.mrf.mxu1 }
 0x171   : > { %v1771_v62 = vpop.f32.mrf.mxu0 }
 0x172   : > { %v2365_v63 = vpop.f32.mrf.mxu1 }
 0x173   : > { %v932_v1 = vpop.f32.mrf.mxu0 }
 0x174   : > { %v2367_v2 = vpop.f32.mrf.mxu1 }
 0x175   : > { %v1772_v4 = vpop.f32.mrf.mxu0 }
 0x177   : > { %v935_v5 = vpop.f32.mrf.mxu0 }
 0x179   : > { %v1785_v6 = vpop.f32.mrf.mxu1  ;;  %v1803_v7 = vpop.f32.mrf.mxu0 }
 0x17a   : > { %v1032_v8 = vadd.f32 %v1785_v6, %v1767_v53 }
 0x17b   : > { %v1023_v10 = vpop.f32.mrf.mxu1  ;;  %v1133_v3 = vpop.f32.mrf.mxu0 }
 0x17c   : > { %v1024_v12 = vadd.f32 %v1023_v10, %v916_v55  ;;  %v1198_v13 = vadd.f32 %v1803_v7, %v1032_v8 }
 0x17d   : > { %v1786_v17 = vpop.f32.mrf.mxu1  ;;  %v1804_v18 = vpop.f32.mrf.mxu0 }
 0x17e   : > { %v1675_v19 = vpack.c.bf16 %v1198_v13, %v1198_v13  ;;  %v1035_v20 = vadd.f32 %v1786_v17, %v1768_v58  ;;  %v1196_v21 = vadd.f32 %v1133_v3, %v1024_v12  ;;  %v1332_v40 = vmul.f32 %v1198_v13, %v1198_v13 }
 0x17f   : > { %v1026_v23 = vpop.f32.mrf.mxu1  ;;  %v1136_v25 = vpop.f32.mrf.mxu0  ;;  %v1296_v22 = vsel %vm799_vm7, %v1198_v13, 0.0 }
 0x180   : > { %1279 = vst.msk [vmem:[%s2374_s22 + $0x8] sm:$0xf] %vm1276_vm10, %v1675_v19  ;;  %v1027_v29 = vadd.f32 %v1026_v23, %v919_v60  ;;  %v1199_v28 = vadd.f32 %v1804_v18, %v1035_v20  ;;  %v1673_v30 = vpack.c.bf16 %v1196_v21, %v1196_v21  ;;  %v1330_v35 = vmul.f32 %v1196_v21, %v1196_v21 }
 0x181   : > { %v1789_v32 = vpop.f32.mrf.mxu1  ;;  %v1807_v33 = vpop.f32.mrf.mxu0  ;;  %v1293_v14 = vsel %vm799_vm7, %v1196_v21, 0.0  ;;  %v1349_v49 = vsel %vm799_vm7, %v1332_v40, 0.0 }
 0x182   : > { %v1676_v34 = vpack.c.bf16 %v1199_v28, %v1199_v28  ;;  %v1048_v0 = vadd.f32 %v1789_v32, %v1771_v62  ;;  %1277 = vst.msk [vmem:[%s2374_s22] sm:$0xf] %vm1276_vm10, %v1673_v30  ;;  %v1197_v37 = vadd.f32 %v1136_v25, %v1027_v29  ;;  %v1333_v45 = vmul.f32 %v1199_v28, %v1199_v28 }
 0x183   : > { %v1039_v38 = vpop.f32.mrf.mxu1  ;;  %v1149_v39 = vpop.f32.mrf.mxu0  ;;  %v1346_v46 = vsel %vm799_vm7, %v1330_v35, 0.0  ;;  %v1298_v53 = vsel %vm799_vm7, %v1199_v28, 0.0 }
 0x184   : > { %1280 = vst.msk [vmem:[%s2374_s22 + $0xc] sm:$0xf] %vm1276_vm10, %v1676_v34  ;;  %v1040_v41 = vadd.f32 %v1039_v38, %v932_v1  ;;  %v1202_v9 = vadd.f32 %v1807_v33, %v1048_v0  ;;  %v1674_v27 = vpack.c.bf16 %v1197_v37, %v1197_v37  ;;  %v1294_v43 = vsel %vm799_vm7, %v1197_v37, 0.0 }
 0x185   : > { %v1331_v47 = vmul.f32 %v1197_v37, %v1197_v37  ;;  %v1790_v48 = vpop.f32.mrf.mxu1  ;;  %v1808_v42 = vpop.f32.mrf.mxu0  ;;  %v1295_v56 = vadd.f32 %v1294_v43, %v1293_v14  ;;  %v1351_v10 = vsel %vm799_vm7, %v1333_v45, 0.0 }
 0x186   : > { %v1679_v16 = vpack.c.bf16 %v1202_v9, %v1202_v9  ;;  %1278 = vst.msk [vmem:[%s2374_s22 + $0x4] sm:$0xf] %vm1276_vm10, %v1674_v27  ;;  %v1051_v11 = vadd.f32 %v1790_v48, %v1772_v4  ;;  %v1200_v26 = vadd.f32 %v1149_v39, %v1040_v41  ;;  %v1336_v3 = vmul.f32 %v1202_v9, %v1202_v9 }
 0x187   : > { %v1347_v24 = vsel %vm799_vm7, %v1331_v47, 0.0  ;;  %v1042_v31 = vpop.f32.mrf.mxu1  ;;  %v1152_v36 = vpop.f32.mrf.mxu0  ;;  %v1297_v50 = vadd.f32 %v1296_v22, %v1295_v56  ;;  %v1304_v0 = vsel %vm799_vm7, %v1202_v9, 0.0 }
 0x188   : > { %v1348_v51 = vadd.f32 %v1347_v24, %v1346_v46  ;;  %1283 = vst.msk [vmem:[%s2374_s22 + $0x18] sm:$0xf] %vm1276_vm10, %v1679_v16  ;;  %v1043_v15 = vadd.f32 %v1042_v31, %v935_v5  ;;  %v1677_v55 = vpack.c.bf16 %v1200_v26, %v1200_v26  ;;  %v1334_v58 = vmul.f32 %v1200_v26, %v1200_v26 }
 0x189   : > { %v1203_v60 = vadd.f32 %v1808_v42, %v1051_v11  ;;  %v1793_v62 = vpop.f32.mrf.mxu1  ;;  %v1811_v1 = vpop.f32.mrf.mxu0  ;;  %v1299_v4 = vadd.f32 %v1298_v53, %v1297_v50  ;;  %v1300_v5 = vsel %vm799_vm7, %v1200_v26, 0.0  ;;  %v1357_v43 = vsel %vm799_vm7, %v1336_v3, 0.0 }
 0x18a   : > { %v1350_v6 = vadd.f32 %v1349_v49, %v1348_v51  ;;  %v1064_v7 = vadd.f32 %v1793_v62, %v2353_v44  ;;  %v1201_v8 = vadd.f32 %v1152_v36, %v1043_v15  ;;  %1281 = vst.msk [vmem:[%s2374_s22 + $0x10] sm:$0xf] %vm1276_vm10, %v1677_v55  ;;  %v1353_v23 = vsel %vm799_vm7, %v1334_v58, 0.0 }
 0x18b   : > { %v1680_v12 = vpack.c.bf16 %v1203_v60, %v1203_v60  ;;  %v1055_v13 = vpop.f32.mrf.mxu1  ;;  %v1165_v17 = vpop.f32.mrf.mxu0  ;;  %v1301_v18 = vadd.f32 %v1300_v5, %v1299_v4  ;;  %v1337_v35 = vmul.f32 %v1203_v60, %v1203_v60  ;;  %v1306_v47 = vsel %vm799_vm7, %v1203_v60, 0.0 }
 0x18c   : > { %v1352_v19 = vadd.f32 %v1351_v10, %v1350_v6  ;;  %v1678_v20 = vpack.c.bf16 %v1201_v8, %v1201_v8  ;;  %v1302_v21 = vsel %vm799_vm7, %v1201_v8, 0.0  ;;  %v1335_v44 = vmul.f32 %v1201_v8, %v1201_v8 }
 0x18d   : > { %1284 = vst.msk [vmem:[%s2374_s22 + $0x1c] sm:$0xf] %vm1276_vm10, %v1680_v12  ;;  %v1056_v25 = vadd.f32 %v1055_v13, %v2355_v52  ;;  %v1206_v29 = vadd.f32 %v1811_v1, %v1064_v7  ;;  %v1794_v28 = vpop.f32.mrf.mxu1  ;;  %v1812_v30 = vpop.f32.mrf.mxu0  ;;  %v1303_v33 = vadd.f32 %v1302_v21, %v1301_v18  ;;  %v1359_v56 = vsel %vm799_vm7, %v1337_v35, 0.0 }
 0x18e   : > { %v1354_v32 = vadd.f32 %v1353_v23, %v1352_v19  ;;  %1282 = vst.msk [vmem:[%s2374_s22 + $0x14] sm:$0xf] %vm1276_vm10, %v1678_v20  ;;  %v1067_v34 = vadd.f32 %v1794_v28, %v2357_v54  ;;  %v1355_v37 = vsel %vm799_vm7, %v1335_v44, 0.0 }
 0x18f   : > { %v1683_v38 = vpack.c.bf16 %v1206_v29, %v1206_v29  ;;  %v1058_v39 = vpop.f32.mrf.mxu1  ;;  %v1168_v40 = vpop.f32.mrf.mxu0  ;;  %v1305_v41 = vadd.f32 %v1304_v0, %v1303_v33  ;;  %v1204_v14 = vadd.f32 %v1165_v17, %v1056_v25  ;;  %v1340_v50 = vmul.f32 %v1206_v29, %v1206_v29 }
 0x190   : > { %v1356_v52 = vadd.f32 %v1355_v37, %v1354_v32  ;;  %v1059_v27 = vadd.f32 %v1058_v39, %v2359_v57  ;;  %v1207_v54 = vadd.f32 %v1812_v30, %v1067_v34  ;;  %v1312_v10 = vsel %vm799_vm7, %v1206_v29, 0.0 }
 0x191   : > { %1287 = vst.msk [vmem:[%s2374_s22 + $0x28] sm:$0xf] %vm1276_vm10, %v1683_v38  ;;  %v1797_v9 = vpop.f32.mrf.mxu1  ;;  %v1815_v48 = vpop.f32.mrf.mxu0  ;;  %v1681_v22 = vpack.c.bf16 %v1204_v14, %v1204_v14  ;;  %v1307_v45 = vadd.f32 %v1306_v47, %v1305_v41  ;;  %v1308_v16 = vsel %vm799_vm7, %v1204_v14, 0.0  ;;  %v1338_v46 = vmul.f32 %v1204_v14, %v1204_v14 }
 0x192   : > { %v1358_v42 = vadd.f32 %v1357_v43, %v1356_v52  ;;  %v1684_v57 = vpack.c.bf16 %v1207_v54, %v1207_v54  ;;  %v1080_v36 = vadd.f32 %v1797_v9, %v2361_v59  ;;  %v1205_v49 = vadd.f32 %v1168_v40, %v1059_v27 }
 0x193   : > { %v1071_v24 = vpop.f32.mrf.mxu1  ;;  %v1181_v11 = vpop.f32.mrf.mxu0  ;;  %1285 = vst.msk [vmem:[%s2374_s22 + $0x20] sm:$0xf] %vm1276_vm10, %v1681_v22  ;;  %v1309_v26 = vadd.f32 %v1308_v16, %v1307_v45  ;;  %v1361_v51 = vsel %vm799_vm7, %v1338_v46, 0.0  ;;  %v1341_v3 = vmul.f32 %v1207_v54, %v1207_v54  ;;  %v1365_v19 = vsel %vm799_vm7, %v1340_v50, 0.0 }
 0x194   : > { %v1360_v31 = vadd.f32 %v1359_v56, %v1358_v42  ;;  %1288 = vst.msk [vmem:[%s2374_s22 + $0x2c] sm:$0xf] %vm1276_vm10, %v1684_v57  ;;  %v1072_v15 = vadd.f32 %v1071_v24, %v2363_v61  ;;  %v1682_v60 = vpack.c.bf16 %v1205_v49, %v1205_v49  ;;  %v1310_v62 = vsel %vm799_vm7, %v1205_v49, 0.0 }
 0x195   : > { %v1798_v53 = vpop.f32.mrf.mxu1  ;;  %v1816_v55 = vpop.f32.mrf.mxu0  ;;  %v1339_v1 = vmul.f32 %v1205_v49, %v1205_v49  ;;  %v1311_v6 = vadd.f32 %v1310_v62, %v1309_v26  ;;  %v1210_v4 = vadd.f32 %v1815_v48, %v1080_v36  ;;  %v1367_v28 = vsel %vm799_vm7, %v1341_v3, 0.0 }
 0x196   : > { %v1362_v58 = vadd.f32 %v1361_v51, %v1360_v31  ;;  %v1083_v59 = vadd.f32 %v1798_v53, %v2365_v63  ;;  %v1208_v7 = vadd.f32 %v1181_v11, %v1072_v15  ;;  %1286 = vst.msk [vmem:[%s2374_s22 + $0x24] sm:$0xf] %vm1276_vm10, %v1682_v60  ;;  %v1314_v63 = vsel %vm799_vm7, %v1207_v54, 0.0 }
 0x197   : > { %v1074_v8 = vpop.f32.mrf.mxu1  ;;  %v1363_v61 = vsel %vm799_vm7, %v1339_v1, 0.0  ;;  %v1184_v12 = vpop.f32.mrf.mxu0  ;;  %v1313_v13 = vadd.f32 %v1312_v10, %v1311_v6  ;;  %v1687_v18 = vpack.c.bf16 %v1210_v4, %v1210_v4  ;;  %v1344_v30 = vmul.f32 %v1210_v4, %v1210_v4 }
 0x198   : > { %v1075_v5 = vadd.f32 %v1074_v8, %v2367_v2  ;;  %v1364_v17 = vadd.f32 %v1363_v61, %v1362_v58  ;;  %v1685_v20 = vpack.c.bf16 %v1208_v7, %v1208_v7  ;;  %v1342_v21 = vmul.f32 %v1208_v7, %v1208_v7 }
 0x199   : > { %1291 = vst.msk [vmem:[%s2374_s22 + $0x38] sm:$0xf] %vm1276_vm10, %v1687_v18  ;;  %v1315_v44 = vadd.f32 %v1314_v63, %v1313_v13  ;;  %v1211_v25 = vadd.f32 %v1816_v55, %v1083_v59  ;;  %v1316_v2 = vsel %vm799_vm7, %v1208_v7, 0.0  ;;  %v1320_v41 = vsel %vm799_vm7, %v1210_v4, 0.0 }
 0x19a   : > { %v1366_v23 = vadd.f32 %v1365_v19, %v1364_v17  ;;  %v1209_v29 = vadd.f32 %v1184_v12, %v1075_v5  ;;  %1289 = vst.msk [vmem:[%s2374_s22 + $0x30] sm:$0xf] %vm1276_vm10, %v1685_v20  ;;  %v1369_v0 = vsel %vm799_vm7, %v1342_v21, 0.0  ;;  %v1373_v47 = vsel %vm799_vm7, %v1344_v30, 0.0 }
 0x19b   : > { %v1317_v32 = vadd.f32 %v1316_v2, %v1315_v44  ;;  %v1688_v34 = vpack.c.bf16 %v1211_v25, %v1211_v25  ;;  %v1345_v52 = vmul.f32 %v1211_v25, %v1211_v25  ;;  %v1322_v54 = vsel %vm799_vm7, %v1211_v25, 0.0 }
 0x19c   : > { %v1368_v33 = vadd.f32 %v1367_v28, %v1366_v23  ;;  %v1686_v35 = vpack.c.bf16 %v1209_v29, %v1209_v29  ;;  %v1318_v37 = vsel %vm799_vm7, %v1209_v29, 0.0  ;;  %v1343_v38 = vmul.f32 %v1209_v29, %v1209_v29 }
 0x19d   : > { %1292 = vst.msk [vmem:[%s2374_s22 + $0x3c] sm:$0xf] %vm1276_vm10, %v1688_v34  ;;  %v1319_v40 = vadd.f32 %v1318_v37, %v1317_v32  ;;  %v1375_v42 = vsel %vm799_vm7, %v1345_v52, 0.0 }
 0x19e   : > { %v1370_v39 = vadd.f32 %v1369_v0, %v1368_v33  ;;  %1290 = vst.msk [vmem:[%s2374_s22 + $0x34] sm:$0xf] %vm1276_vm10, %v1686_v35  ;;  %v1371_v14 = vsel %vm799_vm7, %v1343_v38, 0.0 }
 0x19f   : > { %v1321_v27 = vadd.f32 %v1320_v41, %v1319_v40 }
 0x1a0   : > { %v1372_v43 = vadd.f32 %v1371_v14, %v1370_v39 }
 0x1a1   : > { %v1323_v9 = vadd.f32 %v1322_v54, %v1321_v27 }
 0x1a2   : > { %v1374_v48 = vadd.f32 %v1373_v47, %v1372_v43 }
 0x1a3   : > { %v1324_v22 = vrot.slane %v1323_v9, 4 }
 0x1a4   : > { %v1376_v45 = vadd.f32 %v1375_v42, %v1374_v48 }
 0x1a5   : > { %v1325_v56 = vadd.f32 %v1324_v22, %v1323_v9 }
 0x1a6   : > { %v1377_v16 = vrot.slane %v1376_v45, 4 }
 0x1a7   : > { %v1326_v46 = vrot.slane %v1325_v56, 2 }
 0x1a8   : > { %v1378_v57 = vadd.f32 %v1377_v16, %v1376_v45 }
 0x1a9   : > { %v1327_v24 = vadd.f32 %v1326_v46, %v1325_v56 }
 0x1aa   : > { %v1379_v11 = vrot.slane %v1378_v57, 2 }
 0x1ab   : > { %v1328_v26 = vrot.slane %v1327_v24, 1 }
 0x1ac   : > { %v1380_v31 = vadd.f32 %v1379_v11, %v1378_v57 }
 0x1ad   : > { %v1329_v49 = vadd.f32 %v1328_v26, %v1327_v24 }
 0x1ae   : > { %v1381_v36 = vrot.slane %v1380_v31, 1 }
 0x1b0   : > { %v1382_v50 = vadd.f32 %v1381_v36, %v1380_v31 }
 0x1b2   : > { %v1384_v51 = vsel %vm683_vm4, %v1329_v49, %v1382_v50 }
 0x1b3   : > { %v1386_v15 = vsel %vm1385_vm11, %v1384_v51, 0.0 }
 0x1b4   : > { %1387 = vst.msk [vmem:[%s467_s9] sm:$0xff] %vm799_vm7, %v1386_v15 }
 0x1b5 PF: > { %s18_s28 = sadd.s32 1, %s1906_s28   ;;  %s2482_s24 = smov %s1898_s26 }
 0x1b6   : > { %p15_p12 = scmp.ge.s32.totalorder %s18_s28, 6   ;;  %s2483_s25 = smov %s1902_s27 }
 0x1b7   : > { %s2484_s26 = smov %s2487_s29  ;;  %s2485_s27 = smov %s2491_s30 }
 0x1b8   :  { %17 = sbr.rel (!%p15_p12) target bundleno = 3 (0x3), region = 94 }

// kernel: bottleneck_forward.7
= control target key start
LH: loop header
LB: loop body
LE: loop exit
PB: predicated region body
PF: predicated region fallthrough
CT: control target
= control target key end

     0   :  { %vm480_vm0 = vcmask 130048   ;;  %s1268_s0 = inlined_call_operand.vmem [shape: bf16[512,16], index: 0, kind: input, shape index: {}]   ;;  %s1269_s1 = inlined_call_operand.vmem [shape: f32[512,16], index: 1, kind: input, shape index: {}]   ;;  %s1270_s2 = inlined_call_operand.vmem [shape: f32[1,16], index: 2, kind: input, shape index: {}]   ;;  %s1271_s3 = inlined_call_operand.vmem [shape: f32[1,16], index: 3, kind: input, shape index: {}]   ;;  %s1272_s4 = inlined_call_operand.hbm [shape: f32[512,16], index: 4, kind: output, shape index: {}]  }
   0x1   :  { %v564_v0 = vld [vmem:[%s1268_s0] sm:$0xff]   ;;  %v691_v4 = vld [vmem:[%s1268_s0 + $0x8] sm:$0xff]   ;;  %v692_v8 = vld [vmem:[%s1268_s0 + $0x10] sm:$0xff]  }
   0x2   :  { %v781_v1 = vld [vmem:[%s1270_s2] ss:$0 sm:$0xff]  ;;  %v565_v2 = vunpack.c.l.bf16 %v564_v0  ;;  %v566_v3 = vunpack.c.h.bf16 %v564_v0  ;;  %v569_v6 = vunpack.c.l.bf16 %v691_v4  ;;  %v570_v7 = vunpack.c.h.bf16 %v691_v4  ;;  %v693_v13 = vld [vmem:[%s1268_s0 + $0x18] sm:$0xff]   ;;  %v289_v15 = vld [vmem:[%s1269_s1 + $0x8] sm:$0xff] }
   0x3   :  { %v789_v5 = vld [vmem:[%s1271_s3] ss:$0 sm:$0xff]  ;;  %v573_v11 = vunpack.c.l.bf16 %v692_v8  ;;  %v574_v12 = vunpack.c.h.bf16 %v692_v8  ;;  %v577_v18 = vunpack.c.l.bf16 %v693_v13  ;;  %v578_v19 = vunpack.c.h.bf16 %v693_v13  ;;  %v290_v22 = vld [vmem:[%s1269_s1 + $0x10] sm:$0xff]  ;;  %v291_v23 = vld [vmem:[%s1269_s1 + $0x18] sm:$0xff] }
   0x4   :  { %v153_v9 = vmul.f32 %v565_v2, %v781_v1  ;;  %v154_v10 = vmul.f32 %v566_v3, %v781_v1  ;;  %v288_v14 = vld [vmem:[%s1269_s1] sm:$0xff]  ;;  %v155_v16 = vmul.f32 %v569_v6, %v781_v1  ;;  %v156_v17 = vmul.f32 %v570_v7, %v781_v1  ;;  %v293_v29 = vld [vmem:[%s1269_s1 + $0x28] sm:$0xff]  ;;  %v294_v36 = vld [vmem:[%s1269_s1 + $0x30] sm:$0xff] }
   0x5   :  { %v157_v24 = vmul.f32 %v573_v11, %v781_v1  ;;  %v158_v25 = vmul.f32 %v574_v12, %v781_v1  ;;  %v292_v28 = vld [vmem:[%s1269_s1 + $0x20] sm:$0xff]  ;;  %v159_v30 = vmul.f32 %v577_v18, %v781_v1  ;;  %v160_v31 = vmul.f32 %v578_v19, %v781_v1  ;;  %v295_v37 = vld [vmem:[%s1269_s1 + $0x38] sm:$0xff]  ;;  %v695_v47 = vld [vmem:[%s1268_s0 + $0x28] sm:$0xff]  }
   0x6   :  { %v224_v20 = vadd.f32 %v789_v5, %v153_v9  ;;  %v225_v21 = vadd.f32 %v789_v5, %v154_v10  ;;  %v226_v26 = vadd.f32 %v789_v5, %v155_v16  ;;  %v227_v27 = vadd.f32 %v789_v5, %v156_v17  ;;  %v694_v42 = vld [vmem:[%s1268_s0 + $0x20] sm:$0xff]   ;;  %v696_v52 = vld [vmem:[%s1268_s0 + $0x30] sm:$0xff]   ;;  %v697_v57 = vld [vmem:[%s1268_s0 + $0x38] sm:$0xff]  }
   0x7   :  { %v228_v34 = vadd.f32 %v789_v5, %v157_v24  ;;  %v229_v35 = vadd.f32 %v789_v5, %v158_v25  ;;  %v230_v40 = vadd.f32 %v789_v5, %v159_v30  ;;  %v231_v41 = vadd.f32 %v789_v5, %v160_v31  ;;  %v296_v3 = vld [vmem:[%s1269_s1 + $0x40] sm:$0xff]  ;;  %v297_v4 = vld [vmem:[%s1269_s1 + $0x48] sm:$0xff]  ;;  %v298_v12 = vld [vmem:[%s1269_s1 + $0x50] sm:$0xff] }
   0x8   :  { %v352_v32 = vadd.f32 %v288_v14, %v224_v20  ;;  %v353_v33 = vadd.f32 %v289_v15, %v225_v21  ;;  %v354_v38 = vadd.f32 %v290_v22, %v226_v26  ;;  %v355_v39 = vadd.f32 %v291_v23, %v227_v27  ;;  %v299_v13 = vld [vmem:[%s1269_s1 + $0x58] sm:$0xff]  ;;  %v300_v18 = vld [vmem:[%s1269_s1 + $0x60] sm:$0xff]  ;;  %v301_v19 = vld [vmem:[%s1269_s1 + $0x68] sm:$0xff] }
   0x9   :  { %v356_v45 = vadd.f32 %v292_v28, %v228_v34  ;;  %v357_v46 = vadd.f32 %v293_v29, %v229_v35  ;;  %v358_v50 = vadd.f32 %v294_v36, %v230_v40  ;;  %v359_v51 = vadd.f32 %v295_v37, %v231_v41  ;;  %v302_v26 = vld [vmem:[%s1269_s1 + $0x70] sm:$0xff]  ;;  %v303_v27 = vld [vmem:[%s1269_s1 + $0x78] sm:$0xff]  ;;  %v699_v37 = vld [vmem:[%s1268_s0 + $0x48] sm:$0xff]  }
   0xa   :  { %v416_v43 = vmax.f32 %v352_v32, 0.0  ;;  %v417_v44 = vmax.f32 %v353_v33, 0.0  ;;  %v418_v48 = vmax.f32 %v354_v38, 0.0  ;;  %v419_v49 = vmax.f32 %v355_v39, 0.0  ;;  %v698_v32 = vld [vmem:[%s1268_s0 + $0x40] sm:$0xff]  }
   0xb   :  { %v420_v53 = vmax.f32 %v356_v45, 0.0  ;;  %v421_v54 = vmax.f32 %v357_v46, 0.0  ;;  %v581_v55 = vunpack.c.l.bf16 %v694_v42  ;;  %v582_v56 = vunpack.c.h.bf16 %v694_v42  ;;  %v700_v42 = vld [vmem:[%s1268_s0 + $0x50] sm:$0xff]  }
   0xc   :  { %481 = vst.msk [vmem:[#allocation2] sm:$0xff] %vm480_vm0, %v416_v43  ;;  %482 = vst.msk [vmem:[#allocation2 + $0x8] sm:$0xff] %vm480_vm0, %v417_v44  ;;  %v422_v58 = vmax.f32 %v358_v50, 0.0  ;;  %v423_v59 = vmax.f32 %v359_v51, 0.0  ;;  %v585_v60 = vunpack.c.l.bf16 %v695_v47  ;;  %v586_v61 = vunpack.c.h.bf16 %v695_v47  ;;  %v701_v47 = vld [vmem:[%s1268_s0 + $0x58] sm:$0xff]  }
   0xd   :  { %483 = vst.msk [vmem:[#allocation2 + $0x10] sm:$0xff] %vm480_vm0, %v418_v48  ;;  %484 = vst.msk [vmem:[#allocation2 + $0x18] sm:$0xff] %vm480_vm0, %v419_v49  ;;  %v161_v62 = vmul.f32 %v581_v55, %v781_v1  ;;  %v162_v63 = vmul.f32 %v582_v56, %v781_v1  ;;  %v589_v0 = vunpack.c.l.bf16 %v696_v52  ;;  %v590_v2 = vunpack.c.h.bf16 %v696_v52  ;;  %v304_v56 = vld [vmem:[%s1269_s1 + $0x80] sm:$0xff] }
   0xe   :  { %485 = vst.msk [vmem:[#allocation2 + $0x20] sm:$0xff] %vm480_vm0, %v420_v53  ;;  %486 = vst.msk [vmem:[#allocation2 + $0x28] sm:$0xff] %vm480_vm0, %v421_v54  ;;  %v163_v6 = vmul.f32 %v585_v60, %v781_v1  ;;  %v164_v7 = vmul.f32 %v586_v61, %v781_v1  ;;  %v593_v8 = vunpack.c.l.bf16 %v697_v57  ;;  %v594_v9 = vunpack.c.h.bf16 %v697_v57  ;;  %v305_v57 = vld [vmem:[%s1269_s1 + $0x88] sm:$0xff] }
   0xf   :  { %487 = vst.msk [vmem:[#allocation2 + $0x30] sm:$0xff] %vm480_vm0, %v422_v58  ;;  %488 = vst.msk [vmem:[#allocation2 + $0x38] sm:$0xff] %vm480_vm0, %v423_v59  ;;  %v232_v10 = vadd.f32 %v789_v5, %v161_v62  ;;  %v233_v11 = vadd.f32 %v789_v5, %v162_v63  ;;  %v165_v14 = vmul.f32 %v589_v0, %v781_v1  ;;  %v597_v45 = vunpack.c.l.bf16 %v698_v32  ;;  %v306_v0 = vld [vmem:[%s1269_s1 + $0x90] sm:$0xff] }
  0x10   :  { %v166_v15 = vmul.f32 %v590_v2, %v781_v1  ;;  %v234_v16 = vadd.f32 %v789_v5, %v163_v6  ;;  %v235_v17 = vadd.f32 %v789_v5, %v164_v7  ;;  %v167_v20 = vmul.f32 %v593_v8, %v781_v1  ;;  %v307_v2 = vld [vmem:[%s1269_s1 + $0x98] sm:$0xff]  ;;  %v308_v8 = vld [vmem:[%s1269_s1 + $0xa0] sm:$0xff] }
  0x11   :  { %v168_v21 = vmul.f32 %v594_v9, %v781_v1  ;;  %v360_v22 = vadd.f32 %v296_v3, %v232_v10  ;;  %v361_v23 = vadd.f32 %v297_v4, %v233_v11  ;;  %v236_v24 = vadd.f32 %v789_v5, %v165_v14  ;;  %v309_v9 = vld [vmem:[%s1269_s1 + $0xa8] sm:$0xff] }
  0x12   :  { %v237_v25 = vadd.f32 %v789_v5, %v166_v15  ;;  %v362_v28 = vadd.f32 %v298_v12, %v234_v16  ;;  %v363_v29 = vadd.f32 %v299_v13, %v235_v17  ;;  %v238_v30 = vadd.f32 %v789_v5, %v167_v20  ;;  %v310_v16 = vld [vmem:[%s1269_s1 + $0xb0] sm:$0xff]  ;;  %v311_v17 = vld [vmem:[%s1269_s1 + $0xb8] sm:$0xff] }
  0x13   :  { %v239_v31 = vadd.f32 %v789_v5, %v168_v21  ;;  %v424_v33 = vmax.f32 %v360_v22, 0.0  ;;  %v425_v34 = vmax.f32 %v361_v23, 0.0  ;;  %v364_v35 = vadd.f32 %v300_v18, %v236_v24  ;;  %v702_v22 = vld [vmem:[%s1268_s0 + $0x60] sm:$0xff]  }
  0x14   :  { %v365_v36 = vadd.f32 %v301_v19, %v237_v25  ;;  %v426_v38 = vmax.f32 %v362_v28, 0.0  ;;  %v427_v39 = vmax.f32 %v363_v29, 0.0  ;;  %v366_v40 = vadd.f32 %v302_v26, %v238_v30 }
  0x15   :  { %v367_v41 = vadd.f32 %v303_v27, %v239_v31  ;;  %489 = vst.msk [vmem:[#allocation2 + $0x40] sm:$0xff] %vm480_vm0, %v424_v33  ;;  %490 = vst.msk [vmem:[#allocation2 + $0x48] sm:$0xff] %vm480_vm0, %v425_v34  ;;  %v428_v43 = vmax.f32 %v364_v35, 0.0  ;;  %v598_v46 = vunpack.c.h.bf16 %v698_v32  ;;  %v601_v50 = vunpack.c.l.bf16 %v699_v37  ;;  %v703_v27 = vld [vmem:[%s1268_s0 + $0x68] sm:$0xff]   ;;  %v704_v32 = vld [vmem:[%s1268_s0 + $0x70] sm:$0xff]  }
  0x16   :  { %v429_v44 = vmax.f32 %v365_v36, 0.0  ;;  %491 = vst.msk [vmem:[#allocation2 + $0x50] sm:$0xff] %vm480_vm0, %v426_v38  ;;  %492 = vst.msk [vmem:[#allocation2 + $0x58] sm:$0xff] %vm480_vm0, %v427_v39  ;;  %v430_v48 = vmax.f32 %v366_v40, 0.0  ;;  %v602_v51 = vunpack.c.h.bf16 %v699_v37  ;;  %v169_v52 = vmul.f32 %v597_v45, %v781_v1  ;;  %v705_v37 = vld [vmem:[%s1268_s0 + $0x78] sm:$0xff]  }
  0x17   :  { %v431_v49 = vmax.f32 %v367_v41, 0.0  ;;  %493 = vst.msk [vmem:[#allocation2 + $0x60] sm:$0xff] %vm480_vm0, %v428_v43  ;;  %v170_v53 = vmul.f32 %v598_v46, %v781_v1  ;;  %v605_v54 = vunpack.c.l.bf16 %v700_v42  ;;  %v606_v55 = vunpack.c.h.bf16 %v700_v42 }
  0x18   :  { %494 = vst.msk [vmem:[#allocation2 + $0x68] sm:$0xff] %vm480_vm0, %v429_v44  ;;  %495 = vst.msk [vmem:[#allocation2 + $0x70] sm:$0xff] %vm480_vm0, %v430_v48  ;;  %v171_v58 = vmul.f32 %v601_v50, %v781_v1  ;;  %v172_v59 = vmul.f32 %v602_v51, %v781_v1  ;;  %v609_v60 = vunpack.c.l.bf16 %v701_v47  ;;  %v610_v61 = vunpack.c.h.bf16 %v701_v47 }
  0x19   :  { %496 = vst.msk [vmem:[#allocation2 + $0x78] sm:$0xff] %vm480_vm0, %v431_v49  ;;  %v240_v62 = vadd.f32 %v789_v5, %v169_v52  ;;  %v241_v63 = vadd.f32 %v789_v5, %v170_v53  ;;  %v173_v3 = vmul.f32 %v605_v54, %v781_v1  ;;  %v174_v4 = vmul.f32 %v606_v55, %v781_v1 }
  0x1a   :  { %v242_v6 = vadd.f32 %v789_v5, %v171_v58  ;;  %v243_v7 = vadd.f32 %v789_v5, %v172_v59  ;;  %v175_v10 = vmul.f32 %v609_v60, %v781_v1  ;;  %v176_v11 = vmul.f32 %v610_v61, %v781_v1 }
  0x1b   :  { %v368_v12 = vadd.f32 %v304_v56, %v240_v62  ;;  %v369_v13 = vadd.f32 %v305_v57, %v241_v63  ;;  %v244_v14 = vadd.f32 %v789_v5, %v173_v3  ;;  %v245_v15 = vadd.f32 %v789_v5, %v174_v4 }
  0x1c   :  { %v370_v18 = vadd.f32 %v306_v0, %v242_v6  ;;  %v371_v19 = vadd.f32 %v307_v2, %v243_v7  ;;  %v246_v20 = vadd.f32 %v789_v5, %v175_v10  ;;  %v247_v21 = vadd.f32 %v789_v5, %v176_v11 }
  0x1d   :  { %v432_v23 = vmax.f32 %v368_v12, 0.0  ;;  %v433_v24 = vmax.f32 %v369_v13, 0.0  ;;  %v372_v25 = vadd.f32 %v308_v8, %v244_v14  ;;  %v373_v26 = vadd.f32 %v309_v9, %v245_v15 }
  0x1e   :  { %v434_v28 = vmax.f32 %v370_v18, 0.0  ;;  %v435_v29 = vmax.f32 %v371_v19, 0.0  ;;  %v374_v30 = vadd.f32 %v310_v16, %v246_v20  ;;  %v375_v31 = vadd.f32 %v311_v17, %v247_v21 }
  0x1f   :  { %497 = vst.msk [vmem:[#allocation2 + $0x80] sm:$0xff] %vm480_vm0, %v432_v23  ;;  %498 = vst.msk [vmem:[#allocation2 + $0x88] sm:$0xff] %vm480_vm0, %v433_v24  ;;  %v436_v33 = vmax.f32 %v372_v25, 0.0  ;;  %v437_v34 = vmax.f32 %v373_v26, 0.0  ;;  %v613_v35 = vunpack.c.l.bf16 %v702_v22  ;;  %v614_v36 = vunpack.c.h.bf16 %v702_v22 }
  0x20   :  { %499 = vst.msk [vmem:[#allocation2 + $0x90] sm:$0xff] %vm480_vm0, %v434_v28  ;;  %500 = vst.msk [vmem:[#allocation2 + $0x98] sm:$0xff] %vm480_vm0, %v435_v29  ;;  %v438_v38 = vmax.f32 %v374_v30, 0.0  ;;  %v439_v39 = vmax.f32 %v375_v31, 0.0  ;;  %v617_v40 = vunpack.c.l.bf16 %v703_v27  ;;  %v618_v41 = vunpack.c.h.bf16 %v703_v27 }
  0x21   :  { %9 = vsyncpa [#allocation3], 0  ;;  %501 = vst.msk [vmem:[#allocation2 + $0xa0] sm:$0xff] %vm480_vm0, %v436_v33  ;;  %v177_v42 = vmul.f32 %v613_v35, %v781_v1  ;;  %v178_v43 = vmul.f32 %v614_v36, %v781_v1  ;;  %v621_v44 = vunpack.c.l.bf16 %v704_v32  ;;  %v622_v45 = vunpack.c.h.bf16 %v704_v32  ;;  %v312_v46 = vld [vmem:[%s1269_s1 + $0xc0] sm:$0xff]  ;;  %v313_v47 = vld [vmem:[%s1269_s1 + $0xc8] sm:$0xff]  ;;  %s747_s14 = smov [#allocation2]  }
  0x22   :  { %502 = vst.msk [vmem:[#allocation2 + $0xa8] sm:$0xff] %vm480_vm0, %v437_v34  ;;  %503 = vst.msk [vmem:[#allocation2 + $0xb0] sm:$0xff] %vm480_vm0, %v438_v38  ;;  %v179_v48 = vmul.f32 %v617_v40, %v781_v1  ;;  %v180_v49 = vmul.f32 %v618_v41, %v781_v1  ;;  %v625_v50 = vunpack.c.l.bf16 %v705_v37  ;;  %v626_v51 = vunpack.c.h.bf16 %v705_v37  ;;  %v314_v54 = vld [vmem:[%s1269_s1 + $0xd0] sm:$0xff]  ;;  %v315_v55 = vld [vmem:[%s1269_s1 + $0xd8] sm:$0xff]  ;;  %s550_s15 = sshll.u32 %s747_s14, 4  ;;  %s551_s15 = int_to_ptr.vmem [resolvable:$true] %s550_s15 }
  0x23   :  { %504 = vst.msk [vmem:[#allocation2 + $0xb8] sm:$0xff] %vm480_vm0, %v439_v39  ;;  %v248_v52 = vadd.f32 %v789_v5, %v177_v42  ;;  %v249_v53 = vadd.f32 %v789_v5, %v178_v43  ;;  %v181_v56 = vmul.f32 %v621_v44, %v781_v1  ;;  %v182_v57 = vmul.f32 %v622_v45, %v781_v1  ;;  %v316_v60 = vld [vmem:[%s1269_s1 + $0xe0] sm:$0xff]  ;;  %v317_v61 = vld [vmem:[%s1269_s1 + $0xe8] sm:$0xff]  ;;  %v318_v6 = vld [vmem:[%s1269_s1 + $0xf0] sm:$0xff]  ;;  %p730_p1 = scmp.lt.s32.totalorder %s551_s15, %s551_s15 }
  0x24   :  { %v250_v58 = vadd.f32 %v789_v5, %v179_v48  ;;  %v251_v59 = vadd.f32 %v789_v5, %v180_v49  ;;  %v183_v62 = vmul.f32 %v625_v50, %v781_v1  ;;  %v184_v63 = vmul.f32 %v626_v51, %v781_v1  ;;  %v319_v7 = vld [vmem:[%s1269_s1 + $0xf8] sm:$0xff]  ;;  %v706_v12 = vld [vmem:[%s1268_s0 + $0x80] sm:$0xff]   ;;  %v707_v17 = vld [vmem:[%s1268_s0 + $0x88] sm:$0xff]  }
  0x25   :  { %v376_v0 = vadd.f32 %v312_v46, %v248_v52  ;;  %v377_v2 = vadd.f32 %v313_v47, %v249_v53  ;;  %v252_v3 = vadd.f32 %v789_v5, %v181_v56  ;;  %v253_v4 = vadd.f32 %v789_v5, %v182_v57  ;;  %v708_v22 = vld [vmem:[%s1268_s0 + $0x90] sm:$0xff]   ;;  %v709_v27 = vld [vmem:[%s1268_s0 + $0x98] sm:$0xff]   ;;  %v320_v36 = vld [vmem:[%s1269_s1 + $0x100] sm:$0xff] }
  0x26   :  { %v378_v8 = vadd.f32 %v314_v54, %v250_v58  ;;  %v379_v9 = vadd.f32 %v315_v55, %v251_v59  ;;  %v254_v10 = vadd.f32 %v789_v5, %v183_v62  ;;  %v255_v11 = vadd.f32 %v789_v5, %v184_v63  ;;  %v321_v37 = vld [vmem:[%s1269_s1 + $0x108] sm:$0xff]  ;;  %v322_v44 = vld [vmem:[%s1269_s1 + $0x110] sm:$0xff]  ;;  %v323_v45 = vld [vmem:[%s1269_s1 + $0x118] sm:$0xff] }
  0x27   :  { %v440_v13 = vmax.f32 %v376_v0, 0.0  ;;  %v441_v14 = vmax.f32 %v377_v2, 0.0  ;;  %v380_v15 = vadd.f32 %v316_v60, %v252_v3  ;;  %v381_v16 = vadd.f32 %v317_v61, %v253_v4  ;;  %v324_v50 = vld [vmem:[%s1269_s1 + $0x120] sm:$0xff]  ;;  %v325_v51 = vld [vmem:[%s1269_s1 + $0x128] sm:$0xff]  ;;  %v326_v58 = vld [vmem:[%s1269_s1 + $0x130] sm:$0xff] }
  0x28   :  { %v442_v18 = vmax.f32 %v378_v8, 0.0  ;;  %v443_v19 = vmax.f32 %v379_v9, 0.0  ;;  %v382_v20 = vadd.f32 %v318_v6, %v254_v10  ;;  %v383_v21 = vadd.f32 %v319_v7, %v255_v11  ;;  %v327_v59 = vld [vmem:[%s1269_s1 + $0x138] sm:$0xff]  ;;  %v710_v0 = vld [vmem:[%s1268_s0 + $0xa0] sm:$0xff]   ;;  %v711_v7 = vld [vmem:[%s1268_s0 + $0xa8] sm:$0xff]  }
  0x29   :  { %505 = vst.msk [vmem:[#allocation2 + $0xc0] sm:$0xff] %vm480_vm0, %v440_v13  ;;  %506 = vst.msk [vmem:[#allocation2 + $0xc8] sm:$0xff] %vm480_vm0, %v441_v14  ;;  %v444_v23 = vmax.f32 %v380_v15, 0.0  ;;  %v445_v24 = vmax.f32 %v381_v16, 0.0  ;;  %v629_v25 = vunpack.c.l.bf16 %v706_v12  ;;  %v630_v26 = vunpack.c.h.bf16 %v706_v12  ;;  %v712_v12 = vld [vmem:[%s1268_s0 + $0xb0] sm:$0xff]  }
  0x2a   :  { %507 = vst.msk [vmem:[#allocation2 + $0xd0] sm:$0xff] %vm480_vm0, %v442_v18  ;;  %508 = vst.msk [vmem:[#allocation2 + $0xd8] sm:$0xff] %vm480_vm0, %v443_v19  ;;  %v446_v28 = vmax.f32 %v382_v20, 0.0  ;;  %v447_v29 = vmax.f32 %v383_v21, 0.0  ;;  %v633_v30 = vunpack.c.l.bf16 %v707_v17  ;;  %v634_v31 = vunpack.c.h.bf16 %v707_v17  ;;  %v713_v17 = vld [vmem:[%s1268_s0 + $0xb8] sm:$0xff]  }
  0x2b   :  { %509 = vst.msk [vmem:[#allocation2 + $0xe0] sm:$0xff] %vm480_vm0, %v444_v23  ;;  %510 = vst.msk [vmem:[#allocation2 + $0xe8] sm:$0xff] %vm480_vm0, %v445_v24  ;;  %v185_v32 = vmul.f32 %v629_v25, %v781_v1  ;;  %v186_v33 = vmul.f32 %v630_v26, %v781_v1  ;;  %v637_v34 = vunpack.c.l.bf16 %v708_v22  ;;  %v638_v35 = vunpack.c.h.bf16 %v708_v22  ;;  %v328_v26 = vld [vmem:[%s1269_s1 + $0x140] sm:$0xff] }
  0x2c   :  { %511 = vst.msk [vmem:[#allocation2 + $0xf0] sm:$0xff] %vm480_vm0, %v446_v28  ;;  %512 = vst.msk [vmem:[#allocation2 + $0xf8] sm:$0xff] %vm480_vm0, %v447_v29  ;;  %v187_v38 = vmul.f32 %v633_v30, %v781_v1  ;;  %v188_v39 = vmul.f32 %v634_v31, %v781_v1  ;;  %v641_v40 = vunpack.c.l.bf16 %v709_v27  ;;  %v642_v41 = vunpack.c.h.bf16 %v709_v27  ;;  %v329_v27 = vld [vmem:[%s1269_s1 + $0x148] sm:$0xff] }
  0x2d   :  { %v256_v42 = vadd.f32 %v789_v5, %v185_v32  ;;  %v257_v43 = vadd.f32 %v789_v5, %v186_v33  ;;  %v189_v46 = vmul.f32 %v637_v34, %v781_v1  ;;  %v190_v47 = vmul.f32 %v638_v35, %v781_v1  ;;  %v330_v34 = vld [vmem:[%s1269_s1 + $0x150] sm:$0xff]  ;;  %v331_v35 = vld [vmem:[%s1269_s1 + $0x158] sm:$0xff] }
  0x2e   :  { %v258_v48 = vadd.f32 %v789_v5, %v187_v38  ;;  %v259_v49 = vadd.f32 %v789_v5, %v188_v39  ;;  %v191_v52 = vmul.f32 %v641_v40, %v781_v1  ;;  %v192_v53 = vmul.f32 %v642_v41, %v781_v1  ;;  %v332_v40 = vld [vmem:[%s1269_s1 + $0x160] sm:$0xff]  ;;  %v333_v41 = vld [vmem:[%s1269_s1 + $0x168] sm:$0xff] }
  0x2f   :  { %v384_v54 = vadd.f32 %v320_v36, %v256_v42  ;;  %v385_v55 = vadd.f32 %v321_v37, %v257_v43  ;;  %v260_v56 = vadd.f32 %v789_v5, %v189_v46  ;;  %v261_v57 = vadd.f32 %v789_v5, %v190_v47 }
  0x30   :  { %v386_v60 = vadd.f32 %v322_v44, %v258_v48  ;;  %v387_v61 = vadd.f32 %v323_v45, %v259_v49  ;;  %v262_v62 = vadd.f32 %v789_v5, %v191_v52  ;;  %v263_v63 = vadd.f32 %v789_v5, %v192_v53  ;;  %v334_v48 = vld [vmem:[%s1269_s1 + $0x170] sm:$0xff]  ;;  %v335_v49 = vld [vmem:[%s1269_s1 + $0x178] sm:$0xff] }
  0x31   :  { %v448_v2 = vmax.f32 %v384_v54, 0.0  ;;  %v449_v3 = vmax.f32 %v385_v55, 0.0  ;;  %v388_v4 = vadd.f32 %v324_v50, %v260_v56  ;;  %v389_v6 = vadd.f32 %v325_v51, %v261_v57  ;;  %v714_v54 = vld [vmem:[%s1268_s0 + $0xc0] sm:$0xff]  }
  0x32   :  { %v450_v8 = vmax.f32 %v386_v60, 0.0  ;;  %v451_v9 = vmax.f32 %v387_v61, 0.0  ;;  %v390_v10 = vadd.f32 %v326_v58, %v262_v62  ;;  %v391_v11 = vadd.f32 %v327_v59, %v263_v63  ;;  %v715_v59 = vld [vmem:[%s1268_s0 + $0xc8] sm:$0xff]  }
  0x33   :  { %513 = vst.msk [vmem:[#allocation2 + $0x100] sm:$0xff] %vm480_vm0, %v448_v2  ;;  %514 = vst.msk [vmem:[#allocation2 + $0x108] sm:$0xff] %vm480_vm0, %v449_v3  ;;  %v452_v13 = vmax.f32 %v388_v4, 0.0  ;;  %v453_v14 = vmax.f32 %v389_v6, 0.0  ;;  %v645_v15 = vunpack.c.l.bf16 %v710_v0  ;;  %v646_v16 = vunpack.c.h.bf16 %v710_v0  ;;  %v716_v0 = vld [vmem:[%s1268_s0 + $0xd0] sm:$0xff]  }
  0x34   :  { %515 = vst.msk [vmem:[#allocation2 + $0x110] sm:$0xff] %vm480_vm0, %v450_v8  ;;  %516 = vst.msk [vmem:[#allocation2 + $0x118] sm:$0xff] %vm480_vm0, %v451_v9  ;;  %v454_v18 = vmax.f32 %v390_v10, 0.0  ;;  %v455_v19 = vmax.f32 %v391_v11, 0.0  ;;  %v649_v20 = vunpack.c.l.bf16 %v711_v7  ;;  %v650_v21 = vunpack.c.h.bf16 %v711_v7  ;;  %v717_v7 = vld [vmem:[%s1268_s0 + $0xd8] sm:$0xff]  }
  0x35   :  { %517 = vst.msk [vmem:[#allocation2 + $0x120] sm:$0xff] %vm480_vm0, %v452_v13  ;;  %518 = vst.msk [vmem:[#allocation2 + $0x128] sm:$0xff] %vm480_vm0, %v453_v14  ;;  %v193_v22 = vmul.f32 %v645_v15, %v781_v1  ;;  %v194_v23 = vmul.f32 %v646_v16, %v781_v1  ;;  %v653_v24 = vunpack.c.l.bf16 %v712_v12  ;;  %v654_v25 = vunpack.c.h.bf16 %v712_v12  ;;  %v336_v16 = vld [vmem:[%s1269_s1 + $0x180] sm:$0xff] }
  0x36   :  { %519 = vst.msk [vmem:[#allocation2 + $0x130] sm:$0xff] %vm480_vm0, %v454_v18  ;;  %520 = vst.msk [vmem:[#allocation2 + $0x138] sm:$0xff] %vm480_vm0, %v455_v19  ;;  %v195_v28 = vmul.f32 %v649_v20, %v781_v1  ;;  %v196_v29 = vmul.f32 %v650_v21, %v781_v1  ;;  %v657_v30 = vunpack.c.l.bf16 %v713_v17  ;;  %v658_v31 = vunpack.c.h.bf16 %v713_v17  ;;  %v337_v17 = vld [vmem:[%s1269_s1 + $0x188] sm:$0xff] }
  0x37   :  { %v264_v32 = vadd.f32 %v789_v5, %v193_v22  ;;  %v265_v33 = vadd.f32 %v789_v5, %v194_v23  ;;  %v197_v36 = vmul.f32 %v653_v24, %v781_v1  ;;  %v198_v37 = vmul.f32 %v654_v25, %v781_v1  ;;  %v338_v24 = vld [vmem:[%s1269_s1 + $0x190] sm:$0xff]  ;;  %v339_v25 = vld [vmem:[%s1269_s1 + $0x198] sm:$0xff] }
  0x38   :  { %v266_v38 = vadd.f32 %v789_v5, %v195_v28  ;;  %v267_v39 = vadd.f32 %v789_v5, %v196_v29  ;;  %v199_v42 = vmul.f32 %v657_v30, %v781_v1  ;;  %v200_v43 = vmul.f32 %v658_v31, %v781_v1  ;;  %v340_v30 = vld [vmem:[%s1269_s1 + $0x1a0] sm:$0xff]  ;;  %v341_v31 = vld [vmem:[%s1269_s1 + $0x1a8] sm:$0xff] }
  0x39   :  { %v392_v44 = vadd.f32 %v328_v26, %v264_v32  ;;  %v393_v45 = vadd.f32 %v329_v27, %v265_v33  ;;  %v268_v46 = vadd.f32 %v789_v5, %v197_v36  ;;  %v269_v47 = vadd.f32 %v789_v5, %v198_v37 }
  0x3a   :  { %v394_v50 = vadd.f32 %v330_v34, %v266_v38  ;;  %v395_v51 = vadd.f32 %v331_v35, %v267_v39  ;;  %v270_v52 = vadd.f32 %v789_v5, %v199_v42  ;;  %v271_v53 = vadd.f32 %v789_v5, %v200_v43  ;;  %v342_v38 = vld [vmem:[%s1269_s1 + $0x1b0] sm:$0xff]  ;;  %v343_v39 = vld [vmem:[%s1269_s1 + $0x1b8] sm:$0xff] }
  0x3b   :  { %v456_v55 = vmax.f32 %v392_v44, 0.0  ;;  %v457_v56 = vmax.f32 %v393_v45, 0.0  ;;  %v396_v57 = vadd.f32 %v332_v40, %v268_v46  ;;  %v397_v58 = vadd.f32 %v333_v41, %v269_v47  ;;  %v718_v44 = vld [vmem:[%s1268_s0 + $0xe0] sm:$0xff]  }
  0x3c   :  { %v458_v60 = vmax.f32 %v394_v50, 0.0  ;;  %v459_v61 = vmax.f32 %v395_v51, 0.0  ;;  %v398_v62 = vadd.f32 %v334_v48, %v270_v52  ;;  %v399_v63 = vadd.f32 %v335_v49, %v271_v53  ;;  %v719_v49 = vld [vmem:[%s1268_s0 + $0xe8] sm:$0xff]  }
  0x3d   :  { %521 = vst.msk [vmem:[#allocation2 + $0x140] sm:$0xff] %vm480_vm0, %v456_v55  ;;  %522 = vst.msk [vmem:[#allocation2 + $0x148] sm:$0xff] %vm480_vm0, %v457_v56  ;;  %v460_v2 = vmax.f32 %v396_v57, 0.0  ;;  %v461_v3 = vmax.f32 %v397_v58, 0.0  ;;  %v661_v4 = vunpack.c.l.bf16 %v714_v54  ;;  %v662_v6 = vunpack.c.h.bf16 %v714_v54  ;;  %v720_v54 = vld [vmem:[%s1268_s0 + $0xf0] sm:$0xff]  }
  0x3e   :  { %523 = vst.msk [vmem:[#allocation2 + $0x150] sm:$0xff] %vm480_vm0, %v458_v60  ;;  %524 = vst.msk [vmem:[#allocation2 + $0x158] sm:$0xff] %vm480_vm0, %v459_v61  ;;  %v462_v8 = vmax.f32 %v398_v62, 0.0  ;;  %v463_v9 = vmax.f32 %v399_v63, 0.0  ;;  %v665_v10 = vunpack.c.l.bf16 %v715_v59  ;;  %v666_v11 = vunpack.c.h.bf16 %v715_v59  ;;  %v721_v59 = vld [vmem:[%s1268_s0 + $0xf8] sm:$0xff]  }
  0x3f   :  { %525 = vst.msk [vmem:[#allocation2 + $0x160] sm:$0xff] %vm480_vm0, %v460_v2  ;;  %526 = vst.msk [vmem:[#allocation2 + $0x168] sm:$0xff] %vm480_vm0, %v461_v3  ;;  %v201_v12 = vmul.f32 %v661_v4, %v781_v1  ;;  %v202_v13 = vmul.f32 %v662_v6, %v781_v1  ;;  %v669_v14 = vunpack.c.l.bf16 %v716_v0  ;;  %v670_v15 = vunpack.c.h.bf16 %v716_v0  ;;  %v344_v6 = vld [vmem:[%s1269_s1 + $0x1c0] sm:$0xff] }
  0x40   :  { %527 = vst.msk [vmem:[#allocation2 + $0x170] sm:$0xff] %vm480_vm0, %v462_v8  ;;  %528 = vst.msk [vmem:[#allocation2 + $0x178] sm:$0xff] %vm480_vm0, %v463_v9  ;;  %v203_v18 = vmul.f32 %v665_v10, %v781_v1  ;;  %v204_v19 = vmul.f32 %v666_v11, %v781_v1  ;;  %v673_v20 = vunpack.c.l.bf16 %v717_v7  ;;  %v674_v21 = vunpack.c.h.bf16 %v717_v7  ;;  %v345_v7 = vld [vmem:[%s1269_s1 + $0x1c8] sm:$0xff] }
  0x41   :  { %v272_v22 = vadd.f32 %v789_v5, %v201_v12  ;;  %v273_v23 = vadd.f32 %v789_v5, %v202_v13  ;;  %v205_v26 = vmul.f32 %v669_v14, %v781_v1  ;;  %v206_v27 = vmul.f32 %v670_v15, %v781_v1  ;;  %v346_v14 = vld [vmem:[%s1269_s1 + $0x1d0] sm:$0xff]  ;;  %v347_v15 = vld [vmem:[%s1269_s1 + $0x1d8] sm:$0xff] }
  0x42   :  { %v274_v28 = vadd.f32 %v789_v5, %v203_v18  ;;  %v275_v29 = vadd.f32 %v789_v5, %v204_v19  ;;  %v207_v32 = vmul.f32 %v673_v20, %v781_v1  ;;  %v208_v33 = vmul.f32 %v674_v21, %v781_v1  ;;  %v348_v20 = vld [vmem:[%s1269_s1 + $0x1e0] sm:$0xff]  ;;  %v349_v21 = vld [vmem:[%s1269_s1 + $0x1e8] sm:$0xff] }
  0x43   :  { %v400_v34 = vadd.f32 %v336_v16, %v272_v22  ;;  %v401_v35 = vadd.f32 %v337_v17, %v273_v23  ;;  %v276_v36 = vadd.f32 %v789_v5, %v205_v26  ;;  %v277_v37 = vadd.f32 %v789_v5, %v206_v27 }
  0x44   :  { %v402_v40 = vadd.f32 %v338_v24, %v274_v28  ;;  %v403_v41 = vadd.f32 %v339_v25, %v275_v29  ;;  %v278_v42 = vadd.f32 %v789_v5, %v207_v32  ;;  %v279_v43 = vadd.f32 %v789_v5, %v208_v33  ;;  %v350_v28 = vld [vmem:[%s1269_s1 + $0x1f0] sm:$0xff]  ;;  %v351_v29 = vld [vmem:[%s1269_s1 + $0x1f8] sm:$0xff]  ;;  %s725_s1 = scalar_lea.vmem %s551_s15, 8192 }
  0x45   :  { %v464_v45 = vmax.f32 %v400_v34, 0.0  ;;  %v465_v46 = vmax.f32 %v401_v35, 0.0  ;;  %v404_v47 = vadd.f32 %v340_v30, %v276_v36  ;;  %v405_v48 = vadd.f32 %v341_v31, %v277_v37  ;;  %p726_p0 = scmp.ne.s32.totalorder %s551_s15, %s725_s1  ;;  %p731_p2 = scmp.lt.s32.totalorder %s725_s1, %s725_s1 }
  0x46   :  { %v466_v50 = vmax.f32 %v402_v40, 0.0  ;;  %v467_v51 = vmax.f32 %v403_v41, 0.0  ;;  %v406_v52 = vadd.f32 %v342_v38, %v278_v42  ;;  %v407_v53 = vadd.f32 %v343_v39, %v279_v43 }
  0x47   :  { %529 = vst.msk [vmem:[#allocation2 + $0x180] sm:$0xff] %vm480_vm0, %v464_v45  ;;  %530 = vst.msk [vmem:[#allocation2 + $0x188] sm:$0xff] %vm480_vm0, %v465_v46  ;;  %v468_v55 = vmax.f32 %v404_v47, 0.0  ;;  %v469_v56 = vmax.f32 %v405_v48, 0.0  ;;  %v677_v57 = vunpack.c.l.bf16 %v718_v44  ;;  %v678_v58 = vunpack.c.h.bf16 %v718_v44  ;;  %p732_p3 = por %p731_p2, %p730_p1 }
  0x48   :  { %531 = vst.msk [vmem:[#allocation2 + $0x190] sm:$0xff] %vm480_vm0, %v466_v50  ;;  %532 = vst.msk [vmem:[#allocation2 + $0x198] sm:$0xff] %vm480_vm0, %v467_v51  ;;  %v470_v60 = vmax.f32 %v406_v52, 0.0  ;;  %v471_v61 = vmax.f32 %v407_v53, 0.0  ;;  %v681_v62 = vunpack.c.l.bf16 %v719_v49  ;;  %v682_v63 = vunpack.c.h.bf16 %v719_v49 }
  0x49   :  { %533 = vst.msk [vmem:[#allocation2 + $0x1a0] sm:$0xff] %vm480_vm0, %v468_v55  ;;  %534 = vst.msk [vmem:[#allocation2 + $0x1a8] sm:$0xff] %vm480_vm0, %v469_v56  ;;  %v209_v0 = vmul.f32 %v677_v57, %v781_v1  ;;  %v210_v2 = vmul.f32 %v678_v58, %v781_v1  ;;  %v685_v3 = vunpack.c.l.bf16 %v720_v54  ;;  %v686_v4 = vunpack.c.h.bf16 %v720_v54  ;;  %p733_p4 = pnand %p732_p3, %p726_p0 }
  0x4a   :  { %535 = vst.msk [vmem:[#allocation2 + $0x1b0] sm:$0xff] %vm480_vm0, %v470_v60  ;;  %536 = vst.msk [vmem:[#allocation2 + $0x1b8] sm:$0xff] %vm480_vm0, %v471_v61  ;;  %v211_v8 = vmul.f32 %v681_v62, %v781_v1  ;;  %v212_v9 = vmul.f32 %v682_v63, %v781_v1  ;;  %v689_v10 = vunpack.c.l.bf16 %v721_v59  ;;  %v690_v11 = vunpack.c.h.bf16 %v721_v59 }
  0x4b   :  { %v280_v12 = vadd.f32 %v789_v5, %v209_v0  ;;  %v281_v13 = vadd.f32 %v789_v5, %v210_v2  ;;  %v213_v16 = vmul.f32 %v685_v3, %v781_v1  ;;  %v214_v17 = vmul.f32 %v686_v4, %v781_v1 }
  0x4c   :  { %v282_v18 = vadd.f32 %v789_v5, %v211_v8  ;;  %v283_v19 = vadd.f32 %v789_v5, %v212_v9  ;;  %v215_v22 = vmul.f32 %v689_v10, %v781_v1  ;;  %v216_v23 = vmul.f32 %v690_v11, %v781_v1 }
  0x4d   :  { %v408_v24 = vadd.f32 %v344_v6, %v280_v12  ;;  %v409_v25 = vadd.f32 %v345_v7, %v281_v13  ;;  %v284_v26 = vadd.f32 %v789_v5, %v213_v16  ;;  %v285_v27 = vadd.f32 %v789_v5, %v214_v17 }
  0x4e   :  { %v410_v30 = vadd.f32 %v346_v14, %v282_v18  ;;  %v411_v31 = vadd.f32 %v347_v15, %v283_v19  ;;  %v286_v32 = vadd.f32 %v789_v5, %v215_v22  ;;  %v287_v1 = vadd.f32 %v789_v5, %v216_v23 }
  0x4f   :  { %v472_v33 = vmax.f32 %v408_v24, 0.0  ;;  %v473_v34 = vmax.f32 %v409_v25, 0.0  ;;  %v412_v35 = vadd.f32 %v348_v20, %v284_v26  ;;  %v413_v36 = vadd.f32 %v349_v21, %v285_v27 }
  0x50   :  { %v474_v37 = vmax.f32 %v410_v30, 0.0  ;;  %v475_v38 = vmax.f32 %v411_v31, 0.0  ;;  %v414_v39 = vadd.f32 %v350_v28, %v286_v32  ;;  %v415_v40 = vadd.f32 %v351_v29, %v287_v1 }
  0x51   :  { %537 = vst.msk [vmem:[#allocation2 + $0x1c0] sm:$0xff] %vm480_vm0, %v472_v33  ;;  %538 = vst.msk [vmem:[#allocation2 + $0x1c8] sm:$0xff] %vm480_vm0, %v473_v34  ;;  %v476_v41 = vmax.f32 %v412_v35, 0.0  ;;  %v477_v42 = vmax.f32 %v413_v36, 0.0 }
  0x52   :  { %539 = vst.msk [vmem:[#allocation2 + $0x1d0] sm:$0xff] %vm480_vm0, %v474_v37  ;;  %540 = vst.msk [vmem:[#allocation2 + $0x1d8] sm:$0xff] %vm480_vm0, %v475_v38  ;;  %v478_v5 = vmax.f32 %v414_v39, 0.0  ;;  %v479_v43 = vmax.f32 %v415_v40, 0.0 }
  0x53   :  { %541 = vst.msk [vmem:[#allocation2 + $0x1e0] sm:$0xff] %vm480_vm0, %v476_v41  ;;  %542 = vst.msk [vmem:[#allocation2 + $0x1e8] sm:$0xff] %vm480_vm0, %v477_v42 }
  0x54   :  { %543 = vst.msk [vmem:[#allocation2 + $0x1f0] sm:$0xff] %vm480_vm0, %v478_v5  ;;  %544 = vst.msk [vmem:[#allocation2 + $0x1f8] sm:$0xff] %vm480_vm0, %v479_v43 }
  0x55   :  { %736 = shalt.err (!%p733_p4)
}
  0x56   :  { %s748_s16 = smov 128   ;;  %s749_s17 = smov 8  }
  0x57   :  { %556 = dma.vmem_to_hbm [thread:$0]  %s551_s15, 8192, %s1272_s4, [#allocation3], %s748_s16, %s748_s16, %s749_s17  }
  0x58   :  { %745 = dma.done.wait [#allocation3], 8192  }
  0x59   :  { %746 = vsyncadd [#allocation3], 4294959104 }
  0x5a   :  { %560 = vsyncpa [#allocation3], 1 }

// kernel: bottleneck_forward.4
= control target key start
LH: loop header
LB: loop body
LE: loop exit
PB: predicated region body
PF: predicated region fallthrough
CT: control target
= control target key end

     0   :  { %9 = vsyncpa [#allocation3], 0  ;;  %s1472_s12 = smov [#allocation2]   ;;  %s2145_s0 = inlined_call_operand.hbm [shape: f32[512,16], index: 0, kind: input, shape index: {}]   ;;  %s2146_s1 = inlined_call_operand.vmem [shape: bf16[16,4], index: 1, kind: input, shape index: {}]   ;;  %s2147_s2 = inlined_call_operand.vmem [shape: bf16[512,4], index: 2, kind: output, shape index: {0}]   ;;  %s2148_s3 = inlined_call_operand.vmem [shape: f32[1,8,4], index: 3, kind: output, shape index: {1}]  }
   0x1   :  { %s15_s13 = sshll.u32 %s1472_s12, 4  ;;  %s16_s13 = int_to_ptr.vmem [resolvable:$true] %s15_s13 }
   0x2   :  { %s1458_s14 = scalar_lea.vmem %s16_s13, 8192  ;;  %p1463_p1 = scmp.lt.s32.totalorder %s16_s13, %s16_s13 }
   0x3   :  { %p1459_p0 = scmp.ne.s32.totalorder %s16_s13, %s1458_s14  ;;  %p1464_p2 = scmp.lt.s32.totalorder %s1458_s14, %s1458_s14 }
   0x5   :  { %p1465_p3 = por %p1464_p2, %p1463_p1 }
   0x7   :  { %p1466_p4 = pnand %p1465_p3, %p1459_p0 }
   0x9   :  { %1469 = shalt.err (!%p1466_p4)
}
   0xa   :  { %s1473_s15 = smov 128   ;;  %s1474_s16 = smov 8  }
   0xb   :  { %21 = dma.hbm_to_vmem [thread:$0]  %s2145_s0, 8192, %s16_s13, [#allocation3], %s1473_s15, %s1473_s15, %s1474_s16  }
   0xc   :  { %1470 = dma.done.wait [#allocation3], 8192  }
   0xd   :  { %1471 = vsyncadd [#allocation3], 4294959104  ;;  %v1449_v0 = vld [vmem:[%s2146_s1] sm:$0xff]   ;;  %v29_v2 = vld [vmem:[#allocation2 + $0x8] sm:$0xff]  ;;  %vm132_vm0 = vcmask 130048   ;;  %vm774_vm1 = vcmask 27648  }
   0xe   :  { %v28_v1 = vld [vmem:[#allocation2] sm:$0xff]  ;;  %v30_v3 = vld [vmem:[#allocation2 + $0x10] sm:$0xff]  ;;  %1378 = vmatprep.subr.bf16.mxu0 %v1449_v0  ;;  %v31_v5 = vld [vmem:[#allocation2 + $0x18] sm:$0xff]  ;;  %1444 = vmatprep.subr.bf16.mxu1 %v1449_v0  ;;  %vm839_vm2 = vcmask 31744   ;;  %vm1170_vm3 = vcmask 1040384   ;;  %vm1172_vm4 = vcmask 1041408  }
   0xf   :  { %v92_v4 = vpack.c.bf16 %v29_v2, %v28_v1  ;;  %v32_v6 = vld [vmem:[#allocation2 + $0x20] sm:$0xff]  ;;  %v33_v7 = vld [vmem:[#allocation2 + $0x28] sm:$0xff]  ;;  %1379 = vmatpush3.bf16.msra.mxu0 %v1449_v0  ;;  %v93_v8 = vpack.c.bf16 %v31_v5, %v30_v3  ;;  %1445 = vmatpush3.bf16.msra.mxu1 %v1449_v0  ;;  %v34_v10 = vld [vmem:[#allocation2 + $0x30] sm:$0xff] }
  0x10   :  { %v94_v9 = vpack.c.bf16 %v33_v7, %v32_v6  ;;  %v35_v11 = vld [vmem:[#allocation2 + $0x38] sm:$0xff]  ;;  %v36_v12 = vld [vmem:[#allocation2 + $0x40] sm:$0xff]  ;;  %v37_v13 = vld [vmem:[#allocation2 + $0x48] sm:$0xff] }
  0x11   :  { %1380 = vmatprep.mubr.msk.bf16.mxu0 %vm132_vm0, %v92_v4  ;;  %v95_v14 = vpack.c.bf16 %v35_v11, %v34_v10  ;;  %v96_v15 = vpack.c.bf16 %v37_v13, %v36_v12  ;;  %v60_v16 = vld [vmem:[#allocation2 + $0x100] sm:$0xff]  ;;  %v61_v17 = vld [vmem:[#allocation2 + $0x108] sm:$0xff]  ;;  %v62_v18 = vld [vmem:[#allocation2 + $0x110] sm:$0xff] }
  0x12   :  { %1381 = vmatmul.mubr.msk.bf16.vlgmr.msra.gmra.mxu0 %vm132_vm0, %v93_v8  ;;  %v63_v19 = vld [vmem:[#allocation2 + $0x118] sm:$0xff]  ;;  %v108_v20 = vpack.c.bf16 %v61_v17, %v60_v16  ;;  %v64_v22 = vld [vmem:[#allocation2 + $0x120] sm:$0xff]  ;;  %v65_v23 = vld [vmem:[#allocation2 + $0x128] sm:$0xff] }
  0x13   :  { %1384 = vmatprep.mubr.msk.bf16.mxu0 %vm132_vm0, %v94_v9  ;;  %v109_v21 = vpack.c.bf16 %v63_v19, %v62_v18  ;;  %v110_v24 = vpack.c.bf16 %v65_v23, %v64_v22  ;;  %v38_v25 = vld [vmem:[#allocation2 + $0x50] sm:$0xff]  ;;  %v39_v26 = vld [vmem:[#allocation2 + $0x58] sm:$0xff]  ;;  %v40_v27 = vld [vmem:[#allocation2 + $0x60] sm:$0xff] }
  0x14   :  { %1412 = vmatprep.mubr.msk.bf16.mxu1 %vm132_vm0, %v108_v20  ;;  %v41_v28 = vld [vmem:[#allocation2 + $0x68] sm:$0xff]  ;;  %v66_v29 = vld [vmem:[#allocation2 + $0x130] sm:$0xff]  ;;  %v67_v30 = vld [vmem:[#allocation2 + $0x138] sm:$0xff]  ;;  %v97_v31 = vpack.c.bf16 %v39_v26, %v38_v25 }
  0x15   :  { %1413 = vmatmul.mubr.msk.bf16.vlgmr.msra.gmra.mxu1 %vm132_vm0, %v109_v21  ;;  %v68_v32 = vld [vmem:[#allocation2 + $0x140] sm:$0xff]  ;;  %v69_v33 = vld [vmem:[#allocation2 + $0x148] sm:$0xff]  ;;  %v98_v34 = vpack.c.bf16 %v41_v28, %v40_v27  ;;  %v111_v35 = vpack.c.bf16 %v67_v30, %v66_v29  ;;  %v42_v37 = vld [vmem:[#allocation2 + $0x70] sm:$0xff] }
  0x16   :  { %1416 = vmatprep.mubr.msk.bf16.mxu1 %vm132_vm0, %v110_v24  ;;  %v112_v36 = vpack.c.bf16 %v69_v33, %v68_v32  ;;  %v43_v38 = vld [vmem:[#allocation2 + $0x78] sm:$0xff]  ;;  %v44_v39 = vld [vmem:[#allocation2 + $0x80] sm:$0xff]  ;;  %v45_v40 = vld [vmem:[#allocation2 + $0x88] sm:$0xff] }
  0x17   :  { %v70_v41 = vld [vmem:[#allocation2 + $0x150] sm:$0xff]  ;;  %v71_v42 = vld [vmem:[#allocation2 + $0x158] sm:$0xff]  ;;  %v99_v43 = vpack.c.bf16 %v43_v38, %v42_v37  ;;  %v72_v44 = vld [vmem:[#allocation2 + $0x160] sm:$0xff]  ;;  %v100_v46 = vpack.c.bf16 %v45_v40, %v44_v39 }
  0x18   :  { %v73_v45 = vld [vmem:[#allocation2 + $0x168] sm:$0xff]  ;;  %v113_v47 = vpack.c.bf16 %v71_v42, %v70_v41  ;;  %v46_v49 = vld [vmem:[#allocation2 + $0x90] sm:$0xff]  ;;  %v47_v50 = vld [vmem:[#allocation2 + $0x98] sm:$0xff] }
  0x19   :  { %v114_v48 = vpack.c.bf16 %v73_v45, %v72_v44  ;;  %v48_v51 = vld [vmem:[#allocation2 + $0xa0] sm:$0xff]  ;;  %v49_v52 = vld [vmem:[#allocation2 + $0xa8] sm:$0xff]  ;;  %v74_v53 = vld [vmem:[#allocation2 + $0x170] sm:$0xff]  ;;  %v101_v55 = vpack.c.bf16 %v47_v50, %v46_v49 }
  0x1a   :  { %1385 = vmatmul.mubr.msk.bf16.gmra.mxu0 %vm132_vm0, %v95_v14  ;;  %v75_v54 = vld [vmem:[#allocation2 + $0x178] sm:$0xff]  ;;  %v76_v56 = vld [vmem:[#allocation2 + $0x180] sm:$0xff]  ;;  %v77_v57 = vld [vmem:[#allocation2 + $0x188] sm:$0xff]  ;;  %v102_v58 = vpack.c.bf16 %v49_v52, %v48_v51 }
  0x1b   :  { %1388 = vmatprep.mubr.msk.bf16.mxu0 %vm132_vm0, %v96_v15  ;;  %v115_v59 = vpack.c.bf16 %v75_v54, %v74_v53  ;;  %v116_v60 = vpack.c.bf16 %v77_v57, %v76_v56  ;;  %v50_v61 = vld [vmem:[#allocation2 + $0xb0] sm:$0xff]  ;;  %v51_v62 = vld [vmem:[#allocation2 + $0xb8] sm:$0xff]  ;;  %v52_v63 = vld [vmem:[#allocation2 + $0xc0] sm:$0xff] }
  0x1c   :  { %v53_v0 = vld [vmem:[#allocation2 + $0xc8] sm:$0xff]  ;;  %v78_v1 = vld [vmem:[#allocation2 + $0x190] sm:$0xff]  ;;  %v79_v2 = vld [vmem:[#allocation2 + $0x198] sm:$0xff]  ;;  %v103_v3 = vpack.c.bf16 %v51_v62, %v50_v61 }
  0x1d   :  { %1417 = vmatmul.mubr.msk.bf16.gmra.mxu1 %vm132_vm0, %v111_v35  ;;  %v80_v4 = vld [vmem:[#allocation2 + $0x1a0] sm:$0xff]  ;;  %v81_v5 = vld [vmem:[#allocation2 + $0x1a8] sm:$0xff]  ;;  %v104_v6 = vpack.c.bf16 %v53_v0, %v52_v63  ;;  %v117_v7 = vpack.c.bf16 %v79_v2, %v78_v1  ;;  %v54_v9 = vld [vmem:[#allocation2 + $0xd0] sm:$0xff] }
  0x1e   :  { %1420 = vmatprep.mubr.msk.bf16.mxu1 %vm132_vm0, %v112_v36  ;;  %v118_v8 = vpack.c.bf16 %v81_v5, %v80_v4  ;;  %v55_v10 = vld [vmem:[#allocation2 + $0xd8] sm:$0xff]  ;;  %v56_v11 = vld [vmem:[#allocation2 + $0xe0] sm:$0xff]  ;;  %v57_v12 = vld [vmem:[#allocation2 + $0xe8] sm:$0xff] }
  0x1f   :  { %v82_v13 = vld [vmem:[#allocation2 + $0x1b0] sm:$0xff]  ;;  %v83_v14 = vld [vmem:[#allocation2 + $0x1b8] sm:$0xff]  ;;  %v105_v15 = vpack.c.bf16 %v55_v10, %v54_v9  ;;  %v84_v16 = vld [vmem:[#allocation2 + $0x1c0] sm:$0xff]  ;;  %v106_v18 = vpack.c.bf16 %v57_v12, %v56_v11 }
  0x20   :  { %v85_v17 = vld [vmem:[#allocation2 + $0x1c8] sm:$0xff]  ;;  %v119_v19 = vpack.c.bf16 %v83_v14, %v82_v13  ;;  %v58_v21 = vld [vmem:[#allocation2 + $0xf0] sm:$0xff]  ;;  %v59_v22 = vld [vmem:[#allocation2 + $0xf8] sm:$0xff] }
  0x21   :  { %v120_v20 = vpack.c.bf16 %v85_v17, %v84_v16  ;;  %v86_v23 = vld [vmem:[#allocation2 + $0x1d0] sm:$0xff]  ;;  %v87_v24 = vld [vmem:[#allocation2 + $0x1d8] sm:$0xff]  ;;  %v107_v25 = vpack.c.bf16 %v59_v22, %v58_v21  ;;  %v88_v26 = vld [vmem:[#allocation2 + $0x1e0] sm:$0xff] }
  0x22   :  { %1389 = vmatmul.mubr.msk.bf16.gmra.mxu0 %vm132_vm0, %v97_v31  ;;  %v89_v27 = vld [vmem:[#allocation2 + $0x1e8] sm:$0xff]  ;;  %v121_v28 = vpack.c.bf16 %v87_v24, %v86_v23  ;;  %v90_v30 = vld [vmem:[#allocation2 + $0x1f0] sm:$0xff]  ;;  %v91_v31 = vld [vmem:[#allocation2 + $0x1f8] sm:$0xff] }
  0x23   :  { %1392 = vmatprep.mubr.msk.bf16.mxu0 %vm132_vm0, %v98_v34  ;;  %v122_v29 = vpack.c.bf16 %v89_v27, %v88_v26  ;;  %v123_v32 = vpack.c.bf16 %v91_v31, %v90_v30 }
  0x25   :  { %1421 = vmatmul.mubr.msk.bf16.gmra.mxu1 %vm132_vm0, %v113_v47 }
  0x26   :  { %1424 = vmatprep.mubr.msk.bf16.mxu1 %vm132_vm0, %v114_v48 }
  0x2a   :  { %1393 = vmatmul.mubr.msk.bf16.gmra.mxu0 %vm132_vm0, %v99_v43 }
  0x2b   :  { %1396 = vmatprep.mubr.msk.bf16.mxu0 %vm132_vm0, %v100_v46 }
  0x2d   :  { %1425 = vmatmul.mubr.msk.bf16.gmra.mxu1 %vm132_vm0, %v115_v59 }
  0x2e   :  { %1428 = vmatprep.mubr.msk.bf16.mxu1 %vm132_vm0, %v116_v60 }
  0x32   :  { %1397 = vmatmul.mubr.msk.bf16.gmra.mxu0 %vm132_vm0, %v101_v55 }
  0x33   :  { %1400 = vmatprep.mubr.msk.bf16.mxu0 %vm132_vm0, %v102_v58 }
  0x35   :  { %1429 = vmatmul.mubr.msk.bf16.gmra.mxu1 %vm132_vm0, %v117_v7 }
  0x36   :  { %1432 = vmatprep.mubr.msk.bf16.mxu1 %vm132_vm0, %v118_v8 }
  0x3a   :  { %1401 = vmatmul.mubr.msk.bf16.gmra.mxu0 %vm132_vm0, %v103_v3 }
  0x3b   :  { %1404 = vmatprep.mubr.msk.bf16.mxu0 %vm132_vm0, %v104_v6 }
  0x3d   :  { %1433 = vmatmul.mubr.msk.bf16.gmra.mxu1 %vm132_vm0, %v119_v19 }
  0x3e   :  { %1436 = vmatprep.mubr.msk.bf16.mxu1 %vm132_vm0, %v120_v20 }
  0x42   :  { %1405 = vmatmul.mubr.msk.bf16.gmra.mxu0 %vm132_vm0, %v105_v15 }
  0x43   :  { %1408 = vmatprep.mubr.msk.bf16.mxu0 %vm132_vm0, %v106_v18 }
  0x45   :  { %1437 = vmatmul.mubr.msk.bf16.gmra.mxu1 %vm132_vm0, %v121_v28 }
  0x46   :  { %1440 = vmatprep.mubr.msk.bf16.mxu1 %vm132_vm0, %v122_v29 }
  0x4a   :  { %1409 = vmatmul.mubr.msk.bf16.gmra.mxu0 %vm132_vm0, %v107_v25 }
  0x4d   :  { %1441 = vmatmul.mubr.msk.bf16.gmra.mxu1 %vm132_vm0, %v123_v32 }
  0xd2   :  { %v1382_v33 = vpop.f32.mrf.mxu0 }
  0xd3   :  { %v1283_v34 = vpack.c.bf16 %v1382_v33, %v1382_v33  ;;  %v975_v40 = vmul.f32 %v1382_v33, %v1382_v33  ;;  %v843_v46 = vsel %vm839_vm2, %v1382_v33, 0.0 }
  0xd4   :  { %v263_v35 = vpop.f32.mrf.mxu0 }
  0xd5   :  { %777 = vst.msk [vmem:[%s2147_s2 + $0x8] sm:$0xf] %vm774_vm1, %v1283_v34  ;;  %v1281_v36 = vpack.c.bf16 %v263_v35, %v263_v35  ;;  %v973_v38 = vmul.f32 %v263_v35, %v263_v35  ;;  %v840_v42 = vsel %vm839_vm2, %v263_v35, 0.0  ;;  %v1554_v56 = vpop.f32.mrf.mxu1  ;;  %v1040_v57 = vsel %vm839_vm2, %v975_v40, 0.0 }
  0xd6   :  { %v1383_v37 = vpop.f32.mrf.mxu0  ;;  %v1315_v0 = vpack.c.bf16 %v1554_v56, %v1554_v56 }
  0xd7   :  { %775 = vst.msk [vmem:[%s2147_s2] sm:$0xf] %vm774_vm1, %v1281_v36  ;;  %v1284_v39 = vpack.c.bf16 %v1383_v37, %v1383_v37  ;;  %v1037_v49 = vsel %vm839_vm2, %v973_v38, 0.0  ;;  %v976_v50 = vmul.f32 %v1383_v37, %v1383_v37  ;;  %v845_v58 = vsel %vm839_vm2, %v1383_v37, 0.0  ;;  %v1564_v1 = vpop.f32.mrf.mxu1 }
  0xd8   :  { %v266_v41 = vpop.f32.mrf.mxu0  ;;  %809 = vst.msk [vmem:[%s2147_s2 + $0x88] sm:$0xf] %vm774_vm1, %v1315_v0  ;;  %v1313_v9 = vpack.c.bf16 %v1564_v1, %v1564_v1 }
  0xd9   :  { %778 = vst.msk [vmem:[%s2147_s2 + $0xc] sm:$0xf] %vm774_vm1, %v1284_v39  ;;  %v1282_v43 = vpack.c.bf16 %v266_v41, %v266_v41  ;;  %v841_v44 = vsel %vm839_vm2, %v266_v41, 0.0  ;;  %v974_v45 = vmul.f32 %v266_v41, %v266_v41  ;;  %v1042_v2 = vsel %vm839_vm2, %v976_v50, 0.0  ;;  %v1578_v10 = vpop.f32.mrf.mxu1 }
  0xda   :  { %v842_v47 = vadd.f32 %v841_v44, %v840_v42  ;;  %v1386_v48 = vpop.f32.mrf.mxu0  ;;  %807 = vst.msk [vmem:[%s2147_s2 + $0x80] sm:$0xf] %vm774_vm1, %v1313_v9  ;;  %v1316_v26 = vpack.c.bf16 %v1578_v10, %v1578_v10 }
  0xdb   :  { %776 = vst.msk [vmem:[%s2147_s2 + $0x4] sm:$0xf] %vm774_vm1, %v1282_v43  ;;  %v1038_v51 = vsel %vm839_vm2, %v974_v45, 0.0  ;;  %v1287_v52 = vpack.c.bf16 %v1386_v48, %v1386_v48  ;;  %v979_v5 = vmul.f32 %v1386_v48, %v1386_v48  ;;  %v1590_v18 = vpop.f32.mrf.mxu1  ;;  %v851_v19 = vsel %vm839_vm2, %v1386_v48, 0.0 }
  0xdc   :  { %v844_v53 = vadd.f32 %v843_v46, %v842_v47  ;;  %v1039_v54 = vadd.f32 %v1038_v51, %v1037_v49  ;;  %v279_v55 = vpop.f32.mrf.mxu0  ;;  %810 = vst.msk [vmem:[%s2147_s2 + $0x8c] sm:$0xf] %vm774_vm1, %v1316_v26  ;;  %v1314_v43 = vpack.c.bf16 %v1590_v18, %v1590_v18 }
  0xdd   :  { %781 = vst.msk [vmem:[%s2147_s2 + $0x18] sm:$0xf] %vm774_vm1, %v1287_v52  ;;  %v1285_v59 = vpack.c.bf16 %v279_v55, %v279_v55  ;;  %v977_v60 = vmul.f32 %v279_v55, %v279_v55  ;;  %v847_v3 = vsel %vm839_vm2, %v279_v55, 0.0  ;;  %v1600_v27 = vpop.f32.mrf.mxu1  ;;  %v1048_v28 = vsel %vm839_vm2, %v979_v5, 0.0 }
  0xde   :  { %v1041_v61 = vadd.f32 %v1040_v57, %v1039_v54  ;;  %v846_v62 = vadd.f32 %v845_v58, %v844_v53  ;;  %v1387_v63 = vpop.f32.mrf.mxu0  ;;  %808 = vst.msk [vmem:[%s2147_s2 + $0x84] sm:$0xf] %vm774_vm1, %v1314_v43 }
  0xdf   :  { %779 = vst.msk [vmem:[%s2147_s2 + $0x10] sm:$0xf] %vm774_vm1, %v1285_v59  ;;  %v1288_v4 = vpack.c.bf16 %v1387_v63, %v1387_v63  ;;  %v1044_v11 = vsel %vm839_vm2, %v977_v60, 0.0  ;;  %v980_v20 = vmul.f32 %v1387_v63, %v1387_v63  ;;  %v853_v29 = vsel %vm839_vm2, %v1387_v63, 0.0  ;;  %v1612_v35 = vpop.f32.mrf.mxu1 }
  0xe0   :  { %v848_v6 = vadd.f32 %v847_v3, %v846_v62  ;;  %v1043_v7 = vadd.f32 %v1042_v2, %v1041_v61  ;;  %v282_v8 = vpop.f32.mrf.mxu0  ;;  %v1319_v61 = vpack.c.bf16 %v1600_v27, %v1600_v27 }
  0xe1   :  { %782 = vst.msk [vmem:[%s2147_s2 + $0x1c] sm:$0xf] %vm774_vm1, %v1288_v4  ;;  %v1286_v12 = vpack.c.bf16 %v282_v8, %v282_v8  ;;  %v849_v13 = vsel %vm839_vm2, %v282_v8, 0.0  ;;  %v978_v14 = vmul.f32 %v282_v8, %v282_v8  ;;  %v1050_v36 = vsel %vm839_vm2, %v980_v20, 0.0  ;;  %v1622_v44 = vpop.f32.mrf.mxu1 }
  0xe2   :  { %v1045_v15 = vadd.f32 %v1044_v11, %v1043_v7  ;;  %v850_v16 = vadd.f32 %v849_v13, %v848_v6  ;;  %v1390_v17 = vpop.f32.mrf.mxu0  ;;  %813 = vst.msk [vmem:[%s2147_s2 + $0x98] sm:$0xf] %vm774_vm1, %v1319_v61 }
  0xe3   :  { %780 = vst.msk [vmem:[%s2147_s2 + $0x14] sm:$0xf] %vm774_vm1, %v1286_v12  ;;  %v1046_v21 = vsel %vm839_vm2, %v978_v14, 0.0  ;;  %v1291_v22 = vpack.c.bf16 %v1390_v17, %v1390_v17  ;;  %v983_v39 = vmul.f32 %v1390_v17, %v1390_v17  ;;  %v1634_v52 = vpop.f32.mrf.mxu1  ;;  %v859_v53 = vsel %vm839_vm2, %v1390_v17, 0.0 }
  0xe4   :  { %v852_v23 = vadd.f32 %v851_v19, %v850_v16  ;;  %v1047_v24 = vadd.f32 %v1046_v21, %v1045_v15  ;;  %v295_v25 = vpop.f32.mrf.mxu0  ;;  %v1317_v16 = vpack.c.bf16 %v1612_v35, %v1612_v35 }
  0xe5   :  { %785 = vst.msk [vmem:[%s2147_s2 + $0x28] sm:$0xf] %vm774_vm1, %v1291_v22  ;;  %v1289_v30 = vpack.c.bf16 %v295_v25, %v295_v25  ;;  %v981_v31 = vmul.f32 %v295_v25, %v295_v25  ;;  %v855_v37 = vsel %vm839_vm2, %v295_v25, 0.0  ;;  %v1644_v62 = vpop.f32.mrf.mxu1  ;;  %v1056_v63 = vsel %vm839_vm2, %v983_v39, 0.0 }
  0xe6   :  { %v1049_v32 = vadd.f32 %v1048_v28, %v1047_v24  ;;  %v854_v33 = vadd.f32 %v853_v29, %v852_v23  ;;  %v1391_v34 = vpop.f32.mrf.mxu0  ;;  %811 = vst.msk [vmem:[%s2147_s2 + $0x90] sm:$0xf] %vm774_vm1, %v1317_v16 }
  0xe7   :  { %783 = vst.msk [vmem:[%s2147_s2 + $0x20] sm:$0xf] %vm774_vm1, %v1289_v30  ;;  %v1292_v38 = vpack.c.bf16 %v1391_v34, %v1391_v34  ;;  %v1052_v45 = vsel %vm839_vm2, %v981_v31, 0.0  ;;  %v984_v54 = vmul.f32 %v1391_v34, %v1391_v34  ;;  %v861_v0 = vsel %vm839_vm2, %v1391_v34, 0.0  ;;  %v1656_v7 = vpop.f32.mrf.mxu1 }
  0xe8   :  { %v856_v40 = vadd.f32 %v855_v37, %v854_v33  ;;  %v1051_v41 = vadd.f32 %v1050_v36, %v1049_v32  ;;  %v298_v42 = vpop.f32.mrf.mxu0  ;;  %v1320_v36 = vpack.c.bf16 %v1622_v44, %v1622_v44 }
  0xe9   :  { %786 = vst.msk [vmem:[%s2147_s2 + $0x2c] sm:$0xf] %vm774_vm1, %v1292_v38  ;;  %v1290_v46 = vpack.c.bf16 %v298_v42, %v298_v42  ;;  %v857_v47 = vsel %vm839_vm2, %v298_v42, 0.0  ;;  %v982_v48 = vmul.f32 %v298_v42, %v298_v42  ;;  %v1058_v8 = vsel %vm839_vm2, %v984_v54, 0.0  ;;  %v1666_v17 = vpop.f32.mrf.mxu1 }
  0xea   :  { %v1053_v49 = vadd.f32 %v1052_v45, %v1051_v41  ;;  %v858_v50 = vadd.f32 %v857_v47, %v856_v40  ;;  %v1394_v51 = vpop.f32.mrf.mxu0  ;;  %814 = vst.msk [vmem:[%s2147_s2 + $0x9c] sm:$0xf] %vm774_vm1, %v1320_v36 }
  0xeb   :  { %784 = vst.msk [vmem:[%s2147_s2 + $0x24] sm:$0xf] %vm774_vm1, %v1290_v46  ;;  %v1054_v55 = vsel %vm839_vm2, %v982_v48, 0.0  ;;  %v1295_v57 = vpack.c.bf16 %v1394_v51, %v1394_v51  ;;  %v987_v12 = vmul.f32 %v1394_v51, %v1394_v51  ;;  %v1678_v26 = vpop.f32.mrf.mxu1  ;;  %v867_v28 = vsel %vm839_vm2, %v1394_v51, 0.0 }
  0xec   :  { %v860_v58 = vadd.f32 %v859_v53, %v858_v50  ;;  %v1055_v59 = vadd.f32 %v1054_v55, %v1053_v49  ;;  %v311_v60 = vpop.f32.mrf.mxu0  ;;  %v1318_v55 = vpack.c.bf16 %v1634_v52, %v1634_v52 }
  0xed   :  { %789 = vst.msk [vmem:[%s2147_s2 + $0x38] sm:$0xf] %vm774_vm1, %v1295_v57  ;;  %v1293_v2 = vpack.c.bf16 %v311_v60, %v311_v60  ;;  %v985_v3 = vmul.f32 %v311_v60, %v311_v60  ;;  %v863_v9 = vsel %vm839_vm2, %v311_v60, 0.0  ;;  %v1688_v37 = vpop.f32.mrf.mxu1  ;;  %v1064_v38 = vsel %vm839_vm2, %v987_v12, 0.0 }
  0xee   :  { %v1057_v4 = vadd.f32 %v1056_v63, %v1055_v59  ;;  %v862_v5 = vadd.f32 %v861_v0, %v860_v58  ;;  %v1395_v6 = vpop.f32.mrf.mxu0  ;;  %812 = vst.msk [vmem:[%s2147_s2 + $0x94] sm:$0xf] %vm774_vm1, %v1318_v55 }
  0xef   :  { %787 = vst.msk [vmem:[%s2147_s2 + $0x30] sm:$0xf] %vm774_vm1, %v1293_v2  ;;  %v1296_v11 = vpack.c.bf16 %v1395_v6, %v1395_v6  ;;  %v1060_v19 = vsel %vm839_vm2, %v985_v3, 0.0  ;;  %v988_v29 = vmul.f32 %v1395_v6, %v1395_v6  ;;  %v869_v39 = vsel %vm839_vm2, %v1395_v6, 0.0  ;;  %v1700_v46 = vpop.f32.mrf.mxu1 }
  0xf0   :  { %v864_v13 = vadd.f32 %v863_v9, %v862_v5  ;;  %v1059_v14 = vadd.f32 %v1058_v8, %v1057_v4  ;;  %v314_v15 = vpop.f32.mrf.mxu0 }
  0xf1   :  { %790 = vst.msk [vmem:[%s2147_s2 + $0x3c] sm:$0xf] %vm774_vm1, %v1296_v11  ;;  %v1294_v20 = vpack.c.bf16 %v314_v15, %v314_v15  ;;  %v865_v21 = vsel %vm839_vm2, %v314_v15, 0.0  ;;  %v986_v22 = vmul.f32 %v314_v15, %v314_v15  ;;  %v1066_v47 = vsel %vm839_vm2, %v988_v29, 0.0  ;;  %v1710_v57 = vpop.f32.mrf.mxu1 }
  0xf2   :  { %v1061_v23 = vadd.f32 %v1060_v19, %v1059_v14  ;;  %v866_v24 = vadd.f32 %v865_v21, %v864_v13  ;;  %v1398_v25 = vpop.f32.mrf.mxu0  ;;  %v1323_v13 = vpack.c.bf16 %v1644_v62, %v1644_v62 }
  0xf3   :  { %788 = vst.msk [vmem:[%s2147_s2 + $0x34] sm:$0xf] %vm774_vm1, %v1294_v20  ;;  %v1062_v30 = vsel %vm839_vm2, %v986_v22, 0.0  ;;  %v1299_v31 = vpack.c.bf16 %v1398_v25, %v1398_v25  ;;  %v991_v50 = vmul.f32 %v1398_v25, %v1398_v25  ;;  %v1722_v3 = vpop.f32.mrf.mxu1  ;;  %v875_v4 = vsel %vm839_vm2, %v1398_v25, 0.0 }
  0xf4   :  { %v868_v32 = vadd.f32 %v867_v28, %v866_v24  ;;  %v1063_v33 = vadd.f32 %v1062_v30, %v1061_v23  ;;  %v327_v34 = vpop.f32.mrf.mxu0  ;;  %817 = vst.msk [vmem:[%s2147_s2 + $0xa8] sm:$0xf] %vm774_vm1, %v1323_v13 }
  0xf5   :  { %793 = vst.msk [vmem:[%s2147_s2 + $0x48] sm:$0xf] %vm774_vm1, %v1299_v31  ;;  %v1297_v40 = vpack.c.bf16 %v327_v34, %v327_v34  ;;  %v989_v41 = vmul.f32 %v327_v34, %v327_v34  ;;  %v871_v48 = vsel %vm839_vm2, %v327_v34, 0.0  ;;  %v1732_v14 = vpop.f32.mrf.mxu1  ;;  %v1072_v15 = vsel %vm839_vm2, %v991_v50, 0.0 }
  0xf6   :  { %v1065_v42 = vadd.f32 %v1064_v38, %v1063_v33  ;;  %v870_v43 = vadd.f32 %v869_v39, %v868_v32  ;;  %v1399_v45 = vpop.f32.mrf.mxu0  ;;  %v1321_v34 = vpack.c.bf16 %v1656_v7, %v1656_v7 }
  0xf7   :  { %791 = vst.msk [vmem:[%s2147_s2 + $0x40] sm:$0xf] %vm774_vm1, %v1297_v40  ;;  %v1300_v49 = vpack.c.bf16 %v1399_v45, %v1399_v45  ;;  %v1068_v58 = vsel %vm839_vm2, %v989_v41, 0.0  ;;  %v992_v5 = vmul.f32 %v1399_v45, %v1399_v45  ;;  %v877_v16 = vsel %vm839_vm2, %v1399_v45, 0.0  ;;  %v1744_v24 = vpop.f32.mrf.mxu1 }
  0xf8   :  { %v872_v51 = vadd.f32 %v871_v48, %v870_v43  ;;  %v1067_v53 = vadd.f32 %v1066_v47, %v1065_v42  ;;  %v330_v54 = vpop.f32.mrf.mxu0  ;;  %815 = vst.msk [vmem:[%s2147_s2 + $0xa0] sm:$0xf] %vm774_vm1, %v1321_v34 }
  0xf9   :  { %794 = vst.msk [vmem:[%s2147_s2 + $0x4c] sm:$0xf] %vm774_vm1, %v1300_v49  ;;  %v1298_v59 = vpack.c.bf16 %v330_v54, %v330_v54  ;;  %v873_v60 = vsel %vm839_vm2, %v330_v54, 0.0  ;;  %v990_v61 = vmul.f32 %v330_v54, %v330_v54  ;;  %v1074_v25 = vsel %vm839_vm2, %v992_v5, 0.0  ;;  %v1754_v36 = vpop.f32.mrf.mxu1 }
  0xfa   :  { %v1069_v63 = vadd.f32 %v1068_v58, %v1067_v53  ;;  %v874_v0 = vadd.f32 %v873_v60, %v872_v51  ;;  %v1402_v2 = vpop.f32.mrf.mxu0  ;;  %v1324_v58 = vpack.c.bf16 %v1666_v17, %v1666_v17 }
  0xfb   :  { %792 = vst.msk [vmem:[%s2147_s2 + $0x44] sm:$0xf] %vm774_vm1, %v1298_v59  ;;  %v1070_v6 = vsel %vm839_vm2, %v990_v61, 0.0  ;;  %v1303_v8 = vpack.c.bf16 %v1402_v2, %v1402_v2  ;;  %v995_v30 = vmul.f32 %v1402_v2, %v1402_v2  ;;  %v1766_v47 = vpop.f32.mrf.mxu1  ;;  %v883_v48 = vsel %vm839_vm2, %v1402_v2, 0.0 }
  0xfc   :  { %v876_v9 = vadd.f32 %v875_v4, %v874_v0  ;;  %v1071_v11 = vadd.f32 %v1070_v6, %v1069_v63  ;;  %v343_v12 = vpop.f32.mrf.mxu0  ;;  %818 = vst.msk [vmem:[%s2147_s2 + $0xac] sm:$0xf] %vm774_vm1, %v1324_v58 }
  0xfd   :  { %797 = vst.msk [vmem:[%s2147_s2 + $0x58] sm:$0xf] %vm774_vm1, %v1303_v8  ;;  %v1301_v19 = vpack.c.bf16 %v343_v12, %v343_v12  ;;  %v993_v20 = vmul.f32 %v343_v12, %v343_v12  ;;  %v879_v28 = vsel %vm839_vm2, %v343_v12, 0.0  ;;  %v1776_v59 = vpop.f32.mrf.mxu1  ;;  %v1080_v60 = vsel %vm839_vm2, %v995_v30, 0.0 }
  0xfe   :  { %v1073_v21 = vadd.f32 %v1072_v15, %v1071_v11  ;;  %v878_v22 = vadd.f32 %v877_v16, %v876_v9  ;;  %v1403_v23 = vpop.f32.mrf.mxu0 }
  0xff   :  { %795 = vst.msk [vmem:[%s2147_s2 + $0x50] sm:$0xf] %vm774_vm1, %v1301_v19  ;;  %v1304_v29 = vpack.c.bf16 %v1403_v23, %v1403_v23  ;;  %v1076_v38 = vsel %vm839_vm2, %v993_v20, 0.0  ;;  %v996_v49 = vmul.f32 %v1403_v23, %v1403_v23  ;;  %v885_v61 = vsel %vm839_vm2, %v1403_v23, 0.0  ;;  %v1788_v6 = vpop.f32.mrf.mxu1 }
 0x100   :  { %v880_v31 = vadd.f32 %v879_v28, %v878_v22  ;;  %v1075_v32 = vadd.f32 %v1074_v25, %v1073_v21  ;;  %v346_v33 = vpop.f32.mrf.mxu0  ;;  %v1322_v19 = vpack.c.bf16 %v1678_v26, %v1678_v26 }
 0x101   :  { %798 = vst.msk [vmem:[%s2147_s2 + $0x5c] sm:$0xf] %vm774_vm1, %v1304_v29  ;;  %v1302_v39 = vpack.c.bf16 %v346_v33, %v346_v33  ;;  %v881_v40 = vsel %vm839_vm2, %v346_v33, 0.0  ;;  %v994_v41 = vmul.f32 %v346_v33, %v346_v33  ;;  %v1082_v8 = vsel %vm839_vm2, %v996_v49, 0.0  ;;  %v1798_v20 = vpop.f32.mrf.mxu1 }
 0x102   :  { %v1077_v42 = vadd.f32 %v1076_v38, %v1075_v32  ;;  %v882_v43 = vadd.f32 %v881_v40, %v880_v31  ;;  %v1406_v45 = vpop.f32.mrf.mxu0  ;;  %816 = vst.msk [vmem:[%s2147_s2 + $0xa4] sm:$0xf] %vm774_vm1, %v1322_v19 }
 0x103   :  { %796 = vst.msk [vmem:[%s2147_s2 + $0x54] sm:$0xf] %vm774_vm1, %v1302_v39  ;;  %v1078_v50 = vsel %vm839_vm2, %v994_v41, 0.0  ;;  %v1307_v51 = vpack.c.bf16 %v1406_v45, %v1406_v45  ;;  %v999_v12 = vmul.f32 %v1406_v45, %v1406_v45  ;;  %v1810_v31 = vpop.f32.mrf.mxu1  ;;  %v891_v32 = vsel %vm839_vm2, %v1406_v45, 0.0 }
 0x104   :  { %v884_v53 = vadd.f32 %v883_v48, %v882_v43  ;;  %v1079_v54 = vadd.f32 %v1078_v50, %v1077_v42  ;;  %v359_v55 = vpop.f32.mrf.mxu0  ;;  %v1327_v42 = vpack.c.bf16 %v1688_v37, %v1688_v37 }
 0x105   :  { %801 = vst.msk [vmem:[%s2147_s2 + $0x68] sm:$0xf] %vm774_vm1, %v1307_v51  ;;  %v1305_v63 = vpack.c.bf16 %v359_v55, %v359_v55  ;;  %v997_v0 = vmul.f32 %v359_v55, %v359_v55  ;;  %v887_v9 = vsel %vm839_vm2, %v359_v55, 0.0  ;;  %v1820_v43 = vpop.f32.mrf.mxu1  ;;  %v1088_v48 = vsel %vm839_vm2, %v999_v12, 0.0 }
 0x106   :  { %v1081_v2 = vadd.f32 %v1080_v60, %v1079_v54  ;;  %v886_v4 = vadd.f32 %v885_v61, %v884_v53  ;;  %v1407_v5 = vpop.f32.mrf.mxu0  ;;  %821 = vst.msk [vmem:[%s2147_s2 + $0xb8] sm:$0xf] %vm774_vm1, %v1327_v42  ;;  %v903_v42 = vsel %vm839_vm2, %v1564_v1, 0.0 }
 0x107   :  { %799 = vst.msk [vmem:[%s2147_s2 + $0x60] sm:$0xf] %vm774_vm1, %v1305_v63  ;;  %v1308_v11 = vpack.c.bf16 %v1407_v5, %v1407_v5  ;;  %v1084_v21 = vsel %vm839_vm2, %v997_v0, 0.0  ;;  %v1000_v33 = vmul.f32 %v1407_v5, %v1407_v5  ;;  %v893_v45 = vsel %vm839_vm2, %v1407_v5, 0.0  ;;  %v1832_v55 = vpop.f32.mrf.mxu1 }
 0x108   :  { %v888_v13 = vadd.f32 %v887_v9, %v886_v4  ;;  %v1083_v15 = vadd.f32 %v1082_v8, %v1081_v2  ;;  %v362_v16 = vpop.f32.mrf.mxu0  ;;  %v1325_v5 = vpack.c.bf16 %v1700_v46, %v1700_v46 }
 0x109   :  { %802 = vst.msk [vmem:[%s2147_s2 + $0x6c] sm:$0xf] %vm774_vm1, %v1308_v11  ;;  %v1306_v22 = vpack.c.bf16 %v362_v16, %v362_v16  ;;  %v889_v23 = vsel %vm839_vm2, %v362_v16, 0.0  ;;  %v998_v25 = vmul.f32 %v362_v16, %v362_v16  ;;  %v1090_v58 = vsel %vm839_vm2, %v1000_v33, 0.0  ;;  %v1852_v16 = vpop.f32.mrf.mxu1 }
 0x10a   :  { %v1085_v28 = vadd.f32 %v1084_v21, %v1083_v15  ;;  %v890_v29 = vadd.f32 %v889_v23, %v888_v13  ;;  %v1410_v30 = vpop.f32.mrf.mxu0  ;;  %819 = vst.msk [vmem:[%s2147_s2 + $0xb0] sm:$0xf] %vm774_vm1, %v1325_v5  ;;  %v1328_v23 = vpack.c.bf16 %v1710_v57, %v1710_v57  ;;  %v1005_v33 = vmul.f32 %v1564_v1, %v1564_v1 }
 0x10b   :  { %800 = vst.msk [vmem:[%s2147_s2 + $0x64] sm:$0xf] %vm774_vm1, %v1306_v22  ;;  %v1086_v34 = vsel %vm839_vm2, %v998_v25, 0.0  ;;  %v1311_v38 = vpack.c.bf16 %v1410_v30, %v1410_v30  ;;  %v1003_v63 = vmul.f32 %v1410_v30, %v1410_v30  ;;  %v899_v19 = vsel %vm839_vm2, %v1410_v30, 0.0 }
 0x10c   :  { %v892_v39 = vadd.f32 %v891_v32, %v890_v29  ;;  %v1087_v40 = vadd.f32 %v1086_v34, %v1085_v28  ;;  %v375_v41 = vpop.f32.mrf.mxu0  ;;  %v1326_v29 = vpack.c.bf16 %v1722_v3, %v1722_v3  ;;  %822 = vst.msk [vmem:[%s2147_s2 + $0xbc] sm:$0xf] %vm774_vm1, %v1328_v23  ;;  %v1331_v34 = vpack.c.bf16 %v1732_v14, %v1732_v14 }
 0x10d   :  { %805 = vst.msk [vmem:[%s2147_s2 + $0x78] sm:$0xf] %vm774_vm1, %v1311_v38  ;;  %v1309_v49 = vpack.c.bf16 %v375_v41, %v375_v41  ;;  %v1001_v50 = vmul.f32 %v375_v41, %v375_v41  ;;  %v895_v60 = vsel %vm839_vm2, %v375_v41, 0.0  ;;  %v1096_v32 = vsel %vm839_vm2, %v1003_v63, 0.0 }
 0x10e   :  { %v1089_v51 = vadd.f32 %v1088_v48, %v1087_v40  ;;  %v894_v53 = vadd.f32 %v893_v45, %v892_v39  ;;  %v1411_v54 = vpop.f32.mrf.mxu0  ;;  %820 = vst.msk [vmem:[%s2147_s2 + $0xb4] sm:$0xf] %vm774_vm1, %v1326_v29  ;;  %v1878_v40 = vpop.f32.mrf.mxu1  ;;  %v1006_v48 = vmul.f32 %v1590_v18, %v1590_v18  ;;  %825 = vst.msk [vmem:[%s2147_s2 + $0xc8] sm:$0xf] %vm774_vm1, %v1331_v34  ;;  %v1100_v1 = vsel %vm839_vm2, %v1005_v33, 0.0 }
 0x10f   :  { %803 = vst.msk [vmem:[%s2147_s2 + $0x70] sm:$0xf] %vm774_vm1, %v1309_v49  ;;  %v1312_v61 = vpack.c.bf16 %v1411_v54, %v1411_v54  ;;  %v1092_v8 = vsel %vm839_vm2, %v1001_v50, 0.0  ;;  %v1004_v21 = vmul.f32 %v1411_v54, %v1411_v54  ;;  %v901_v30 = vsel %vm839_vm2, %v1411_v54, 0.0 }
 0x110   :  { %v896_v0 = vadd.f32 %v895_v60, %v894_v53  ;;  %v1091_v2 = vadd.f32 %v1090_v58, %v1089_v51  ;;  %v378_v4 = vpop.f32.mrf.mxu0  ;;  %v1329_v45 = vpack.c.bf16 %v1744_v24, %v1744_v24  ;;  %v1332_v51 = vpack.c.bf16 %v1754_v36, %v1754_v36  ;;  %v1908_v63 = vpop.f32.mrf.mxu1 }
 0x111   :  { %806 = vst.msk [vmem:[%s2147_s2 + $0x7c] sm:$0xf] %vm774_vm1, %v1312_v61  ;;  %v1310_v9 = vpack.c.bf16 %v378_v4, %v378_v4  ;;  %v897_v11 = vsel %vm839_vm2, %v378_v4, 0.0  ;;  %v1002_v12 = vmul.f32 %v378_v4, %v378_v4  ;;  %v1098_v41 = vsel %vm839_vm2, %v1004_v21, 0.0 }
 0x112   :  { %v1093_v13 = vadd.f32 %v1092_v8, %v1091_v2  ;;  %v898_v15 = vadd.f32 %v897_v11, %v896_v0  ;;  %v1007_v53 = vmul.f32 %v1554_v56, %v1554_v56  ;;  %v905_v54 = vsel %vm839_vm2, %v1590_v18, 0.0  ;;  %823 = vst.msk [vmem:[%s2147_s2 + $0xc0] sm:$0xf] %vm774_vm1, %v1329_v45  ;;  %826 = vst.msk [vmem:[%s2147_s2 + $0xcc] sm:$0xf] %vm774_vm1, %v1332_v51  ;;  %v1938_v21 = vpop.f32.mrf.mxu1 }
 0x113   :  { %804 = vst.msk [vmem:[%s2147_s2 + $0x74] sm:$0xf] %vm774_vm1, %v1310_v9  ;;  %v1094_v22 = vsel %vm839_vm2, %v1002_v12, 0.0  ;;  %v1330_v58 = vpack.c.bf16 %v1766_v47, %v1766_v47  ;;  %v907_v18 = vsel %vm839_vm2, %v1554_v56, 0.0  ;;  %v1008_v0 = vmul.f32 %v1578_v10, %v1578_v10 }
 0x114   :  { %v900_v25 = vadd.f32 %v899_v19, %v898_v15  ;;  %v1095_v28 = vadd.f32 %v1094_v22, %v1093_v13  ;;  %v1102_v2 = vsel %vm839_vm2, %v1006_v48, 0.0  ;;  %v1335_v4 = vpack.c.bf16 %v1776_v59, %v1776_v59 }
 0x115   :  { %824 = vst.msk [vmem:[%s2147_s2 + $0xc4] sm:$0xf] %vm774_vm1, %v1330_v58  ;;  %v1333_v9 = vpack.c.bf16 %v1788_v6, %v1788_v6  ;;  %v1104_v56 = vsel %vm839_vm2, %v1007_v53, 0.0  ;;  %v909_v11 = vsel %vm839_vm2, %v1578_v10, 0.0  ;;  %v1009_v12 = vmul.f32 %v1612_v35, %v1612_v35 }
 0x116   :  { %v902_v38 = vadd.f32 %v901_v30, %v900_v25  ;;  %v1097_v39 = vadd.f32 %v1096_v32, %v1095_v28  ;;  %829 = vst.msk [vmem:[%s2147_s2 + $0xd8] sm:$0xf] %vm774_vm1, %v1335_v4  ;;  %v1336_v13 = vpack.c.bf16 %v1798_v20, %v1798_v20  ;;  %v1106_v10 = vsel %vm839_vm2, %v1008_v0, 0.0 }
 0x117   :  { %827 = vst.msk [vmem:[%s2147_s2 + $0xd0] sm:$0xf] %vm774_vm1, %v1333_v9  ;;  %v911_v22 = vsel %vm839_vm2, %v1612_v35, 0.0  ;;  %v1010_v23 = vmul.f32 %v1634_v52, %v1634_v52  ;;  %v1334_v25 = vpack.c.bf16 %v1810_v31, %v1810_v31  ;;  %v1339_v32 = vpack.c.bf16 %v1820_v43, %v1820_v43 }
 0x118   :  { %v1099_v49 = vadd.f32 %v1098_v41, %v1097_v39  ;;  %v904_v50 = vadd.f32 %v903_v42, %v902_v38  ;;  %830 = vst.msk [vmem:[%s2147_s2 + $0xdc] sm:$0xf] %vm774_vm1, %v1336_v13  ;;  %v1011_v30 = vmul.f32 %v1600_v27, %v1600_v27  ;;  %v1108_v35 = vsel %vm839_vm2, %v1009_v12, 0.0  ;;  %v1968_v41 = vpop.f32.mrf.mxu1 }
 0x119   :  { %v913_v33 = vsel %vm839_vm2, %v1634_v52, 0.0  ;;  %828 = vst.msk [vmem:[%s2147_s2 + $0xd4] sm:$0xf] %vm774_vm1, %v1334_v25  ;;  %v1337_v34 = vpack.c.bf16 %v1832_v55, %v1832_v55  ;;  %833 = vst.msk [vmem:[%s2147_s2 + $0xe8] sm:$0xf] %vm774_vm1, %v1339_v32  ;;  %v915_v52 = vsel %vm839_vm2, %v1600_v27, 0.0  ;;  %v1012_v42 = vmul.f32 %v1622_v44, %v1622_v44 }
 0x11a   :  { %v906_v60 = vadd.f32 %v905_v54, %v904_v50  ;;  %v1101_v61 = vadd.f32 %v1100_v1, %v1099_v49  ;;  %v1110_v48 = vsel %vm839_vm2, %v1010_v23, 0.0  ;;  %v1340_v45 = vpack.c.bf16 %v1852_v16, %v1852_v16 }
 0x11b   :  { %831 = vst.msk [vmem:[%s2147_s2 + $0xe0] sm:$0xf] %vm774_vm1, %v1337_v34  ;;  %v1338_v51 = vpack.c.bf16 %v1878_v40, %v1878_v40  ;;  %v1112_v27 = vsel %vm839_vm2, %v1011_v30, 0.0  ;;  %v917_v53 = vsel %vm839_vm2, %v1622_v44, 0.0  ;;  %v1013_v1 = vmul.f32 %v1656_v7, %v1656_v7 }
 0x11c   :  { %v908_v5 = vadd.f32 %v907_v18, %v906_v60  ;;  %v1103_v8 = vadd.f32 %v1102_v2, %v1101_v61  ;;  %834 = vst.msk [vmem:[%s2147_s2 + $0xec] sm:$0xf] %vm774_vm1, %v1340_v45  ;;  %v1343_v54 = vpack.c.bf16 %v1908_v63, %v1908_v63  ;;  %v1998_v61 = vpop.f32.mrf.mxu1  ;;  %v1114_v44 = vsel %vm839_vm2, %v1012_v42, 0.0 }
 0x11d   :  { %832 = vst.msk [vmem:[%s2147_s2 + $0xe4] sm:$0xf] %vm774_vm1, %v1338_v51  ;;  %v919_v18 = vsel %vm839_vm2, %v1656_v7, 0.0  ;;  %v1014_v0 = vmul.f32 %v1678_v26, %v1678_v26  ;;  %v1341_v2 = vpack.c.bf16 %v1938_v21, %v1938_v21  ;;  %v1015_v9 = vmul.f32 %v1644_v62, %v1644_v62 }
 0x11e   :  { %v1105_v15 = vadd.f32 %v1104_v56, %v1103_v8  ;;  %v910_v19 = vadd.f32 %v909_v11, %v908_v5  ;;  %837 = vst.msk [vmem:[%s2147_s2 + $0xf8] sm:$0xf] %vm774_vm1, %v1343_v54  ;;  %v1344_v8 = vpack.c.bf16 %v1968_v41, %v1968_v41  ;;  %v1116_v7 = vsel %vm839_vm2, %v1013_v1, 0.0 }
 0x11f   :  { %v921_v56 = vsel %vm839_vm2, %v1678_v26, 0.0  ;;  %835 = vst.msk [vmem:[%s2147_s2 + $0xf0] sm:$0xf] %vm774_vm1, %v1341_v2  ;;  %v1342_v11 = vpack.c.bf16 %v1998_v61, %v1998_v61  ;;  %v1016_v26 = vmul.f32 %v1666_v17, %v1666_v17  ;;  %v1120_v23 = vsel %vm839_vm2, %v1015_v9, 0.0 }
 0x120   :  { %v912_v28 = vadd.f32 %v911_v22, %v910_v19  ;;  %v1107_v29 = vadd.f32 %v1106_v10, %v1105_v15  ;;  %838 = vst.msk [vmem:[%s2147_s2 + $0xfc] sm:$0xf] %vm774_vm1, %v1344_v8  ;;  %v923_v15 = vsel %vm839_vm2, %v1644_v62, 0.0  ;;  %v1118_v19 = vsel %vm839_vm2, %v1014_v0, 0.0 }
 0x121   :  { %836 = vst.msk [vmem:[%s2147_s2 + $0xf4] sm:$0xf] %vm774_vm1, %v1342_v11  ;;  %v925_v25 = vsel %vm839_vm2, %v1666_v17, 0.0  ;;  %v1017_v62 = vmul.f32 %v1700_v46, %v1700_v46  ;;  %v1122_v32 = vsel %vm839_vm2, %v1016_v26, 0.0  ;;  %v927_v30 = vsel %vm839_vm2, %v1700_v46, 0.0 }
 0x122   :  { %v1109_v38 = vadd.f32 %v1108_v35, %v1107_v29  ;;  %v914_v39 = vadd.f32 %v913_v33, %v912_v28  ;;  %v1018_v35 = vmul.f32 %v1722_v3, %v1722_v3  ;;  %v1020_v46 = vmul.f32 %v1710_v57, %v1710_v57 }
 0x123   :  { %v1124_v17 = vsel %vm839_vm2, %v1017_v62, 0.0  ;;  %v937_v0 = vsel %vm839_vm2, %v1766_v47, 0.0  ;;  %v941_v11 = vsel %vm839_vm2, %v1754_v36, 0.0  ;;  %v1026_v26 = vmul.f32 %v1810_v31, %v1810_v31 }
 0x124   :  { %v916_v49 = vadd.f32 %v915_v52, %v914_v39  ;;  %v1111_v50 = vadd.f32 %v1110_v48, %v1109_v38  ;;  %v1019_v38 = vmul.f32 %v1688_v37, %v1688_v37  ;;  %v929_v39 = vsel %vm839_vm2, %v1722_v3, 0.0 }
 0x125   :  { %v931_v48 = vsel %vm839_vm2, %v1688_v37, 0.0  ;;  %v1126_v45 = vsel %vm839_vm2, %v1018_v35, 0.0  ;;  %v1021_v3 = vmul.f32 %v1744_v24, %v1744_v24  ;;  %v1130_v54 = vsel %vm839_vm2, %v1020_v46, 0.0 }
 0x126   :  { %v1113_v58 = vadd.f32 %v1112_v27, %v1111_v50  ;;  %v918_v60 = vadd.f32 %v917_v53, %v916_v49  ;;  %v1128_v51 = vsel %vm839_vm2, %v1019_v38, 0.0  ;;  %v933_v27 = vsel %vm839_vm2, %v1710_v57, 0.0 }
 0x127   :  { %v935_v37 = vsel %vm839_vm2, %v1744_v24, 0.0  ;;  %v1132_v57 = vsel %vm839_vm2, %v1021_v3, 0.0  ;;  %v1024_v24 = vmul.f32 %v1754_v36, %v1754_v36  ;;  %v953_v46 = vsel %vm839_vm2, %v1878_v40, 0.0 }
 0x128   :  { %v920_v4 = vadd.f32 %v919_v18, %v918_v60  ;;  %v1115_v5 = vadd.f32 %v1114_v44, %v1113_v58  ;;  %v1022_v58 = vmul.f32 %v1766_v47, %v1766_v47  ;;  %v1023_v18 = vmul.f32 %v1732_v14, %v1732_v14 }
 0x129   :  { %v1025_v47 = vmul.f32 %v1788_v6, %v1788_v6 }
 0x12a   :  { %v1117_v12 = vadd.f32 %v1116_v7, %v1115_v5  ;;  %v922_v13 = vadd.f32 %v921_v56, %v920_v4  ;;  %v939_v5 = vsel %vm839_vm2, %v1732_v14, 0.0  ;;  %v1134_v8 = vsel %vm839_vm2, %v1022_v58, 0.0 }
 0x12b   :  { %v1136_v56 = vsel %vm839_vm2, %v1023_v18, 0.0  ;;  %v943_v14 = vsel %vm839_vm2, %v1788_v6, 0.0  ;;  %v1140_v36 = vsel %vm839_vm2, %v1025_v47, 0.0  ;;  %v1028_v6 = vmul.f32 %v1798_v20, %v1798_v20 }
 0x12c   :  { %v924_v10 = vadd.f32 %v923_v15, %v922_v13  ;;  %v1119_v22 = vadd.f32 %v1118_v19, %v1117_v12  ;;  %v1138_v15 = vsel %vm839_vm2, %v1024_v24, 0.0 }
 0x12e   :  { %v1121_v28 = vadd.f32 %v1120_v23, %v1119_v22  ;;  %v926_v29 = vadd.f32 %v925_v25, %v924_v10  ;;  %v1027_v22 = vmul.f32 %v1776_v59, %v1776_v59  ;;  %v945_v23 = vsel %vm839_vm2, %v1810_v31, 0.0 }
 0x12f   :  { %v1029_v31 = vmul.f32 %v1832_v55, %v1832_v55 }
 0x130   :  { %v928_v33 = vadd.f32 %v927_v30, %v926_v29  ;;  %v1123_v34 = vadd.f32 %v1122_v32, %v1121_v28  ;;  %v947_v28 = vsel %vm839_vm2, %v1776_v59, 0.0  ;;  %v1142_v29 = vsel %vm839_vm2, %v1026_v26, 0.0 }
 0x131   :  { %v1144_v35 = vsel %vm839_vm2, %v1027_v22, 0.0  ;;  %v951_v59 = vsel %vm839_vm2, %v1832_v55, 0.0  ;;  %v1032_v55 = vmul.f32 %v1852_v16, %v1852_v16 }
 0x132   :  { %v1125_v52 = vadd.f32 %v1124_v17, %v1123_v34  ;;  %v930_v42 = vadd.f32 %v929_v39, %v928_v33  ;;  %v949_v33 = vsel %vm839_vm2, %v1798_v20, 0.0  ;;  %v1146_v17 = vsel %vm839_vm2, %v1028_v6, 0.0 }
 0x133   :  { %v1030_v39 = vmul.f32 %v1878_v40, %v1878_v40  ;;  %v1148_v20 = vsel %vm839_vm2, %v1029_v31, 0.0  ;;  %v1033_v40 = vmul.f32 %v1938_v21, %v1938_v21  ;;  %v1154_v58 = vsel %vm839_vm2, %v1032_v55, 0.0 }
 0x134   :  { %v932_v49 = vadd.f32 %v931_v48, %v930_v42  ;;  %v1127_v50 = vadd.f32 %v1126_v45, %v1125_v52  ;;  %v1031_v48 = vmul.f32 %v1820_v43, %v1820_v43 }
 0x136   :  { %v1129_v53 = vadd.f32 %v1128_v51, %v1127_v50  ;;  %v934_v1 = vadd.f32 %v933_v27, %v932_v49  ;;  %v955_v50 = vsel %vm839_vm2, %v1820_v43, 0.0  ;;  %v1150_v51 = vsel %vm839_vm2, %v1030_v39, 0.0 }
 0x137   :  { %v959_v43 = vsel %vm839_vm2, %v1938_v21, 0.0  ;;  %v1036_v21 = vmul.f32 %v1968_v41, %v1968_v41 }
 0x138   :  { %v936_v60 = vadd.f32 %v935_v37, %v934_v1  ;;  %v1131_v44 = vadd.f32 %v1130_v54, %v1129_v53  ;;  %v1152_v53 = vsel %vm839_vm2, %v1031_v48, 0.0  ;;  %v957_v1 = vsel %vm839_vm2, %v1852_v16, 0.0 }
 0x139   :  { %v1156_v16 = vsel %vm839_vm2, %v1033_v40, 0.0 }
 0x13a   :  { %v1133_v2 = vadd.f32 %v1132_v57, %v1131_v44  ;;  %v938_v4 = vadd.f32 %v937_v0, %v936_v60  ;;  %v1034_v60 = vmul.f32 %v1998_v61, %v1998_v61  ;;  %v1035_v57 = vmul.f32 %v1908_v63, %v1908_v63 }
 0x13b   :  { %v961_v0 = vsel %vm839_vm2, %v1998_v61, 0.0  ;;  %v1162_v61 = vsel %vm839_vm2, %v1036_v21, 0.0 }
 0x13c   :  { %v940_v9 = vadd.f32 %v939_v5, %v938_v4  ;;  %v1135_v7 = vadd.f32 %v1134_v8, %v1133_v2  ;;  %v963_v5 = vsel %vm839_vm2, %v1908_v63, 0.0  ;;  %v1158_v24 = vsel %vm839_vm2, %v1034_v60, 0.0 }
 0x13e   :  { %v1137_v12 = vadd.f32 %v1136_v56, %v1135_v7  ;;  %v942_v13 = vadd.f32 %v941_v11, %v940_v9  ;;  %v1160_v7 = vsel %vm839_vm2, %v1035_v57, 0.0  ;;  %v965_v56 = vsel %vm839_vm2, %v1968_v41, 0.0 }
 0x140   :  { %v944_v19 = vadd.f32 %v943_v14, %v942_v13  ;;  %v1139_v10 = vadd.f32 %v1138_v15, %v1137_v12 }
 0x142   :  { %v1141_v25 = vadd.f32 %v1140_v36, %v1139_v10  ;;  %v946_v62 = vadd.f32 %v945_v23, %v944_v19 }
 0x144   :  { %v948_v32 = vadd.f32 %v947_v28, %v946_v62  ;;  %v1143_v30 = vadd.f32 %v1142_v29, %v1141_v25 }
 0x146   :  { %v1145_v34 = vadd.f32 %v1144_v35, %v1143_v30  ;;  %v950_v38 = vadd.f32 %v949_v33, %v948_v32 }
 0x148   :  { %v952_v52 = vadd.f32 %v951_v59, %v950_v38  ;;  %v1147_v42 = vadd.f32 %v1146_v17, %v1145_v34 }
 0x14a   :  { %v1149_v45 = vadd.f32 %v1148_v20, %v1147_v42  ;;  %v954_v49 = vadd.f32 %v953_v46, %v952_v52 }
 0x14c   :  { %v956_v27 = vadd.f32 %v955_v50, %v954_v49  ;;  %v1151_v3 = vadd.f32 %v1150_v51, %v1149_v45 }
 0x14e   :  { %v1153_v54 = vadd.f32 %v1152_v53, %v1151_v3  ;;  %v958_v37 = vadd.f32 %v957_v1, %v956_v27 }
 0x150   :  { %v960_v44 = vadd.f32 %v959_v43, %v958_v37  ;;  %v1155_v18 = vadd.f32 %v1154_v58, %v1153_v54 }
 0x152   :  { %v1157_v2 = vadd.f32 %v1156_v16, %v1155_v18  ;;  %v962_v4 = vadd.f32 %v961_v0, %v960_v44 }
 0x154   :  { %v964_v8 = vadd.f32 %v963_v5, %v962_v4  ;;  %v1159_v9 = vadd.f32 %v1158_v24, %v1157_v2 }
 0x156   :  { %v966_v11 = vadd.f32 %v965_v56, %v964_v8  ;;  %v1161_v47 = vadd.f32 %v1160_v7, %v1159_v9 }
 0x158   :  { %v967_v12 = vrot.slane %v966_v11, 4  ;;  %v1163_v13 = vadd.f32 %v1162_v61, %v1161_v47 }
 0x15a   :  { %v968_v15 = vadd.f32 %v967_v12, %v966_v11  ;;  %v1164_v63 = vrot.slane %v1163_v13, 4 }
 0x15c   :  { %v969_v14 = vrot.slane %v968_v15, 2  ;;  %v1165_v26 = vadd.f32 %v1164_v63, %v1163_v13 }
 0x15e   :  { %v970_v19 = vadd.f32 %v969_v14, %v968_v15  ;;  %v1166_v10 = vrot.slane %v1165_v26, 2 }
 0x160   :  { %v971_v22 = vrot.slane %v970_v19, 1  ;;  %v1167_v36 = vadd.f32 %v1166_v10, %v1165_v26 }
 0x162   :  { %v1168_v23 = vrot.slane %v1167_v36, 1  ;;  %v972_v25 = vadd.f32 %v971_v22, %v970_v19 }
 0x164   :  { %v1169_v62 = vadd.f32 %v1168_v23, %v1167_v36 }
 0x166   :  { %v1171_v41 = vsel %vm1170_vm3, %v972_v25, %v1169_v62 }
 0x167   :  { %v1173_v28 = vsel %vm1172_vm4, %v1171_v41, 0.0 }
 0x168   :  { %1174 = vst.msk [vmem:[%s2148_s3] sm:$0xff] %vm839_vm2, %v1173_v28 }
 0x169   :  { %1183 = vsyncpa [#allocation3], 1 }

// kernel: bottleneck_forward.6
= control target key start
LH: loop header
LB: loop body
LE: loop exit
PB: predicated region body
PF: predicated region fallthrough
CT: control target
= control target key end

     0   :  { %vm484_vm0 = vcmask 1041408   ;;  %vm387_vm1 = vcmask 31744   ;;  %vm1033_vm2 = vcmask 125952   ;;  %vm1098_vm3 = vcmask 130048   ;;  %s2814_s3 = inlined_call_operand.vmem [shape: bf16[4,16], index: 3, kind: input, shape index: {}]   ;;  %s2815_s0 = inlined_call_operand.vmem [shape: bf16[512,4], index: 0, kind: input, shape index: {}]   ;;  %s2816_s1 = inlined_call_operand.vmem [shape: f32[1,4], index: 1, kind: input, shape index: {}]   ;;  %s2817_s2 = inlined_call_operand.vmem [shape: f32[1,4], index: 2, kind: input, shape index: {}]   ;;  %s2818_s4 = inlined_call_operand.vmem [shape: bf16[512,16], index: 4, kind: output, shape index: {0}]   ;;  %s2819_s5 = inlined_call_operand.vmem [shape: f32[1,8,16], index: 5, kind: output, shape index: {1}]  }
   0x1   :  { %v386_v0 = vld [vmem:[%s2814_s3] sm:$0x3]  ;;  %v1731_v6 = vld [vmem:[%s2815_s0 + $0x8] sm:$0xff]   ;;  %v1732_v7 = vld [vmem:[%s2815_s0 + $0x10] sm:$0xff]   ;;  %vm1429_vm4 = vcmask 1040384  }
   0x2   :  { %v1604_v1 = vld [vmem:[%s2815_s0] sm:$0xff]   ;;  %1863 = vmatprep.subr.msk.bf16.mxu0 %vm484_vm0, %v386_v0  ;;  %v486_v3 = vsel %vm484_vm0, %v386_v0, 0  ;;  %1864 = vmatprep.subr.msk.bf16.mxu1 %vm484_vm0, %v386_v0  ;;  %v1609_v9 = vunpack.c.l.bf16 %v1731_v6  ;;  %v1610_v10 = vunpack.c.h.bf16 %v1731_v6  ;;  %v1613_v11 = vunpack.c.l.bf16 %v1732_v7  ;;  %v1733_v13 = vld [vmem:[%s2815_s0 + $0x18] sm:$0xff]   ;;  %v1735_v35 = vld [vmem:[%s2815_s0 + $0x28] sm:$0xff]  }
   0x3   :  { %v1904_v2 = vld [vmem:[%s2816_s1] ss:$0 sm:$0xff]  ;;  %v1605_v4 = vunpack.c.l.bf16 %v1604_v1  ;;  %v1606_v5 = vunpack.c.h.bf16 %v1604_v1  ;;  %1796 = vmatpush3.bf16.msra.mxu0 %v486_v3  ;;  %v1614_v12 = vunpack.c.h.bf16 %v1732_v7  ;;  %1862 = vmatpush3.bf16.msra.mxu1 %v486_v3  ;;  %v1617_v16 = vunpack.c.l.bf16 %v1733_v13  ;;  %v1736_v40 = vld [vmem:[%s2815_s0 + $0x30] sm:$0xff]   ;;  %v1737_v51 = vld [vmem:[%s2815_s0 + $0x38] sm:$0xff]  }
   0x4   :  { %v1918_v8 = vld [vmem:[%s2817_s2] ss:$0 sm:$0xff]  ;;  %v1618_v17 = vunpack.c.h.bf16 %v1733_v13  ;;  %v157_v18 = vmul.f32 %v1609_v9, %v1904_v2  ;;  %v158_v19 = vmul.f32 %v1610_v10, %v1904_v2  ;;  %v159_v20 = vmul.f32 %v1613_v11, %v1904_v2  ;;  %v1739_v9 = vld [vmem:[%s2815_s0 + $0x48] sm:$0xff]   ;;  %v1740_v11 = vld [vmem:[%s2815_s0 + $0x50] sm:$0xff]  }
   0x5   :  { %v155_v14 = vmul.f32 %v1605_v4, %v1904_v2  ;;  %v156_v15 = vmul.f32 %v1606_v5, %v1904_v2  ;;  %v160_v21 = vmul.f32 %v1614_v12, %v1904_v2  ;;  %v161_v24 = vmul.f32 %v1617_v16, %v1904_v2  ;;  %v1734_v30 = vld [vmem:[%s2815_s0 + $0x20] sm:$0xff]  }
   0x6   :  { %v162_v25 = vmul.f32 %v1618_v17, %v1904_v2  ;;  %v228_v26 = vadd.f32 %v1918_v8, %v157_v18  ;;  %v229_v27 = vadd.f32 %v1918_v8, %v158_v19  ;;  %v230_v28 = vadd.f32 %v1918_v8, %v159_v20  ;;  %v1738_v63 = vld [vmem:[%s2815_s0 + $0x40] sm:$0xff]   ;;  %v1741_v20 = vld [vmem:[%s2815_s0 + $0x58] sm:$0xff]  }
   0x7   :  { %v226_v22 = vadd.f32 %v1918_v8, %v155_v14  ;;  %v227_v23 = vadd.f32 %v1918_v8, %v156_v15  ;;  %v231_v29 = vadd.f32 %v1918_v8, %v160_v21  ;;  %v232_v33 = vadd.f32 %v1918_v8, %v161_v24 }
   0x8   :  { %v233_v34 = vadd.f32 %v1918_v8, %v162_v25  ;;  %v292_v36 = vmax.f32 %v228_v26, 0.0  ;;  %v293_v37 = vmax.f32 %v229_v27, 0.0  ;;  %v294_v38 = vmax.f32 %v230_v28, 0.0 }
   0x9   :  { %v290_v31 = vmax.f32 %v226_v22, 0.0  ;;  %v291_v32 = vmax.f32 %v227_v23, 0.0  ;;  %v295_v39 = vmax.f32 %v231_v29, 0.0  ;;  %v1621_v42 = vunpack.c.l.bf16 %v1734_v30 }
   0xa   :  { %v355_v43 = vpack.c.bf16 %v293_v37, %v292_v36  ;;  %v1622_v45 = vunpack.c.h.bf16 %v1734_v30  ;;  %v1625_v46 = vunpack.c.l.bf16 %v1735_v35  ;;  %v296_v47 = vmax.f32 %v232_v33, 0.0 }
   0xb   :  { %v354_v41 = vpack.c.bf16 %v291_v32, %v290_v31  ;;  %v356_v44 = vpack.c.bf16 %v295_v39, %v294_v38  ;;  %v163_v48 = vmul.f32 %v1621_v42, %v1904_v2  ;;  %v1626_v49 = vunpack.c.h.bf16 %v1735_v35  ;;  %v1742_v31 = vld [vmem:[%s2815_s0 + $0x60] sm:$0xff]  }
   0xc   :  { %v1629_v50 = vunpack.c.l.bf16 %v1736_v40  ;;  %v297_v52 = vmax.f32 %v233_v34, 0.0  ;;  %v164_v53 = vmul.f32 %v1622_v45, %v1904_v2  ;;  %v165_v54 = vmul.f32 %v1625_v46, %v1904_v2 }
   0xd   :  { %1797 = vmatprep.mubr.msk.bf16.mxu0 %vm387_vm1, %v354_v41  ;;  %v1630_v55 = vunpack.c.h.bf16 %v1736_v40  ;;  %v234_v56 = vadd.f32 %v1918_v8, %v163_v48  ;;  %v166_v57 = vmul.f32 %v1626_v49, %v1904_v2  ;;  %v1633_v61 = vunpack.c.l.bf16 %v1737_v51 }
   0xe   :  { %1798 = vmatmul.mubr.msk.bf16.vlgmr.msra.gmra.mxu0 %vm387_vm1, %v355_v43  ;;  %v167_v58 = vmul.f32 %v1629_v50, %v1904_v2  ;;  %v235_v59 = vadd.f32 %v1918_v8, %v164_v53  ;;  %v1634_v62 = vunpack.c.h.bf16 %v1737_v51  ;;  %v236_v1 = vadd.f32 %v1918_v8, %v165_v54 }
   0xf   :  { %1801 = vmatprep.mubr.msk.bf16.mxu0 %vm387_vm1, %v356_v44  ;;  %v168_v60 = vmul.f32 %v1630_v55, %v1904_v2  ;;  %v298_v0 = vmax.f32 %v234_v56, 0.0  ;;  %v237_v3 = vadd.f32 %v1918_v8, %v166_v57  ;;  %v357_v5 = vpack.c.bf16 %v297_v52, %v296_v47  ;;  %v1743_v44 = vld [vmem:[%s2815_s0 + $0x68] sm:$0xff]   ;;  %v1744_v56 = vld [vmem:[%s2815_s0 + $0x70] sm:$0xff]  }
  0x10   :  { %v238_v4 = vadd.f32 %v1918_v8, %v167_v58  ;;  %v299_v6 = vmax.f32 %v235_v59, 0.0  ;;  %v1637_v10 = vunpack.c.l.bf16 %v1738_v63  ;;  %v169_v13 = vmul.f32 %v1633_v61, %v1904_v2 }
  0x11   :  { %v239_v7 = vadd.f32 %v1918_v8, %v168_v60  ;;  %v170_v14 = vmul.f32 %v1634_v62, %v1904_v2  ;;  %v1638_v15 = vunpack.c.h.bf16 %v1738_v63  ;;  %v300_v16 = vmax.f32 %v236_v1, 0.0  ;;  %v2017_v1 = vld [vmem:[%s2815_s0 + $0x78] sm:$0xff]  }
  0x12   :  { %v358_v12 = vpack.c.bf16 %v299_v6, %v298_v0  ;;  %v301_v17 = vmax.f32 %v237_v3, 0.0  ;;  %v302_v18 = vmax.f32 %v238_v4, 0.0  ;;  %v1641_v19 = vunpack.c.l.bf16 %v1739_v9  ;;  %v1746_v3 = vld [vmem:[%s2815_s0 + $0x80] sm:$0xff]  }
  0x13   :  { %v303_v21 = vmax.f32 %v239_v7, 0.0  ;;  %v171_v22 = vmul.f32 %v1637_v10, %v1904_v2  ;;  %v1642_v23 = vunpack.c.h.bf16 %v1739_v9  ;;  %v1645_v24 = vunpack.c.l.bf16 %v1740_v11 }
  0x14   :  { %v172_v25 = vmul.f32 %v1638_v15, %v1904_v2  ;;  %v173_v26 = vmul.f32 %v1641_v19, %v1904_v2  ;;  %v1646_v27 = vunpack.c.h.bf16 %v1740_v11  ;;  %v1649_v30 = vunpack.c.l.bf16 %v1741_v20  ;;  %v1747_v19 = vld [vmem:[%s2815_s0 + $0x88] sm:$0xff]  }
  0x15   :  { %v174_v28 = vmul.f32 %v1642_v23, %v1904_v2  ;;  %v175_v29 = vmul.f32 %v1645_v24, %v1904_v2  ;;  %v240_v32 = vadd.f32 %v1918_v8, %v169_v13  ;;  %v241_v33 = vadd.f32 %v1918_v8, %v170_v14  ;;  %v1748_v24 = vld [vmem:[%s2815_s0 + $0x90] sm:$0xff]  }
  0x16   :  { %1802 = vmatmul.mubr.msk.bf16.gmra.mxu0 %vm387_vm1, %v357_v5  ;;  %v176_v34 = vmul.f32 %v1646_v27, %v1904_v2  ;;  %v1650_v35 = vunpack.c.h.bf16 %v1741_v20  ;;  %v359_v36 = vpack.c.bf16 %v301_v17, %v300_v16  ;;  %v360_v37 = vpack.c.bf16 %v303_v21, %v302_v18 }
  0x17   :  { %1805 = vmatprep.mubr.msk.bf16.mxu0 %vm387_vm1, %v358_v12  ;;  %v242_v38 = vadd.f32 %v1918_v8, %v171_v22  ;;  %v177_v39 = vmul.f32 %v1649_v30, %v1904_v2  ;;  %v243_v40 = vadd.f32 %v1918_v8, %v172_v25  ;;  %v244_v41 = vadd.f32 %v1918_v8, %v173_v26 }
  0x18   :  { %v178_v42 = vmul.f32 %v1650_v35, %v1904_v2  ;;  %v1653_v43 = vunpack.c.l.bf16 %v1742_v31  ;;  %v245_v45 = vadd.f32 %v1918_v8, %v174_v28  ;;  %v246_v46 = vadd.f32 %v1918_v8, %v175_v29 }
  0x19   :  { %v247_v47 = vadd.f32 %v1918_v8, %v176_v34  ;;  %v248_v48 = vadd.f32 %v1918_v8, %v177_v39  ;;  %v1654_v50 = vunpack.c.h.bf16 %v1742_v31  ;;  %v304_v52 = vmax.f32 %v240_v32, 0.0 }
  0x1a   :  { %v249_v49 = vadd.f32 %v1918_v8, %v178_v42  ;;  %v179_v51 = vmul.f32 %v1653_v43, %v1904_v2  ;;  %v305_v53 = vmax.f32 %v241_v33, 0.0  ;;  %v1657_v54 = vunpack.c.l.bf16 %v1743_v44  ;;  %v1749_v33 = vld [vmem:[%s2815_s0 + $0x98] sm:$0xff]  }
  0x1b   :  { %v1658_v55 = vunpack.c.h.bf16 %v1743_v44  ;;  %v306_v57 = vmax.f32 %v242_v38, 0.0  ;;  %v307_v58 = vmax.f32 %v243_v40, 0.0  ;;  %v308_v59 = vmax.f32 %v244_v41, 0.0 }
  0x1c   :  { %v180_v60 = vmul.f32 %v1654_v50, %v1904_v2  ;;  %v309_v61 = vmax.f32 %v245_v45, 0.0  ;;  %v310_v62 = vmax.f32 %v246_v46, 0.0  ;;  %v311_v63 = vmax.f32 %v247_v47, 0.0  ;;  %v1750_v46 = vld [vmem:[%s2815_s0 + $0xa0] sm:$0xff]  }
  0x1d   :  { %v181_v0 = vmul.f32 %v1657_v54, %v1904_v2  ;;  %v312_v4 = vmax.f32 %v248_v48, 0.0  ;;  %v313_v5 = vmax.f32 %v249_v49, 0.0  ;;  %v2023_v6 = vadd.f32 %v1918_v8, %v179_v51 }
  0x1e   :  { %1806 = vmatmul.mubr.msk.bf16.gmra.mxu0 %vm387_vm1, %v359_v36  ;;  %v1661_v7 = vunpack.c.l.bf16 %v1744_v56  ;;  %v361_v9 = vpack.c.bf16 %v305_v53, %v304_v52  ;;  %v2026_v10 = vadd.f32 %v1918_v8, %v180_v60  ;;  %v182_v11 = vmul.f32 %v1658_v55, %v1904_v2  ;;  %v1751_v55 = vld [vmem:[%s2815_s0 + $0xa8] sm:$0xff]  }
  0x1f   :  { %1809 = vmatprep.mubr.msk.bf16.mxu0 %vm387_vm1, %v360_v37  ;;  %v1662_v12 = vunpack.c.h.bf16 %v1744_v56  ;;  %v362_v13 = vpack.c.bf16 %v307_v58, %v306_v57  ;;  %v1665_v14 = vunpack.c.l.bf16 %v2017_v1  ;;  %v1669_v15 = vunpack.c.l.bf16 %v1746_v3 }
  0x20   :  { %v363_v16 = vpack.c.bf16 %v309_v61, %v308_v59  ;;  %v364_v17 = vpack.c.bf16 %v311_v63, %v310_v62  ;;  %v2031_v18 = vadd.f32 %v1918_v8, %v181_v0  ;;  %v2036_v20 = vpack.c.bf16 %v313_v5, %v312_v4 }
  0x21   :  { %v314_v21 = vmax.f32 %v2023_v6, 0.0  ;;  %v183_v22 = vmul.f32 %v1661_v7, %v1904_v2  ;;  %v1670_v23 = vunpack.c.h.bf16 %v1746_v3  ;;  %v315_v25 = vmax.f32 %v2026_v10, 0.0  ;;  %v1752_v7 = vld [vmem:[%s2815_s0 + $0xb0] sm:$0xff]   ;;  %v1754_v6 = vld [vmem:[%s2815_s0 + $0xc0] sm:$0xff]  }
  0x22   :  { %v2046_v26 = vadd.f32 %v1918_v8, %v182_v11  ;;  %v184_v27 = vmul.f32 %v1662_v12, %v1904_v2  ;;  %v187_v28 = vmul.f32 %v1669_v15, %v1904_v2  ;;  %v1666_v29 = vunpack.c.h.bf16 %v2017_v1 }
  0x23   :  { %v2053_v30 = vmul.f32 %v1665_v14, %v1904_v2  ;;  %v188_v31 = vmul.f32 %v1670_v23, %v1904_v2  ;;  %v1673_v32 = vunpack.c.l.bf16 %v1747_v19  ;;  %v316_v34 = vmax.f32 %v2031_v18, 0.0  ;;  %v1756_v18 = vld [vmem:[%s2815_s0 + $0xd0] sm:$0xff]  }
  0x24   :  { %v258_v35 = vadd.f32 %v1918_v8, %v187_v28  ;;  %v1674_v36 = vunpack.c.h.bf16 %v1747_v19  ;;  %v1677_v37 = vunpack.c.l.bf16 %v1748_v24  ;;  %v2062_v38 = vadd.f32 %v1918_v8, %v183_v22 }
  0x25   :  { %v259_v39 = vadd.f32 %v1918_v8, %v188_v31  ;;  %v189_v40 = vmul.f32 %v1673_v32, %v1904_v2  ;;  %v1678_v41 = vunpack.c.h.bf16 %v1748_v24  ;;  %v1681_v45 = vunpack.c.l.bf16 %v1749_v33  ;;  %v1753_v24 = vld [vmem:[%s2815_s0 + $0xb8] sm:$0xff]  }
  0x26   :  { %1810 = vmatmul.mubr.msk.bf16.gmra.mxu0 %vm387_vm1, %v361_v9  ;;  %v322_v42 = vmax.f32 %v258_v35, 0.0  ;;  %v190_v43 = vmul.f32 %v1674_v36, %v1904_v2  ;;  %v191_v44 = vmul.f32 %v1677_v37, %v1904_v2  ;;  %v2072_v47 = vadd.f32 %v1918_v8, %v184_v27 }
  0x27   :  { %1813 = vmatprep.mubr.msk.bf16.mxu0 %vm387_vm1, %v362_v13  ;;  %v323_v48 = vmax.f32 %v259_v39, 0.0  ;;  %v260_v49 = vadd.f32 %v1918_v8, %v189_v40  ;;  %v192_v50 = vmul.f32 %v1678_v41, %v1904_v2  ;;  %v1682_v53 = vunpack.c.h.bf16 %v1749_v33 }
  0x28   :  { %v261_v51 = vadd.f32 %v1918_v8, %v190_v43  ;;  %v262_v52 = vadd.f32 %v1918_v8, %v191_v44  ;;  %v193_v54 = vmul.f32 %v1681_v45, %v1904_v2  ;;  %v1685_v59 = vunpack.c.l.bf16 %v1750_v46 }
  0x29   :  { %v370_v56 = vpack.c.bf16 %v323_v48, %v322_v42  ;;  %v324_v57 = vmax.f32 %v260_v49, 0.0  ;;  %v263_v58 = vadd.f32 %v1918_v8, %v192_v50  ;;  %v194_v62 = vmul.f32 %v1682_v53, %v1904_v2 }
  0x2a   :  { %v325_v60 = vmax.f32 %v261_v51, 0.0  ;;  %v326_v61 = vmax.f32 %v262_v52, 0.0  ;;  %v264_v63 = vadd.f32 %v1918_v8, %v193_v54  ;;  %v1686_v3 = vunpack.c.h.bf16 %v1750_v46  ;;  %v1755_v52 = vld [vmem:[%s2815_s0 + $0xc8] sm:$0xff]  }
  0x2b   :  { %1829 = vmatprep.mubr.msk.bf16.mxu1 %vm387_vm1, %v370_v56  ;;  %v327_v0 = vmax.f32 %v263_v58, 0.0  ;;  %v195_v4 = vmul.f32 %v1685_v59, %v1904_v2  ;;  %v1689_v5 = vunpack.c.l.bf16 %v1751_v55  ;;  %v265_v10 = vadd.f32 %v1918_v8, %v194_v62 }
  0x2c   :  { %v371_v9 = vpack.c.bf16 %v325_v60, %v324_v57  ;;  %v328_v11 = vmax.f32 %v264_v63, 0.0  ;;  %v1690_v12 = vunpack.c.h.bf16 %v1751_v55  ;;  %v196_v14 = vmul.f32 %v1686_v3, %v1904_v2 }
  0x2d   :  { %v372_v13 = vpack.c.bf16 %v327_v0, %v326_v61  ;;  %v266_v15 = vadd.f32 %v1918_v8, %v195_v4  ;;  %v1693_v22 = vunpack.c.l.bf16 %v1752_v7  ;;  %v1694_v23 = vunpack.c.h.bf16 %v1752_v7 }
  0x2e   :  { %1814 = vmatmul.mubr.msk.bf16.gmra.mxu0 %vm387_vm1, %v363_v16  ;;  %v197_v16 = vmul.f32 %v1689_v5, %v1904_v2  ;;  %1830 = vmatmul.mubr.msk.bf16.vlgmr.msra.gmra.mxu1 %vm387_vm1, %v371_v9  ;;  %v198_v19 = vmul.f32 %v1690_v12, %v1904_v2  ;;  %v366_v27 = vpack.c.bf16 %v315_v25, %v314_v21  ;;  %v317_v28 = vmax.f32 %v2046_v26, 0.0 }
  0x2f   :  { %1817 = vmatprep.mubr.msk.bf16.mxu0 %vm387_vm1, %v364_v17  ;;  %v329_v17 = vmax.f32 %v265_v10, 0.0  ;;  %1833 = vmatprep.mubr.msk.bf16.mxu1 %vm387_vm1, %v372_v13  ;;  %v267_v31 = vadd.f32 %v1918_v8, %v196_v14  ;;  %v330_v32 = vmax.f32 %v266_v15, 0.0  ;;  %v318_v33 = vmax.f32 %v2062_v38, 0.0  ;;  %v1757_v14 = vld [vmem:[%s2815_s0 + $0xd8] sm:$0xff]  }
  0x30   :  { %v186_v35 = vmul.f32 %v1666_v29, %v1904_v2  ;;  %v199_v36 = vmul.f32 %v1693_v22, %v1904_v2  ;;  %v200_v37 = vmul.f32 %v1694_v23, %v1904_v2  ;;  %v319_v21 = vmax.f32 %v2072_v47, 0.0 }
  0x31   :  { %v331_v25 = vmax.f32 %v267_v31, 0.0  ;;  %v1697_v26 = vunpack.c.l.bf16 %v1753_v24  ;;  %v1698_v39 = vunpack.c.h.bf16 %v1753_v24  ;;  %v373_v38 = vpack.c.bf16 %v329_v17, %v328_v11  ;;  %v1758_v17 = vld [vmem:[%s2815_s0 + $0xe0] sm:$0xff]  }
  0x32   :  { %v268_v1 = vadd.f32 %v1918_v8, %v197_v16  ;;  %v269_v29 = vadd.f32 %v1918_v8, %v198_v19  ;;  %v270_v40 = vadd.f32 %v1918_v8, %v199_v36  ;;  %v271_v42 = vadd.f32 %v1918_v8, %v200_v37 }
  0x33   :  { %v374_v41 = vpack.c.bf16 %v331_v25, %v330_v32  ;;  %v1701_v43 = vunpack.c.l.bf16 %v1754_v6  ;;  %v1702_v44 = vunpack.c.h.bf16 %v1754_v6  ;;  %v256_v45 = vadd.f32 %v1918_v8, %v2053_v30 }
  0x34   :  { %v257_v46 = vadd.f32 %v1918_v8, %v186_v35  ;;  %v202_v47 = vmul.f32 %v1698_v39, %v1904_v2  ;;  %v367_v48 = vpack.c.bf16 %v317_v28, %v316_v34  ;;  %v368_v49 = vpack.c.bf16 %v319_v21, %v318_v33  ;;  %v1759_v39 = vld [vmem:[%s2815_s0 + $0xe8] sm:$0xff]  }
  0x35   :  { %v332_v50 = vmax.f32 %v268_v1, 0.0  ;;  %v333_v51 = vmax.f32 %v269_v29, 0.0  ;;  %v334_v30 = vmax.f32 %v270_v40, 0.0  ;;  %v335_v53 = vmax.f32 %v271_v42, 0.0  ;;  %v1760_v29 = vld [vmem:[%s2815_s0 + $0xf0] sm:$0xff]  }
  0x36   :  { %1818 = vmatmul.mubr.msk.bf16.gmra.mxu0 %vm387_vm1, %v2036_v20  ;;  %v201_v20 = vmul.f32 %v1697_v26, %v1904_v2  ;;  %1834 = vmatmul.mubr.msk.bf16.gmra.mxu1 %vm387_vm1, %v373_v38  ;;  %v203_v54 = vmul.f32 %v1701_v43, %v1904_v2  ;;  %v204_v55 = vmul.f32 %v1702_v44, %v1904_v2  ;;  %v320_v34 = vmax.f32 %v256_v45, 0.0 }
  0x37   :  { %1821 = vmatprep.mubr.msk.bf16.mxu0 %vm387_vm1, %v366_v27  ;;  %1837 = vmatprep.mubr.msk.bf16.mxu1 %vm387_vm1, %v374_v41  ;;  %v321_v56 = vmax.f32 %v257_v46, 0.0  ;;  %v273_v58 = vadd.f32 %v1918_v8, %v202_v47  ;;  %v1705_v59 = vunpack.c.l.bf16 %v1755_v52  ;;  %v375_v60 = vpack.c.bf16 %v333_v51, %v332_v50 }
  0x38   :  { %v272_v57 = vadd.f32 %v1918_v8, %v201_v20  ;;  %v1706_v61 = vunpack.c.h.bf16 %v1755_v52  ;;  %v1709_v62 = vunpack.c.l.bf16 %v1756_v18  ;;  %v1710_v63 = vunpack.c.h.bf16 %v1756_v18  ;;  %v1761_v18 = vld [vmem:[%s2815_s0 + $0xf8] sm:$0xff]  }
  0x39   :  { %v376_v0 = vpack.c.bf16 %v335_v53, %v334_v30  ;;  %v274_v3 = vadd.f32 %v1918_v8, %v203_v54  ;;  %v275_v4 = vadd.f32 %v1918_v8, %v204_v55  ;;  %v337_v7 = vmax.f32 %v273_v58, 0.0 }
  0x3a   :  { %v336_v5 = vmax.f32 %v272_v57, 0.0  ;;  %v205_v9 = vmul.f32 %v1705_v59, %v1904_v2  ;;  %v369_v10 = vpack.c.bf16 %v321_v56, %v320_v34  ;;  %v206_v11 = vmul.f32 %v1706_v61, %v1904_v2 }
  0x3b   :  { %v207_v12 = vmul.f32 %v1709_v62, %v1904_v2  ;;  %v208_v13 = vmul.f32 %v1710_v63, %v1904_v2  ;;  %v338_v15 = vmax.f32 %v274_v3, 0.0  ;;  %v339_v16 = vmax.f32 %v275_v4, 0.0 }
  0x3c   :  { %v377_v19 = vpack.c.bf16 %v337_v7, %v336_v5  ;;  %v276_v22 = vadd.f32 %v1918_v8, %v205_v9  ;;  %v1713_v23 = vunpack.c.l.bf16 %v1757_v14  ;;  %v277_v24 = vadd.f32 %v1918_v8, %v206_v11 }
  0x3d   :  { %v278_v27 = vadd.f32 %v1918_v8, %v207_v12  ;;  %v279_v28 = vadd.f32 %v1918_v8, %v208_v13  ;;  %v1714_v31 = vunpack.c.h.bf16 %v1757_v14  ;;  %v378_v32 = vpack.c.bf16 %v339_v16, %v338_v15 }
  0x3e   :  { %1822 = vmatmul.mubr.msk.bf16.gmra.mxu0 %vm387_vm1, %v367_v48  ;;  %1838 = vmatmul.mubr.msk.bf16.gmra.mxu1 %vm387_vm1, %v375_v60  ;;  %v1717_v33 = vunpack.c.l.bf16 %v1758_v17  ;;  %v1718_v35 = vunpack.c.h.bf16 %v1758_v17  ;;  %v340_v36 = vmax.f32 %v276_v22, 0.0  ;;  %v209_v37 = vmul.f32 %v1713_v23, %v1904_v2 }
  0x3f   :  { %1825 = vmatprep.mubr.msk.bf16.mxu0 %vm387_vm1, %v368_v49  ;;  %1841 = vmatprep.mubr.msk.bf16.mxu1 %vm387_vm1, %v376_v0  ;;  %v341_v6 = vmax.f32 %v277_v24, 0.0  ;;  %v342_v21 = vmax.f32 %v278_v27, 0.0  ;;  %v343_v25 = vmax.f32 %v279_v28, 0.0  ;;  %v210_v26 = vmul.f32 %v1714_v31, %v1904_v2 }
  0x40   :  { %v211_v38 = vmul.f32 %v1717_v33, %v1904_v2  ;;  %v212_v1 = vmul.f32 %v1718_v35, %v1904_v2  ;;  %v280_v40 = vadd.f32 %v1918_v8, %v209_v37  ;;  %v1721_v41 = vunpack.c.l.bf16 %v1759_v39 }
  0x41   :  { %v379_v42 = vpack.c.bf16 %v341_v6, %v340_v36  ;;  %v380_v43 = vpack.c.bf16 %v343_v25, %v342_v21  ;;  %v281_v44 = vadd.f32 %v1918_v8, %v210_v26  ;;  %v1722_v45 = vunpack.c.h.bf16 %v1759_v39 }
  0x42   :  { %v282_v46 = vadd.f32 %v1918_v8, %v211_v38  ;;  %v283_v20 = vadd.f32 %v1918_v8, %v212_v1  ;;  %v1725_v47 = vunpack.c.l.bf16 %v1760_v29  ;;  %v1726_v48 = vunpack.c.h.bf16 %v1760_v29 }
  0x43   :  { %v213_v49 = vmul.f32 %v1721_v41, %v1904_v2  ;;  %v344_v50 = vmax.f32 %v280_v40, 0.0  ;;  %v345_v51 = vmax.f32 %v281_v44, 0.0  ;;  %v214_v52 = vmul.f32 %v1722_v45, %v1904_v2 }
  0x44   :  { %v346_v30 = vmax.f32 %v282_v46, 0.0  ;;  %v347_v53 = vmax.f32 %v283_v20, 0.0  ;;  %v215_v54 = vmul.f32 %v1725_v47, %v1904_v2  ;;  %v216_v55 = vmul.f32 %v1726_v48, %v1904_v2 }
  0x45   :  { %v284_v34 = vadd.f32 %v1918_v8, %v213_v49  ;;  %v381_v56 = vpack.c.bf16 %v345_v51, %v344_v50  ;;  %v285_v57 = vadd.f32 %v1918_v8, %v214_v52  ;;  %v1729_v58 = vunpack.c.l.bf16 %v1761_v18 }
  0x46   :  { %1826 = vmatmul.mubr.msk.bf16.gmra.mxu0 %vm387_vm1, %v369_v10  ;;  %1842 = vmatmul.mubr.msk.bf16.gmra.mxu1 %vm387_vm1, %v377_v19  ;;  %v1730_v59 = vunpack.c.h.bf16 %v1761_v18  ;;  %v382_v60 = vpack.c.bf16 %v347_v53, %v346_v30  ;;  %v286_v61 = vadd.f32 %v1918_v8, %v215_v54  ;;  %v287_v62 = vadd.f32 %v1918_v8, %v216_v55 }
  0x47   :  { %1845 = vmatprep.mubr.msk.bf16.mxu1 %vm387_vm1, %v378_v32  ;;  %v348_v63 = vmax.f32 %v284_v34, 0.0  ;;  %v349_v0 = vmax.f32 %v285_v57, 0.0  ;;  %v217_v3 = vmul.f32 %v1729_v58, %v1904_v2 }
  0x48   :  { %v218_v4 = vmul.f32 %v1730_v59, %v1904_v2  ;;  %v350_v5 = vmax.f32 %v286_v61, 0.0  ;;  %v351_v7 = vmax.f32 %v287_v62, 0.0 }
  0x49   :  { %v383_v9 = vpack.c.bf16 %v349_v0, %v348_v63  ;;  %v288_v10 = vadd.f32 %v1918_v8, %v217_v3 }
  0x4a   :  { %v289_v11 = vadd.f32 %v1918_v8, %v218_v4  ;;  %v384_v12 = vpack.c.bf16 %v351_v7, %v350_v5 }
  0x4b   :  { %v352_v13 = vmax.f32 %v288_v10, 0.0 }
  0x4c   :  { %v353_v14 = vmax.f32 %v289_v11, 0.0 }
  0x4e   :  { %1846 = vmatmul.mubr.msk.bf16.gmra.mxu1 %vm387_vm1, %v379_v42  ;;  %v385_v15 = vpack.c.bf16 %v353_v14, %v352_v13 }
  0x4f   :  { %1849 = vmatprep.mubr.msk.bf16.mxu1 %vm387_vm1, %v380_v43 }
  0x56   :  { %1850 = vmatmul.mubr.msk.bf16.gmra.mxu1 %vm387_vm1, %v381_v56 }
  0x57   :  { %1853 = vmatprep.mubr.msk.bf16.mxu1 %vm387_vm1, %v382_v60 }
  0x5e   :  { %1854 = vmatmul.mubr.msk.bf16.gmra.mxu1 %vm387_vm1, %v383_v9 }
  0x5f   :  { %1857 = vmatprep.mubr.msk.bf16.mxu1 %vm387_vm1, %v384_v12 }
  0x66   :  { %1858 = vmatmul.mubr.msk.bf16.gmra.mxu1 %vm387_vm1, %v385_v15 }
  0xce   :  { %v1799_v2 = vpop.f32.mrf.mxu0 }
  0xcf   :  { %v1541_v16 = vpack.c.bf16 %v1799_v2, %v1799_v2  ;;  %v1234_v24 = vmul.f32 %v1799_v2, %v1799_v2  ;;  %v1102_v35 = vsel %vm1098_vm3, %v1799_v2, 0.0 }
  0xd0   :  { %v522_v17 = vpop.f32.mrf.mxu0 }
  0xd1   :  { %1036 = vst.msk [vmem:[%s2818_s4 + $0x8] sm:$0xf] %vm1033_vm2, %v1541_v16  ;;  %v1539_v8 = vpack.c.bf16 %v522_v17, %v522_v17  ;;  %v1232_v22 = vmul.f32 %v522_v17, %v522_v17  ;;  %v1099_v28 = vsel %vm1098_vm3, %v522_v17, 0.0  ;;  %v1299_v29 = vsel %vm1098_vm3, %v1234_v24, 0.0 }
  0xd2   :  { %v1800_v19 = vpop.f32.mrf.mxu0 }
  0xd3   :  { %1034 = vst.msk [vmem:[%s2818_s4] sm:$0xf] %vm1033_vm2, %v1539_v8  ;;  %v1542_v23 = vpack.c.bf16 %v1800_v19, %v1800_v19  ;;  %v1296_v6 = vsel %vm1098_vm3, %v1232_v22, 0.0  ;;  %v1235_v21 = vmul.f32 %v1800_v19, %v1800_v19  ;;  %v1104_v40 = vsel %vm1098_vm3, %v1800_v19, 0.0 }
  0xd4   :  { %v525_v27 = vpop.f32.mrf.mxu0 }
  0xd5   :  { %1037 = vst.msk [vmem:[%s2818_s4 + $0xc] sm:$0xf] %vm1033_vm2, %v1542_v23  ;;  %v1540_v31 = vpack.c.bf16 %v525_v27, %v525_v27  ;;  %v1100_v32 = vsel %vm1098_vm3, %v525_v27, 0.0  ;;  %v1233_v33 = vmul.f32 %v525_v27, %v525_v27  ;;  %v1301_v46 = vsel %vm1098_vm3, %v1235_v21, 0.0 }
  0xd6   :  { %v1101_v36 = vadd.f32 %v1100_v32, %v1099_v28  ;;  %v1803_v37 = vpop.f32.mrf.mxu0 }
  0xd7   :  { %1035 = vst.msk [vmem:[%s2818_s4 + $0x4] sm:$0xf] %vm1033_vm2, %v1540_v31  ;;  %v1297_v25 = vsel %vm1098_vm3, %v1233_v33, 0.0  ;;  %v1545_v26 = vpack.c.bf16 %v1803_v37, %v1803_v37  ;;  %v1238_v48 = vmul.f32 %v1803_v37, %v1803_v37  ;;  %v1110_v56 = vsel %vm1098_vm3, %v1803_v37, 0.0 }
  0xd8   :  { %v1103_v39 = vadd.f32 %v1102_v35, %v1101_v36  ;;  %v1298_v38 = vadd.f32 %v1297_v25, %v1296_v6  ;;  %v538_v1 = vpop.f32.mrf.mxu0 }
  0xd9   :  { %1040 = vst.msk [vmem:[%s2818_s4 + $0x18] sm:$0xf] %vm1033_vm2, %v1545_v26  ;;  %v1543_v41 = vpack.c.bf16 %v538_v1, %v538_v1  ;;  %v1236_v42 = vmul.f32 %v538_v1, %v538_v1  ;;  %v1106_v20 = vsel %vm1098_vm3, %v538_v1, 0.0  ;;  %v1307_v63 = vsel %vm1098_vm3, %v1238_v48, 0.0 }
  0xda   :  { %v1300_v43 = vadd.f32 %v1299_v29, %v1298_v38  ;;  %v1105_v44 = vadd.f32 %v1104_v40, %v1103_v39  ;;  %v1804_v45 = vpop.f32.mrf.mxu0 }
  0xdb   :  { %1038 = vst.msk [vmem:[%s2818_s4 + $0x10] sm:$0xf] %vm1033_vm2, %v1543_v41  ;;  %v1546_v47 = vpack.c.bf16 %v1804_v45, %v1804_v45  ;;  %v1303_v52 = vsel %vm1098_vm3, %v1236_v42, 0.0  ;;  %v1239_v57 = vmul.f32 %v1804_v45, %v1804_v45  ;;  %v1112_v0 = vsel %vm1098_vm3, %v1804_v45, 0.0 }
  0xdc   :  { %v1107_v49 = vadd.f32 %v1106_v20, %v1105_v44  ;;  %v1302_v50 = vadd.f32 %v1301_v46, %v1300_v43  ;;  %v541_v51 = vpop.f32.mrf.mxu0 }
  0xdd   :  { %1041 = vst.msk [vmem:[%s2818_s4 + $0x1c] sm:$0xf] %vm1033_vm2, %v1546_v47  ;;  %v1544_v30 = vpack.c.bf16 %v541_v51, %v541_v51  ;;  %v1108_v53 = vsel %vm1098_vm3, %v541_v51, 0.0  ;;  %v1237_v54 = vmul.f32 %v541_v51, %v541_v51  ;;  %v1309_v10 = vsel %vm1098_vm3, %v1239_v57, 0.0 }
  0xde   :  { %v1304_v55 = vadd.f32 %v1303_v52, %v1302_v50  ;;  %v1109_v18 = vadd.f32 %v1108_v53, %v1107_v49  ;;  %v1807_v34 = vpop.f32.mrf.mxu0 }
  0xdf   :  { %1039 = vst.msk [vmem:[%s2818_s4 + $0x14] sm:$0xf] %vm1033_vm2, %v1544_v30  ;;  %v1305_v58 = vsel %vm1098_vm3, %v1237_v54, 0.0  ;;  %v1549_v59 = vpack.c.bf16 %v1807_v34, %v1807_v34  ;;  %v1242_v13 = vmul.f32 %v1807_v34, %v1807_v34  ;;  %v1118_v27 = vsel %vm1098_vm3, %v1807_v34, 0.0 }
  0xe0   :  { %v1111_v60 = vadd.f32 %v1110_v56, %v1109_v18  ;;  %v1306_v61 = vadd.f32 %v1305_v58, %v1304_v55  ;;  %v554_v62 = vpop.f32.mrf.mxu0 }
  0xe1   :  { %1044 = vst.msk [vmem:[%s2818_s4 + $0x28] sm:$0xf] %vm1033_vm2, %v1549_v59  ;;  %v1547_v3 = vpack.c.bf16 %v554_v62, %v554_v62  ;;  %v1240_v4 = vmul.f32 %v554_v62, %v554_v62  ;;  %v1114_v11 = vsel %vm1098_vm3, %v554_v62, 0.0  ;;  %v1315_v37 = vsel %vm1098_vm3, %v1242_v13, 0.0 }
  0xe2   :  { %v1308_v5 = vadd.f32 %v1307_v63, %v1306_v61  ;;  %v1113_v7 = vadd.f32 %v1112_v0, %v1111_v60  ;;  %v1808_v9 = vpop.f32.mrf.mxu0 }
  0xe3   :  { %1042 = vst.msk [vmem:[%s2818_s4 + $0x20] sm:$0xf] %vm1033_vm2, %v1547_v3  ;;  %v1550_v12 = vpack.c.bf16 %v1808_v9, %v1808_v9  ;;  %v1311_v16 = vsel %vm1098_vm3, %v1240_v4, 0.0  ;;  %v1243_v28 = vmul.f32 %v1808_v9, %v1808_v9  ;;  %v1120_v6 = vsel %vm1098_vm3, %v1808_v9, 0.0 }
  0xe4   :  { %v1115_v14 = vadd.f32 %v1114_v11, %v1113_v7  ;;  %v1310_v15 = vadd.f32 %v1309_v10, %v1308_v5  ;;  %v557_v2 = vpop.f32.mrf.mxu0 }
  0xe5   :  { %1045 = vst.msk [vmem:[%s2818_s4 + $0x2c] sm:$0xf] %vm1033_vm2, %v1550_v12  ;;  %v1548_v17 = vpack.c.bf16 %v557_v2, %v557_v2  ;;  %v1116_v8 = vsel %vm1098_vm3, %v557_v2, 0.0  ;;  %v1241_v19 = vmul.f32 %v557_v2, %v557_v2  ;;  %v1317_v1 = vsel %vm1098_vm3, %v1243_v28, 0.0 }
  0xe6   :  { %v1312_v22 = vadd.f32 %v1311_v16, %v1310_v15  ;;  %v1117_v23 = vadd.f32 %v1116_v8, %v1115_v14  ;;  %v1811_v24 = vpop.f32.mrf.mxu0 }
  0xe7   :  { %1043 = vst.msk [vmem:[%s2818_s4 + $0x24] sm:$0xf] %vm1033_vm2, %v1548_v17  ;;  %v1313_v31 = vsel %vm1098_vm3, %v1241_v19, 0.0  ;;  %v1553_v32 = vpack.c.bf16 %v1811_v24, %v1811_v24  ;;  %v1246_v41 = vmul.f32 %v1811_v24, %v1811_v24  ;;  %v1126_v51 = vsel %vm1098_vm3, %v1811_v24, 0.0 }
  0xe8   :  { %v1119_v33 = vadd.f32 %v1118_v27, %v1117_v23  ;;  %v1314_v35 = vadd.f32 %v1313_v31, %v1312_v22  ;;  %v570_v36 = vpop.f32.mrf.mxu0 }
  0xe9   :  { %1048 = vst.msk [vmem:[%s2818_s4 + $0x38] sm:$0xf] %vm1033_vm2, %v1553_v32  ;;  %v1551_v21 = vpack.c.bf16 %v570_v36, %v570_v36  ;;  %v1244_v25 = vmul.f32 %v570_v36, %v570_v36  ;;  %v1122_v29 = vsel %vm1098_vm3, %v570_v36, 0.0  ;;  %v1323_v34 = vsel %vm1098_vm3, %v1246_v41, 0.0 }
  0xea   :  { %v1316_v26 = vadd.f32 %v1315_v37, %v1314_v35  ;;  %v1121_v39 = vadd.f32 %v1120_v6, %v1119_v33  ;;  %v1812_v38 = vpop.f32.mrf.mxu0 }
  0xeb   :  { %1046 = vst.msk [vmem:[%s2818_s4 + $0x30] sm:$0xf] %vm1033_vm2, %v1551_v21  ;;  %v1554_v40 = vpack.c.bf16 %v1812_v38, %v1812_v38  ;;  %v1319_v45 = vsel %vm1098_vm3, %v1244_v25, 0.0  ;;  %v1247_v52 = vmul.f32 %v1812_v38, %v1812_v38  ;;  %v1128_v56 = vsel %vm1098_vm3, %v1812_v38, 0.0 }
  0xec   :  { %v1123_v42 = vadd.f32 %v1122_v29, %v1121_v39  ;;  %v1318_v43 = vadd.f32 %v1317_v1, %v1316_v26  ;;  %v573_v44 = vpop.f32.mrf.mxu0 }
  0xed   :  { %1049 = vst.msk [vmem:[%s2818_s4 + $0x3c] sm:$0xf] %vm1033_vm2, %v1554_v40  ;;  %v1552_v46 = vpack.c.bf16 %v573_v44, %v573_v44  ;;  %v1124_v20 = vsel %vm1098_vm3, %v573_v44, 0.0  ;;  %v1245_v47 = vmul.f32 %v573_v44, %v573_v44  ;;  %v1325_v63 = vsel %vm1098_vm3, %v1247_v52, 0.0 }
  0xee   :  { %v1320_v48 = vadd.f32 %v1319_v45, %v1318_v43  ;;  %v1125_v49 = vadd.f32 %v1124_v20, %v1123_v42  ;;  %v1815_v50 = vpop.f32.mrf.mxu0  ;;  %v2300_v62 = vpop.f32.mrf.mxu1 }
  0xef   :  { %1047 = vst.msk [vmem:[%s2818_s4 + $0x34] sm:$0xf] %vm1033_vm2, %v1552_v46  ;;  %v1321_v30 = vsel %vm1098_vm3, %v1245_v47, 0.0  ;;  %v1557_v53 = vpack.c.bf16 %v1815_v50, %v1815_v50  ;;  %v1250_v4 = vmul.f32 %v1815_v50, %v1815_v50  ;;  %v1573_v10 = vpack.c.bf16 %v2300_v62, %v2300_v62 }
  0xf0   :  { %v1127_v54 = vadd.f32 %v1126_v51, %v1125_v49  ;;  %v1322_v55 = vadd.f32 %v1321_v30, %v1320_v48  ;;  %v586_v18 = vpop.f32.mrf.mxu0  ;;  %v2310_v11 = vpop.f32.mrf.mxu1  ;;  %v1134_v22 = vsel %vm1098_vm3, %v1815_v50, 0.0 }
  0xf1   :  { %1052 = vst.msk [vmem:[%s2818_s4 + $0x48] sm:$0xf] %vm1033_vm2, %v1557_v53  ;;  %v1555_v57 = vpack.c.bf16 %v586_v18, %v586_v18  ;;  %v1248_v58 = vmul.f32 %v586_v18, %v586_v18  ;;  %v1130_v0 = vsel %vm1098_vm3, %v586_v18, 0.0  ;;  %1068 = vst.msk [vmem:[%s2818_s4 + $0x88] sm:$0xf] %vm1033_vm2, %v1573_v10  ;;  %v1571_v8 = vpack.c.bf16 %v2310_v11, %v2310_v11 }
  0xf2   :  { %v1324_v59 = vadd.f32 %v1323_v34, %v1322_v55  ;;  %v1129_v60 = vadd.f32 %v1128_v56, %v1127_v54  ;;  %v1816_v61 = vpop.f32.mrf.mxu0  ;;  %v2324_v19 = vpop.f32.mrf.mxu1  ;;  %v1331_v35 = vsel %vm1098_vm3, %v1250_v4, 0.0 }
  0xf3   :  { %1050 = vst.msk [vmem:[%s2818_s4 + $0x40] sm:$0xf] %vm1033_vm2, %v1555_v57  ;;  %v1558_v3 = vpack.c.bf16 %v1816_v61, %v1816_v61  ;;  %v1327_v12 = vsel %vm1098_vm3, %v1248_v58, 0.0  ;;  %v1251_v23 = vmul.f32 %v1816_v61, %v1816_v61  ;;  %1066 = vst.msk [vmem:[%s2818_s4 + $0x80] sm:$0xf] %vm1033_vm2, %v1571_v8  ;;  %v1136_v36 = vsel %vm1098_vm3, %v1816_v61, 0.0 }
  0xf4   :  { %v1131_v5 = vadd.f32 %v1130_v0, %v1129_v60  ;;  %v1326_v7 = vadd.f32 %v1325_v63, %v1324_v59  ;;  %v589_v9 = vpop.f32.mrf.mxu0  ;;  %v2336_v33 = vpop.f32.mrf.mxu1  ;;  %v1574_v39 = vpack.c.bf16 %v2324_v19, %v2324_v19 }
  0xf5   :  { %1053 = vst.msk [vmem:[%s2818_s4 + $0x4c] sm:$0xf] %vm1033_vm2, %v1558_v3  ;;  %v1556_v13 = vpack.c.bf16 %v589_v9, %v589_v9  ;;  %v1132_v14 = vsel %vm1098_vm3, %v589_v9, 0.0  ;;  %v1249_v15 = vmul.f32 %v589_v9, %v589_v9  ;;  %v1333_v1 = vsel %vm1098_vm3, %v1251_v23, 0.0 }
  0xf6   :  { %v1328_v2 = vadd.f32 %v1327_v12, %v1326_v7  ;;  %v1133_v16 = vadd.f32 %v1132_v14, %v1131_v5  ;;  %v1819_v17 = vpop.f32.mrf.mxu0  ;;  %v2346_v38 = vpop.f32.mrf.mxu1  ;;  %1069 = vst.msk [vmem:[%s2818_s4 + $0x8c] sm:$0xf] %vm1033_vm2, %v1574_v39  ;;  %v1572_v52 = vpack.c.bf16 %v2336_v33, %v2336_v33 }
  0xf7   :  { %1051 = vst.msk [vmem:[%s2818_s4 + $0x44] sm:$0xf] %vm1033_vm2, %v1556_v13  ;;  %v1329_v24 = vsel %vm1098_vm3, %v1249_v15, 0.0  ;;  %v1561_v27 = vpack.c.bf16 %v1819_v17, %v1819_v17  ;;  %v1254_v41 = vmul.f32 %v1819_v17, %v1819_v17  ;;  %v1142_v53 = vsel %vm1098_vm3, %v1819_v17, 0.0 }
  0xf8   :  { %v1135_v28 = vadd.f32 %v1134_v22, %v1133_v16  ;;  %v1330_v31 = vadd.f32 %v1329_v24, %v1328_v2  ;;  %v602_v32 = vpop.f32.mrf.mxu0  ;;  %v2358_v45 = vpop.f32.mrf.mxu1  ;;  %1067 = vst.msk [vmem:[%s2818_s4 + $0x84] sm:$0xf] %vm1033_vm2, %v1572_v52  ;;  %v1577_v5 = vpack.c.bf16 %v2346_v38, %v2346_v38 }
  0xf9   :  { %1056 = vst.msk [vmem:[%s2818_s4 + $0x58] sm:$0xf] %vm1033_vm2, %v1561_v27  ;;  %v1559_v37 = vpack.c.bf16 %v602_v32, %v602_v32  ;;  %v1252_v6 = vmul.f32 %v602_v32, %v602_v32  ;;  %v1138_v29 = vsel %vm1098_vm3, %v602_v32, 0.0  ;;  %v1339_v59 = vsel %vm1098_vm3, %v1254_v41, 0.0 }
  0xfa   :  { %v1332_v21 = vadd.f32 %v1331_v35, %v1330_v31  ;;  %v1137_v25 = vadd.f32 %v1136_v36, %v1135_v28  ;;  %v1820_v26 = vpop.f32.mrf.mxu0  ;;  %v2368_v30 = vpop.f32.mrf.mxu1  ;;  %1072 = vst.msk [vmem:[%s2818_s4 + $0x98] sm:$0xf] %vm1033_vm2, %v1577_v5  ;;  %v1575_v31 = vpack.c.bf16 %v2358_v45, %v2358_v45 }
  0xfb   :  { %1054 = vst.msk [vmem:[%s2818_s4 + $0x50] sm:$0xf] %vm1033_vm2, %v1559_v37  ;;  %v1562_v40 = vpack.c.bf16 %v1820_v26, %v1820_v26  ;;  %v1335_v46 = vsel %vm1098_vm3, %v1252_v6, 0.0  ;;  %v1255_v54 = vmul.f32 %v1820_v26, %v1820_v26  ;;  %v1144_v60 = vsel %vm1098_vm3, %v1820_v26, 0.0 }
  0xfc   :  { %v1139_v42 = vadd.f32 %v1138_v29, %v1137_v25  ;;  %v1334_v43 = vadd.f32 %v1333_v1, %v1332_v21  ;;  %v605_v44 = vpop.f32.mrf.mxu0  ;;  %v2380_v58 = vpop.f32.mrf.mxu1  ;;  %1070 = vst.msk [vmem:[%s2818_s4 + $0x90] sm:$0xf] %vm1033_vm2, %v1575_v31 }
  0xfd   :  { %1057 = vst.msk [vmem:[%s2818_s4 + $0x5c] sm:$0xf] %vm1033_vm2, %v1562_v40  ;;  %v1560_v20 = vpack.c.bf16 %v605_v44, %v605_v44  ;;  %v1140_v47 = vsel %vm1098_vm3, %v605_v44, 0.0  ;;  %v1253_v48 = vmul.f32 %v605_v44, %v605_v44  ;;  %v1341_v9 = vsel %vm1098_vm3, %v1255_v54, 0.0 }
  0xfe   :  { %v1336_v49 = vadd.f32 %v1335_v46, %v1334_v43  ;;  %v1141_v50 = vadd.f32 %v1140_v47, %v1139_v42  ;;  %v1823_v51 = vpop.f32.mrf.mxu0  ;;  %v2390_v7 = vpop.f32.mrf.mxu1  ;;  %v1578_v46 = vpack.c.bf16 %v2368_v30, %v2368_v30 }
  0xff   :  { %1055 = vst.msk [vmem:[%s2818_s4 + $0x54] sm:$0xf] %vm1033_vm2, %v1560_v20  ;;  %v1337_v55 = vsel %vm1098_vm3, %v1253_v48, 0.0  ;;  %v1565_v18 = vpack.c.bf16 %v1823_v51, %v1823_v51  ;;  %v1258_v13 = vmul.f32 %v1823_v51, %v1823_v51  ;;  %v1150_v35 = vsel %vm1098_vm3, %v1823_v51, 0.0 }
 0x100   :  { %v1143_v34 = vadd.f32 %v1142_v53, %v1141_v50  ;;  %v1338_v56 = vadd.f32 %v1337_v55, %v1336_v49  ;;  %v618_v57 = vpop.f32.mrf.mxu0  ;;  %v2402_v16 = vpop.f32.mrf.mxu1  ;;  %1073 = vst.msk [vmem:[%s2818_s4 + $0x9c] sm:$0xf] %vm1033_vm2, %v1578_v46 }
 0x101   :  { %1060 = vst.msk [vmem:[%s2818_s4 + $0x68] sm:$0xf] %vm1033_vm2, %v1565_v18  ;;  %v1563_v61 = vpack.c.bf16 %v618_v57, %v618_v57  ;;  %v1256_v63 = vmul.f32 %v618_v57, %v618_v57  ;;  %v1146_v10 = vsel %vm1098_vm3, %v618_v57, 0.0  ;;  %v1347_v1 = vsel %vm1098_vm3, %v1258_v13, 0.0 }
 0x102   :  { %v1340_v0 = vadd.f32 %v1339_v59, %v1338_v56  ;;  %v1145_v3 = vadd.f32 %v1144_v60, %v1143_v34  ;;  %v1824_v4 = vpop.f32.mrf.mxu0  ;;  %v2412_v32 = vpop.f32.mrf.mxu1  ;;  %v1576_v60 = vpack.c.bf16 %v2380_v58, %v2380_v58 }
 0x103   :  { %1058 = vst.msk [vmem:[%s2818_s4 + $0x60] sm:$0xf] %vm1033_vm2, %v1563_v61  ;;  %v1566_v12 = vpack.c.bf16 %v1824_v4, %v1824_v4  ;;  %v1343_v17 = vsel %vm1098_vm3, %v1256_v63, 0.0  ;;  %v1259_v36 = vmul.f32 %v1824_v4, %v1824_v4  ;;  %v1152_v29 = vsel %vm1098_vm3, %v1824_v4, 0.0 }
 0x104   :  { %v1147_v14 = vadd.f32 %v1146_v10, %v1145_v3  ;;  %v1342_v15 = vadd.f32 %v1341_v9, %v1340_v0  ;;  %v621_v2 = vpop.f32.mrf.mxu0  ;;  %v2424_v39 = vpop.f32.mrf.mxu1  ;;  %v1581_v4 = vpack.c.bf16 %v2390_v7, %v2390_v7  ;;  %1071 = vst.msk [vmem:[%s2818_s4 + $0x94] sm:$0xf] %vm1033_vm2, %v1576_v60 }
 0x105   :  { %1061 = vst.msk [vmem:[%s2818_s4 + $0x6c] sm:$0xf] %vm1033_vm2, %v1566_v12  ;;  %v1564_v8 = vpack.c.bf16 %v621_v2, %v621_v2  ;;  %v1148_v22 = vsel %vm1098_vm3, %v621_v2, 0.0  ;;  %v1257_v23 = vmul.f32 %v621_v2, %v621_v2  ;;  %v1349_v47 = vsel %vm1098_vm3, %v1259_v36, 0.0 }
 0x106   :  { %v1344_v24 = vadd.f32 %v1343_v17, %v1342_v15  ;;  %v1149_v27 = vadd.f32 %v1148_v22, %v1147_v14  ;;  %v1827_v28 = vpop.f32.mrf.mxu0  ;;  %v2434_v20 = vpop.f32.mrf.mxu1  ;;  %v1264_v14 = vmul.f32 %v2310_v11, %v2310_v11  ;;  %1076 = vst.msk [vmem:[%s2818_s4 + $0xa8] sm:$0xf] %vm1033_vm2, %v1581_v4  ;;  %v1579_v15 = vpack.c.bf16 %v2402_v16, %v2402_v16 }
 0x107   :  { %1059 = vst.msk [vmem:[%s2818_s4 + $0x64] sm:$0xf] %vm1033_vm2, %v1564_v8  ;;  %v1345_v37 = vsel %vm1098_vm3, %v1257_v23, 0.0  ;;  %v1569_v6 = vpack.c.bf16 %v1827_v28, %v1827_v28  ;;  %v1262_v50 = vmul.f32 %v1827_v28, %v1827_v28  ;;  %v1158_v63 = vsel %vm1098_vm3, %v1827_v28, 0.0 }
 0x108   :  { %v1151_v21 = vadd.f32 %v1150_v35, %v1149_v27  ;;  %v1346_v25 = vadd.f32 %v1345_v37, %v1344_v24  ;;  %v634_v26 = vpop.f32.mrf.mxu0  ;;  %v2446_v54 = vpop.f32.mrf.mxu1  ;;  %v1582_v8 = vpack.c.bf16 %v2412_v32, %v2412_v32  ;;  %v1162_v24 = vsel %vm1098_vm3, %v2310_v11, 0.0  ;;  %1074 = vst.msk [vmem:[%s2818_s4 + $0xa0] sm:$0xf] %vm1033_vm2, %v1579_v15 }
 0x109   :  { %1064 = vst.msk [vmem:[%s2818_s4 + $0x78] sm:$0xf] %vm1033_vm2, %v1569_v6  ;;  %v1567_v40 = vpack.c.bf16 %v634_v26, %v634_v26  ;;  %v1260_v41 = vmul.f32 %v634_v26, %v634_v26  ;;  %v1154_v48 = vsel %vm1098_vm3, %v634_v26, 0.0  ;;  %v1355_v12 = vsel %vm1098_vm3, %v1262_v50, 0.0 }
 0x10a   :  { %v1348_v42 = vadd.f32 %v1347_v1, %v1346_v25  ;;  %v1153_v43 = vadd.f32 %v1152_v29, %v1151_v21  ;;  %v1828_v44 = vpop.f32.mrf.mxu0  ;;  %v2456_v61 = vpop.f32.mrf.mxu1  ;;  %v1265_v27 = vmul.f32 %v2336_v33, %v2336_v33  ;;  %v1580_v28 = vpack.c.bf16 %v2424_v39, %v2424_v39  ;;  %1077 = vst.msk [vmem:[%s2818_s4 + $0xac] sm:$0xf] %vm1033_vm2, %v1582_v8 }
 0x10b   :  { %1062 = vst.msk [vmem:[%s2818_s4 + $0x70] sm:$0xf] %vm1033_vm2, %v1567_v40  ;;  %v1570_v49 = vpack.c.bf16 %v1828_v44, %v1828_v44  ;;  %v1351_v55 = vsel %vm1098_vm3, %v1260_v41, 0.0  ;;  %v1263_v0 = vmul.f32 %v1828_v44, %v1828_v44  ;;  %v1160_v13 = vsel %vm1098_vm3, %v1828_v44, 0.0 }
 0x10c   :  { %v1155_v51 = vadd.f32 %v1154_v48, %v1153_v43  ;;  %v1350_v52 = vadd.f32 %v1349_v47, %v1348_v42  ;;  %v637_v53 = vpop.f32.mrf.mxu0  ;;  %v2470_v10 = vpop.f32.mrf.mxu1  ;;  %v1266_v11 = vmul.f32 %v2300_v62, %v2300_v62  ;;  %v1359_v37 = vsel %vm1098_vm3, %v1264_v14, 0.0  ;;  %1075 = vst.msk [vmem:[%s2818_s4 + $0xa4] sm:$0xf] %vm1033_vm2, %v1580_v28 }
 0x10d   :  { %1065 = vst.msk [vmem:[%s2818_s4 + $0x7c] sm:$0xf] %vm1033_vm2, %v1570_v49  ;;  %v1568_v18 = vpack.c.bf16 %v637_v53, %v637_v53  ;;  %v1156_v34 = vsel %vm1098_vm3, %v637_v53, 0.0  ;;  %v1261_v56 = vmul.f32 %v637_v53, %v637_v53  ;;  %v1357_v23 = vsel %vm1098_vm3, %v1263_v0, 0.0 }
 0x10e   :  { %v1352_v57 = vadd.f32 %v1351_v55, %v1350_v52  ;;  %v1157_v59 = vadd.f32 %v1156_v34, %v1155_v51  ;;  %v2484_v22 = vpop.f32.mrf.mxu1  ;;  %v1164_v6 = vsel %vm1098_vm3, %v2336_v33, 0.0  ;;  %v1585_v21 = vpack.c.bf16 %v2434_v20, %v2434_v20 }
 0x10f   :  { %1063 = vst.msk [vmem:[%s2818_s4 + $0x74] sm:$0xf] %vm1033_vm2, %v1568_v18  ;;  %v1353_v3 = vsel %vm1098_vm3, %v1261_v56, 0.0  ;;  %v1583_v1 = vpack.c.bf16 %v2446_v54, %v2446_v54  ;;  %v1166_v40 = vsel %vm1098_vm3, %v2300_v62, 0.0  ;;  %v1267_v33 = vmul.f32 %v2324_v19, %v2324_v19 }
 0x110   :  { %v1159_v5 = vadd.f32 %v1158_v63, %v1157_v59  ;;  %v1354_v9 = vadd.f32 %v1353_v3, %v1352_v57  ;;  %v2501_v36 = vpop.f32.mrf.mxu1  ;;  %v1361_v41 = vsel %vm1098_vm3, %v1265_v27, 0.0  ;;  %1080 = vst.msk [vmem:[%s2818_s4 + $0xb8] sm:$0xf] %vm1033_vm2, %v1585_v21  ;;  %v1586_v42 = vpack.c.bf16 %v2456_v61, %v2456_v61 }
 0x111   :  { %1078 = vst.msk [vmem:[%s2818_s4 + $0xb0] sm:$0xf] %vm1033_vm2, %v1583_v1  ;;  %v1363_v46 = vsel %vm1098_vm3, %v1266_v11, 0.0  ;;  %v1168_v47 = vsel %vm1098_vm3, %v2324_v19, 0.0  ;;  %v1268_v48 = vmul.f32 %v2358_v45, %v2358_v45  ;;  %v1584_v49 = vpack.c.bf16 %v2470_v10, %v2470_v10 }
 0x112   :  { %v1161_v2 = vadd.f32 %v1160_v13, %v1159_v5  ;;  %v1356_v17 = vadd.f32 %v1355_v12, %v1354_v9  ;;  %v2516_v29 = vpop.f32.mrf.mxu1  ;;  %1081 = vst.msk [vmem:[%s2818_s4 + $0xbc] sm:$0xf] %vm1033_vm2, %v1586_v42  ;;  %v1589_v52 = vpack.c.bf16 %v2484_v22, %v2484_v22  ;;  %v1365_v19 = vsel %vm1098_vm3, %v1267_v33, 0.0 }
 0x113   :  { %v1170_v55 = vsel %vm1098_vm3, %v2358_v45, 0.0  ;;  %v1269_v18 = vmul.f32 %v2380_v58, %v2380_v58  ;;  %1079 = vst.msk [vmem:[%s2818_s4 + $0xb4] sm:$0xf] %vm1033_vm2, %v1584_v49  ;;  %v1587_v34 = vpack.c.bf16 %v2501_v36, %v2501_v36  ;;  %v1270_v45 = vmul.f32 %v2346_v38, %v2346_v38 }
 0x114   :  { %v1358_v31 = vadd.f32 %v1357_v23, %v1356_v17  ;;  %v1163_v35 = vadd.f32 %v1162_v24, %v1161_v2  ;;  %v2533_v62 = vpop.f32.mrf.mxu1  ;;  %1084 = vst.msk [vmem:[%s2818_s4 + $0xc8] sm:$0xf] %vm1033_vm2, %v1589_v52  ;;  %v1367_v60 = vsel %vm1098_vm3, %v1268_v48, 0.0  ;;  %v1172_v63 = vsel %vm1098_vm3, %v2380_v58, 0.0 }
 0x115   :  { %1082 = vst.msk [vmem:[%s2818_s4 + $0xc0] sm:$0xf] %vm1033_vm2, %v1587_v34  ;;  %v1590_v0 = vpack.c.bf16 %v2516_v29, %v2516_v29  ;;  %v1588_v5 = vpack.c.bf16 %v2533_v62, %v2533_v62  ;;  %v1174_v12 = vsel %vm1098_vm3, %v2346_v38, 0.0  ;;  %v1271_v58 = vmul.f32 %v2368_v30, %v2368_v30 }
 0x116   :  { %v1165_v25 = vadd.f32 %v1164_v6, %v1163_v35  ;;  %v1360_v26 = vadd.f32 %v1359_v37, %v1358_v31  ;;  %v2548_v53 = vpop.f32.mrf.mxu1  ;;  %v1369_v13 = vsel %vm1098_vm3, %v1269_v18, 0.0  ;;  %v1371_v17 = vsel %vm1098_vm3, %v1270_v45, 0.0 }
 0x117   :  { %1085 = vst.msk [vmem:[%s2818_s4 + $0xcc] sm:$0xf] %vm1033_vm2, %v1590_v0  ;;  %v1593_v14 = vpack.c.bf16 %v2548_v53, %v2548_v53  ;;  %1083 = vst.msk [vmem:[%s2818_s4 + $0xc4] sm:$0xf] %vm1033_vm2, %v1588_v5  ;;  %v1176_v8 = vsel %vm1098_vm3, %v2368_v30, 0.0  ;;  %v1272_v23 = vmul.f32 %v2402_v16, %v2402_v16  ;;  %v1373_v30 = vsel %vm1098_vm3, %v1271_v58, 0.0 }
 0x118   :  { %v1167_v43 = vadd.f32 %v1166_v40, %v1165_v25  ;;  %v1362_v44 = vadd.f32 %v1361_v41, %v1360_v26  ;;  %v2565_v59 = vpop.f32.mrf.mxu1  ;;  %v1178_v11 = vsel %vm1098_vm3, %v2402_v16, 0.0  ;;  %v1273_v37 = vmul.f32 %v2424_v39, %v2424_v39 }
 0x119   :  { %1088 = vst.msk [vmem:[%s2818_s4 + $0xd8] sm:$0xf] %vm1033_vm2, %v1593_v14  ;;  %v1591_v24 = vpack.c.bf16 %v2565_v59, %v2565_v59  ;;  %v1274_v16 = vmul.f32 %v2390_v7, %v2390_v7  ;;  %v1375_v1 = vsel %vm1098_vm3, %v1272_v23, 0.0  ;;  %v1180_v40 = vsel %vm1098_vm3, %v2424_v39, 0.0 }
 0x11a   :  { %v1364_v50 = vadd.f32 %v1363_v46, %v1362_v44  ;;  %v1169_v51 = vadd.f32 %v1168_v47, %v1167_v43  ;;  %v2580_v9 = vpop.f32.mrf.mxu1  ;;  %v1182_v46 = vsel %vm1098_vm3, %v2390_v7, 0.0  ;;  %v1275_v39 = vmul.f32 %v2412_v32, %v2412_v32 }
 0x11b   :  { %v1594_v31 = vpack.c.bf16 %v2580_v9, %v2580_v9  ;;  %1086 = vst.msk [vmem:[%s2818_s4 + $0xd0] sm:$0xf] %vm1033_vm2, %v1591_v24  ;;  %v1377_v47 = vsel %vm1098_vm3, %v1273_v37, 0.0  ;;  %v1184_v52 = vsel %vm1098_vm3, %v2412_v32, 0.0  ;;  %v1186_v32 = vsel %vm1098_vm3, %v2446_v54, 0.0 }
 0x11c   :  { %v1171_v56 = vadd.f32 %v1170_v55, %v1169_v51  ;;  %v1366_v57 = vadd.f32 %v1365_v19, %v1364_v50  ;;  %v2597_v38 = vpop.f32.mrf.mxu1  ;;  %v1379_v51 = vsel %vm1098_vm3, %v1274_v16, 0.0  ;;  %v1276_v19 = vmul.f32 %v2446_v54, %v2446_v54 }
 0x11d   :  { %v1592_v6 = vpack.c.bf16 %v2597_v38, %v2597_v38  ;;  %1089 = vst.msk [vmem:[%s2818_s4 + $0xdc] sm:$0xf] %vm1033_vm2, %v1594_v31  ;;  %v1277_v45 = vmul.f32 %v2470_v10, %v2470_v10  ;;  %v1188_v5 = vsel %vm1098_vm3, %v2470_v10, 0.0  ;;  %v1282_v16 = vmul.f32 %v2484_v22, %v2484_v22 }
 0x11e   :  { %v1368_v3 = vadd.f32 %v1367_v60, %v1366_v57  ;;  %v1173_v4 = vadd.f32 %v1172_v63, %v1171_v56  ;;  %v2612_v35 = vpop.f32.mrf.mxu1  ;;  %v1381_v57 = vsel %vm1098_vm3, %v1275_v39, 0.0  ;;  %v1383_v54 = vsel %vm1098_vm3, %v1276_v19, 0.0 }
 0x11f   :  { %1087 = vst.msk [vmem:[%s2818_s4 + $0xd4] sm:$0xf] %vm1033_vm2, %v1592_v6  ;;  %v1597_v33 = vpack.c.bf16 %v2612_v35, %v2612_v35  ;;  %v1385_v10 = vsel %vm1098_vm3, %v1277_v45, 0.0  ;;  %v1194_v6 = vsel %vm1098_vm3, %v2501_v36, 0.0  ;;  %v1206_v45 = vsel %vm1098_vm3, %v2548_v53, 0.0 }
 0x120   :  { %v1175_v15 = vadd.f32 %v1174_v12, %v1173_v4  ;;  %v1370_v2 = vadd.f32 %v1369_v13, %v1368_v3  ;;  %v2629_v26 = vpop.f32.mrf.mxu1  ;;  %v1278_v4 = vmul.f32 %v2434_v20, %v2434_v20 }
 0x121   :  { %v1595_v43 = vpack.c.bf16 %v2629_v26, %v2629_v26  ;;  %1092 = vst.msk [vmem:[%s2818_s4 + $0xe8] sm:$0xf] %vm1033_vm2, %v1597_v33 }
 0x122   :  { %v1372_v27 = vadd.f32 %v1371_v17, %v1370_v2  ;;  %v1177_v28 = vadd.f32 %v1176_v8, %v1175_v15  ;;  %v2644_v44 = vpop.f32.mrf.mxu1  ;;  %v1190_v15 = vsel %vm1098_vm3, %v2434_v20, 0.0  ;;  %v1279_v2 = vmul.f32 %v2456_v61, %v2456_v61 }
 0x123   :  { %v1598_v48 = vpack.c.bf16 %v2644_v44, %v2644_v44  ;;  %1090 = vst.msk [vmem:[%s2818_s4 + $0xe0] sm:$0xf] %vm1033_vm2, %v1595_v43  ;;  %v1192_v20 = vsel %vm1098_vm3, %v2456_v61, 0.0  ;;  %v1281_v61 = vmul.f32 %v2533_v62, %v2533_v62 }
 0x124   :  { %v1179_v21 = vadd.f32 %v1178_v11, %v1177_v28  ;;  %v1374_v25 = vadd.f32 %v1373_v30, %v1372_v27  ;;  %v2661_v7 = vpop.f32.mrf.mxu1  ;;  %v1387_v27 = vsel %vm1098_vm3, %v1278_v4, 0.0  ;;  %v1280_v28 = vmul.f32 %v2501_v36, %v2501_v36 }
 0x125   :  { %1093 = vst.msk [vmem:[%s2818_s4 + $0xec] sm:$0xf] %vm1033_vm2, %v1598_v48  ;;  %v1596_v55 = vpack.c.bf16 %v2661_v7, %v2661_v7  ;;  %v1389_v37 = vsel %vm1098_vm3, %v1279_v2, 0.0  ;;  %v1393_v43 = vsel %vm1098_vm3, %v1281_v61, 0.0  ;;  %v1200_v48 = vsel %vm1098_vm3, %v2516_v29, 0.0 }
 0x126   :  { %v1376_v41 = vadd.f32 %v1375_v1, %v1374_v25  ;;  %v1181_v42 = vadd.f32 %v1180_v40, %v1179_v21  ;;  %v2674_v56 = vpop.f32.mrf.mxu1  ;;  %v1391_v1 = vsel %vm1098_vm3, %v1280_v28, 0.0  ;;  %v1196_v40 = vsel %vm1098_vm3, %v2533_v62, 0.0 }
 0x127   :  { %1091 = vst.msk [vmem:[%s2818_s4 + $0xe4] sm:$0xf] %vm1033_vm2, %v1596_v55  ;;  %v1601_v60 = vpack.c.bf16 %v2674_v56, %v2674_v56  ;;  %v1284_v62 = vmul.f32 %v2565_v59, %v2565_v59 }
 0x128   :  { %v1183_v49 = vadd.f32 %v1182_v46, %v1181_v42  ;;  %v1378_v50 = vadd.f32 %v1377_v47, %v1376_v41  ;;  %v2687_v3 = vpop.f32.mrf.mxu1  ;;  %v1198_v41 = vsel %vm1098_vm3, %v2484_v22, 0.0  ;;  %v1283_v42 = vmul.f32 %v2516_v29, %v2516_v29 }
 0x129   :  { %1096 = vst.msk [vmem:[%s2818_s4 + $0xf8] sm:$0xf] %vm1033_vm2, %v1601_v60  ;;  %v1599_v12 = vpack.c.bf16 %v2687_v3, %v2687_v3  ;;  %v1395_v47 = vsel %vm1098_vm3, %v1282_v16, 0.0  ;;  %v1202_v22 = vsel %vm1098_vm3, %v2565_v59, 0.0  ;;  %v1399_v29 = vsel %vm1098_vm3, %v1284_v62, 0.0 }
 0x12a   :  { %v1380_v18 = vadd.f32 %v1379_v51, %v1378_v50  ;;  %v1185_v34 = vadd.f32 %v1184_v52, %v1183_v49  ;;  %v2700_v14 = vpop.f32.mrf.mxu1  ;;  %v1397_v51 = vsel %vm1098_vm3, %v1283_v42, 0.0  ;;  %v1285_v52 = vmul.f32 %v2597_v38, %v2597_v38 }
 0x12b   :  { %1094 = vst.msk [vmem:[%s2818_s4 + $0xf0] sm:$0xf] %vm1033_vm2, %v1599_v12  ;;  %v1602_v17 = vpack.c.bf16 %v2700_v14, %v2700_v14  ;;  %v1287_v59 = vmul.f32 %v2580_v9, %v2580_v9 }
 0x12c   :  { %v1187_v63 = vadd.f32 %v1186_v32, %v1185_v34  ;;  %v1382_v0 = vadd.f32 %v1381_v57, %v1380_v18  ;;  %v2713_v24 = vpop.f32.mrf.mxu1  ;;  %v1286_v18 = vmul.f32 %v2548_v53, %v2548_v53  ;;  %v1204_v34 = vsel %vm1098_vm3, %v2597_v38, 0.0 }
 0x12d   :  { %1097 = vst.msk [vmem:[%s2818_s4 + $0xfc] sm:$0xf] %vm1033_vm2, %v1602_v17  ;;  %v1600_v31 = vpack.c.bf16 %v2713_v24, %v2713_v24  ;;  %v1401_v60 = vsel %vm1098_vm3, %v1285_v52, 0.0  ;;  %v1288_v38 = vmul.f32 %v2629_v26, %v2629_v26  ;;  %v1210_v53 = vsel %vm1098_vm3, %v2629_v26, 0.0 }
 0x12e   :  { %v1384_v58 = vadd.f32 %v1383_v54, %v1382_v0  ;;  %v1189_v13 = vadd.f32 %v1188_v5, %v1187_v63  ;;  %v1403_v4 = vsel %vm1098_vm3, %v1286_v18, 0.0  ;;  %v1208_v54 = vsel %vm1098_vm3, %v2580_v9, 0.0 }
 0x12f   :  { %1095 = vst.msk [vmem:[%s2818_s4 + $0xf4] sm:$0xf] %vm1033_vm2, %v1600_v31  ;;  %v1407_v9 = vsel %vm1098_vm3, %v1288_v38, 0.0  ;;  %v1212_v17 = vsel %vm1098_vm3, %v2661_v7, 0.0  ;;  %v1291_v26 = vmul.f32 %v2644_v44, %v2644_v44 }
 0x130   :  { %v1191_v8 = vadd.f32 %v1190_v15, %v1189_v13  ;;  %v1386_v23 = vadd.f32 %v1385_v10, %v1384_v58  ;;  %v1405_v58 = vsel %vm1098_vm3, %v1287_v59, 0.0  ;;  %v1289_v13 = vmul.f32 %v2661_v7, %v2661_v7 }
 0x131   :  { %v1290_v10 = vmul.f32 %v2612_v35, %v2612_v35  ;;  %v1292_v7 = vmul.f32 %v2687_v3, %v2687_v3  ;;  %v1413_v61 = vsel %vm1098_vm3, %v1291_v26, 0.0 }
 0x132   :  { %v1388_v30 = vadd.f32 %v1387_v27, %v1386_v23  ;;  %v1193_v11 = vadd.f32 %v1192_v20, %v1191_v8  ;;  %v1214_v27 = vsel %vm1098_vm3, %v2612_v35, 0.0  ;;  %v1409_v20 = vsel %vm1098_vm3, %v1289_v13, 0.0 }
 0x133   :  { %v1218_v35 = vsel %vm1098_vm3, %v2687_v3, 0.0  ;;  %v1295_v3 = vmul.f32 %v2700_v14, %v2700_v14 }
 0x134   :  { %v1195_v21 = vadd.f32 %v1194_v6, %v1193_v11  ;;  %v1390_v25 = vadd.f32 %v1389_v37, %v1388_v30  ;;  %v1411_v30 = vsel %vm1098_vm3, %v1290_v10, 0.0  ;;  %v1216_v11 = vsel %vm1098_vm3, %v2644_v44, 0.0 }
 0x135   :  { %v1415_v44 = vsel %vm1098_vm3, %v1292_v7, 0.0 }
 0x136   :  { %v1392_v33 = vadd.f32 %v1391_v1, %v1390_v25  ;;  %v1197_v36 = vadd.f32 %v1196_v40, %v1195_v21  ;;  %v1293_v21 = vmul.f32 %v2713_v24, %v2713_v24  ;;  %v1294_v1 = vmul.f32 %v2674_v56, %v2674_v56 }
 0x137   :  { %v1220_v40 = vsel %vm1098_vm3, %v2713_v24, 0.0  ;;  %v1421_v24 = vsel %vm1098_vm3, %v1295_v3, 0.0 }
 0x138   :  { %v1199_v46 = vadd.f32 %v1198_v41, %v1197_v36  ;;  %v1394_v39 = vadd.f32 %v1393_v43, %v1392_v33  ;;  %v1222_v41 = vsel %vm1098_vm3, %v2674_v56, 0.0  ;;  %v1417_v42 = vsel %vm1098_vm3, %v1293_v21, 0.0 }
 0x13a   :  { %v1396_v49 = vadd.f32 %v1395_v47, %v1394_v39  ;;  %v1201_v50 = vadd.f32 %v1200_v48, %v1199_v46  ;;  %v1419_v39 = vsel %vm1098_vm3, %v1294_v1, 0.0  ;;  %v1224_v47 = vsel %vm1098_vm3, %v2700_v14, 0.0 }
 0x13c   :  { %v1203_v19 = vadd.f32 %v1202_v22, %v1201_v50  ;;  %v1398_v55 = vadd.f32 %v1397_v51, %v1396_v49 }
 0x13e   :  { %v1400_v57 = vadd.f32 %v1399_v29, %v1398_v55  ;;  %v1205_v32 = vadd.f32 %v1204_v34, %v1203_v19 }
 0x140   :  { %v1207_v63 = vadd.f32 %v1206_v45, %v1205_v32  ;;  %v1402_v0 = vadd.f32 %v1401_v60, %v1400_v57 }
 0x142   :  { %v1404_v5 = vadd.f32 %v1403_v4, %v1402_v0  ;;  %v1209_v12 = vadd.f32 %v1208_v54, %v1207_v63 }
 0x144   :  { %v1211_v15 = vadd.f32 %v1210_v53, %v1209_v12  ;;  %v1406_v2 = vadd.f32 %v1405_v58, %v1404_v5 }
 0x146   :  { %v1408_v8 = vadd.f32 %v1407_v9, %v1406_v2  ;;  %v1213_v23 = vadd.f32 %v1212_v17, %v1211_v15 }
 0x148   :  { %v1215_v28 = vadd.f32 %v1214_v27, %v1213_v23  ;;  %v1410_v31 = vadd.f32 %v1409_v20, %v1408_v8 }
 0x14a   :  { %v1412_v37 = vadd.f32 %v1411_v30, %v1410_v31  ;;  %v1217_v6 = vadd.f32 %v1216_v11, %v1215_v28 }
 0x14c   :  { %v1219_v25 = vadd.f32 %v1218_v35, %v1217_v6  ;;  %v1414_v16 = vadd.f32 %v1413_v61, %v1412_v37 }
 0x14e   :  { %v1416_v33 = vadd.f32 %v1415_v44, %v1414_v16  ;;  %v1221_v36 = vadd.f32 %v1220_v40, %v1219_v25 }
 0x150   :  { %v1223_v43 = vadd.f32 %v1222_v41, %v1221_v36  ;;  %v1418_v46 = vadd.f32 %v1417_v42, %v1416_v33 }
 0x152   :  { %v1225_v48 = vadd.f32 %v1224_v47, %v1223_v43  ;;  %v1420_v62 = vadd.f32 %v1419_v39, %v1418_v46 }
 0x154   :  { %v1226_v49 = vrot.slane %v1225_v48, 4  ;;  %v1422_v50 = vadd.f32 %v1421_v24, %v1420_v62 }
 0x156   :  { %v1227_v51 = vadd.f32 %v1226_v49, %v1225_v48  ;;  %v1423_v56 = vrot.slane %v1422_v50, 4 }
 0x158   :  { %v1228_v22 = vrot.slane %v1227_v51, 2  ;;  %v1424_v52 = vadd.f32 %v1423_v56, %v1422_v50 }
 0x15a   :  { %v1229_v19 = vadd.f32 %v1228_v22, %v1227_v51  ;;  %v1425_v55 = vrot.slane %v1424_v52, 2 }
 0x15c   :  { %v1230_v18 = vrot.slane %v1229_v19, 1  ;;  %v1426_v29 = vadd.f32 %v1425_v55, %v1424_v52 }
 0x15e   :  { %v1427_v34 = vrot.slane %v1426_v29, 1  ;;  %v1231_v57 = vadd.f32 %v1230_v18, %v1229_v19 }
 0x160   :  { %v1428_v32 = vadd.f32 %v1427_v34, %v1426_v29 }
 0x162   :  { %v1430_v45 = vsel %vm1429_vm4, %v1231_v57, %v1428_v32 }
 0x163   :  { %v1431_v14 = vsel %vm484_vm0, %v1430_v45, 0.0 }
 0x164   :  { %1432 = vst.msk [vmem:[%s2819_s5] sm:$0xff] %vm1098_vm3, %v1431_v14 }

</bundles_post_ra>
